<compile_context>
chip_gen: v6e
topology: v6e:2x2x1
jax: 0.10.0
libtpu: 0.0.40
codegen_flags: <defaults>
</compile_context>

<pallas_src>
import functools

import numpy as np
import jax
import jax.numpy as jnp
from jax import lax
from jax.experimental import pallas as pl
from jax.experimental.pallas import tpu as pltpu


# ---------------------------------------------------------------------------
# Pallas kernel: fused 3x3 "same" conv + folded BN affine + ReLU
# ---------------------------------------------------------------------------
def _conv3x3_bn_relu_kernel(xp_ref, w_ref, b_ref, o_ref, *, H, W, relu):
    """One image x one Cout tile.

    xp_ref: (1, H+2, W+2, Cin)  bf16  zero-padded input image (resident in VMEM)
    w_ref : (9, Cin, TN)        bf16  3x3 taps, BN scale pre-folded into columns
    b_ref : (1, TN)             f32   conv bias + BN shift, pre-folded
    o_ref : (1, H*W, TN)
    """
    tn = o_ref.shape[-1]
    acc = jnp.zeros((H * W, tn), jnp.float32)
    # In-kernel im2col: 9 shifted windows read straight from the VMEM tile.
    for t in range(9):
        dy, dx = t // 3, t % 3
        patch = xp_ref[0, dy:dy + H, dx:dx + W, :].reshape(H * W, -1)
        acc += jnp.dot(patch, w_ref[t], preferred_element_type=jnp.float32)
    acc = acc + b_ref[...]
    if relu:
        acc = jnp.maximum(acc, 0.0)
    o_ref[0] = acc.astype(o_ref.dtype)


def conv3x3_bn_relu(x, w_eff, b_eff, *, relu=True, out_dtype=jnp.float32):
    """x: (N,H,W,Cin) NHWC; w_eff: (3,3,Cin,Cout) BN-scale folded; b_eff: (Cout,).

    Returns (N,H,W,Cout) in out_dtype. bf16 MXU operands, f32 accumulation.
    """
    N, H, W, Cin = x.shape
    Cout = w_eff.shape[-1]
    TN = 128 if Cout % 128 == 0 else Cout  # lane-dense Cout tiles when possible

    xp = jnp.pad(x, ((0, 0), (1, 1), (1, 1), (0, 0))).astype(jnp.bfloat16)
    w9 = w_eff.reshape(9, Cin, Cout).astype(jnp.bfloat16)
    b2 = b_eff.reshape(1, Cout).astype(jnp.float32)

    kernel = functools.partial(_conv3x3_bn_relu_kernel, H=H, W=W, relu=relu)
    y = pl.pallas_call(
        kernel,
        out_shape=jax.ShapeDtypeStruct((N, H * W, Cout), out_dtype),
        grid=(N, Cout // TN),
        in_specs=[
            pl.BlockSpec((1, H + 2, W + 2, Cin), lambda n, j: (n, 0, 0, 0)),
            pl.BlockSpec((9, Cin, TN), lambda n, j: (0, 0, j)),
            pl.BlockSpec((1, TN), lambda n, j: (0, j)),
        ],
        out_specs=pl.BlockSpec((1, H * W, TN), lambda n, j: (n, 0, j)),
        # Tiles are tiny (<1 MiB); default scoped-VMEM limit is ample on all
        # generations, so no vmem_limit_bytes override (v7x has only 64 MiB).
        compiler_params=pltpu.CompilerParams(
            dimension_semantics=("parallel", "parallel")),
    )(xp, w9, b2)
    return y.reshape(N, H, W, Cout)


# ---------------------------------------------------------------------------
# Host-side BN folding (eval-mode / running stats) and ConvBlock forward
# ---------------------------------------------------------------------------
def fold_bn(w_hwio, conv_bias, gamma, beta, mean, var, eps=1e-5):
    scale = gamma / jnp.sqrt(var + eps)           # (Cout,)
    w_eff = w_hwio * scale                        # fold scale into weight cols
    b_eff = (conv_bias - mean) * scale + beta     # fold conv bias + BN shift
    return w_eff, b_eff


def conv_block(params, x_nhwc):
    w1, b1 = fold_bn(params['w1'], params['cb1'], params['g1'], params['be1'],
                     params['m1'], params['v1'])
    w2, b2 = fold_bn(params['w2'], params['cb2'], params['g2'], params['be2'],
                     params['m2'], params['v2'])
    h = conv3x3_bn_relu(x_nhwc, w1, b1, relu=True, out_dtype=jnp.bfloat16)
    y = conv3x3_bn_relu(h, w2, b2, relu=True, out_dtype=jnp.float32)
    return y


# ---------------------------------------------------------------------------
# Pure-JAX reference (mirrors the kernel's bf16 operand quantization)
# ---------------------------------------------------------------------------
def _ref_conv3x3_bn_relu(x, w_eff, b_eff):
    xq = x.astype(jnp.bfloat16).astype(jnp.float32)
    wq = w_eff.astype(jnp.bfloat16).astype(jnp.float32)
    y = lax.conv_general_dilated(
        xq, wq, window_strides=(1, 1), padding='SAME',
        dimension_numbers=('NHWC', 'HWIO', 'NHWC'))
    return jnp.maximum(y + b_eff, 0.0)


def ref_conv_block(params, x_nhwc):
    w1, b1 = fold_bn(params['w1'], params['cb1'], params['g1'], params['be1'],
                     params['m1'], params['v1'])
    w2, b2 = fold_bn(params['w2'], params['cb2'], params['g2'], params['be2'],
                     params['m2'], params['v2'])
    h = _ref_conv3x3_bn_relu(x_nhwc, w1, b1)
    h = h.astype(jnp.bfloat16).astype(jnp.float32)   # mirror bf16 intermediate
    return _ref_conv3x3_bn_relu(h, w2, b2)


# ---------------------------------------------------------------------------
# Deterministic parameter initialization (shapes match the torch module)
# ---------------------------------------------------------------------------
def init_params(key, in_channels, out_channels):
    ks = jax.random.split(key, 12)

    def conv_w(k, cin, cout):
        return jax.random.normal(k, (3, 3, cin, cout),
                                 jnp.float32) / np.sqrt(9 * cin)

    return dict(
        # conv1 + bn1 (non-trivial BN stats to exercise the fold)
        w1=conv_w(ks[0], in_channels, out_channels),
        cb1=0.01 * jax.random.normal(ks[1], (out_channels,), jnp.float32),
        g1=1.0 + 0.1 * jax.random.normal(ks[2], (out_channels,), jnp.float32),
        be1=0.1 * jax.random.normal(ks[3], (out_channels,), jnp.float32),
        m1=0.1 * jax.random.normal(ks[4], (out_channels,), jnp.float32),
        v1=1.0 + 0.1 * jax.random.uniform(ks[5], (out_channels,), jnp.float32),
        # conv2 + bn2
        w2=conv_w(ks[6], out_channels, out_channels),
        cb2=0.01 * jax.random.normal(ks[7], (out_channels,), jnp.float32),
        g2=1.0 + 0.1 * jax.random.normal(ks[8], (out_channels,), jnp.float32),
        be2=0.1 * jax.random.normal(ks[9], (out_channels,), jnp.float32),
        m2=0.1 * jax.random.normal(ks[10], (out_channels,), jnp.float32),
        v2=1.0 + 0.1 * jax.random.uniform(ks[11], (out_channels,), jnp.float32),
    )


# ---------------------------------------------------------------------------
if __name__ == "__main__":
    key = jax.random.PRNGKey(0)
    pkey, xkey = jax.random.split(key)

    N, in_channels, H, W = 2, 4, 16, 16
    out_channels = 128                      # lane-dense Cout (128-lane tiles)
    params = init_params(pkey, in_channels, out_channels)

    # PyTorch-style NCHW input, transposed to NHWC at the boundary.
    x_nchw = jax.random.normal(xkey, (N, in_channels, H, W), dtype=jnp.float32)
    x_nhwc = jnp.transpose(x_nchw, (0, 2, 3, 1))

    y_nhwc = conv_block(params, x_nhwc)
    y_nchw = jnp.transpose(y_nhwc, (0, 3, 1, 2))
    y_nchw = jax.block_until_ready(y_nchw)

    assert y_nchw.shape == (N, out_channels, H, W), y_nchw.shape
    assert bool(jnp.isfinite(y_nchw).all())

    # Correctness check vs. pure-JAX reference (same bf16 operand rounding).
    y_ref = jnp.transpose(ref_conv_block(params, x_nhwc), (0, 3, 1, 2))
    np.testing.assert_allclose(np.asarray(y_nchw), np.asarray(y_ref),
                               rtol=2e-2, atol=2e-2)
    print("KERNEL_OK")
</pallas_src>

<mosaic_0001>
module attributes {stable_mosaic.version = 11 : i64} {
  func.func @_conv3x3_bn_relu_kernel(%arg0: i32, %arg1: i32, %arg2: memref<1x18x18x4xbf16, #tpu.memory_space<vmem>>, %arg3: memref<9x4x128xbf16, #tpu.memory_space<vmem>>, %arg4: memref<1x128xf32, #tpu.memory_space<vmem>>, %arg5: memref<1x256x128xbf16, #tpu.memory_space<vmem>>) attributes {dimension_semantics = [#tpu.dimension_semantics<parallel>, #tpu.dimension_semantics<parallel>], iteration_bounds = array<i64: 2, 1>, scalar_prefetch = 0 : i64, scratch_operands = 0 : i64, tpu.core_type = #tpu.core_type<tc>, window_params = [{transform_indices = @transform_0, window_bounds = array<i64: 1, 18, 18, 4>}, {transform_indices = @transform_1, window_bounds = array<i64: 9, 4, 128>}, {transform_indices = @transform_2, window_bounds = array<i64: 1, 128>}, {transform_indices = @transform_3, window_bounds = array<i64: 1, 256, 128>}]} {
    %cst = arith.constant 0.000000e+00 : f32
    %0 = vector.broadcast %cst : f32 to vector<256x128xf32>
    %c0 = arith.constant 0 : index
    %c0_0 = arith.constant 0 : index
    %c0_1 = arith.constant 0 : index
    %c0_2 = arith.constant 0 : index
    %1 = vector.load %arg2[%c0, %c0_0, %c0_1, %c0_2] : memref<1x18x18x4xbf16, #tpu.memory_space<vmem>>, vector<1x16x16x4xbf16>
    %2 = vector.shape_cast %1 : vector<1x16x16x4xbf16> to vector<16x16x4xbf16>
    %3 = vector.shape_cast %2 : vector<16x16x4xbf16> to vector<256x4xbf16>
    %c0_3 = arith.constant 0 : index
    %c0_4 = arith.constant 0 : index
    %c0_5 = arith.constant 0 : index
    %4 = vector.load %arg3[%c0_3, %c0_4, %c0_5] : memref<9x4x128xbf16, #tpu.memory_space<vmem>>, vector<1x4x128xbf16>
    %5 = vector.shape_cast %4 : vector<1x4x128xbf16> to vector<4x128xbf16>
    %cst_6 = arith.constant dense<0.000000e+00> : vector<256x128xf32>
    %6 = tpu.matmul %3, %5, %cst_6 {dimension_numbers = #tpu.dot_dimension_numbers<[1], [0], [0], [1], [0, 0, 1, 1], [], []>} : vector<256x4xbf16>, vector<4x128xbf16>, vector<256x128xf32> -> vector<256x128xf32>
    %7 = arith.addf %0, %6 : vector<256x128xf32>
    %c0_7 = arith.constant 0 : index
    %c0_8 = arith.constant 0 : index
    %c1 = arith.constant 1 : index
    %c0_9 = arith.constant 0 : index
    %8 = vector.load %arg2[%c0_7, %c0_8, %c1, %c0_9] : memref<1x18x18x4xbf16, #tpu.memory_space<vmem>>, vector<1x16x16x4xbf16>
    %9 = vector.shape_cast %8 : vector<1x16x16x4xbf16> to vector<16x16x4xbf16>
    %10 = vector.shape_cast %9 : vector<16x16x4xbf16> to vector<256x4xbf16>
    %c1_10 = arith.constant 1 : index
    %c0_11 = arith.constant 0 : index
    %c0_12 = arith.constant 0 : index
    %11 = vector.load %arg3[%c1_10, %c0_11, %c0_12] : memref<9x4x128xbf16, #tpu.memory_space<vmem>>, vector<1x4x128xbf16>
    %12 = vector.shape_cast %11 : vector<1x4x128xbf16> to vector<4x128xbf16>
    %cst_13 = arith.constant dense<0.000000e+00> : vector<256x128xf32>
    %13 = tpu.matmul %10, %12, %cst_13 {dimension_numbers = #tpu.dot_dimension_numbers<[1], [0], [0], [1], [0, 0, 1, 1], [], []>} : vector<256x4xbf16>, vector<4x128xbf16>, vector<256x128xf32> -> vector<256x128xf32>
    %14 = arith.addf %7, %13 : vector<256x128xf32>
    %c0_14 = arith.constant 0 : index
    %c0_15 = arith.constant 0 : index
    %c2 = arith.constant 2 : index
    %c0_16 = arith.constant 0 : index
    %15 = vector.load %arg2[%c0_14, %c0_15, %c2, %c0_16] : memref<1x18x18x4xbf16, #tpu.memory_space<vmem>>, vector<1x16x16x4xbf16>
    %16 = vector.shape_cast %15 : vector<1x16x16x4xbf16> to vector<16x16x4xbf16>
    %17 = vector.shape_cast %16 : vector<16x16x4xbf16> to vector<256x4xbf16>
    %c2_17 = arith.constant 2 : index
    %c0_18 = arith.constant 0 : index
    %c0_19 = arith.constant 0 : index
    %18 = vector.load %arg3[%c2_17, %c0_18, %c0_19] : memref<9x4x128xbf16, #tpu.memory_space<vmem>>, vector<1x4x128xbf16>
    %19 = vector.shape_cast %18 : vector<1x4x128xbf16> to vector<4x128xbf16>
    %cst_20 = arith.constant dense<0.000000e+00> : vector<256x128xf32>
    %20 = tpu.matmul %17, %19, %cst_20 {dimension_numbers = #tpu.dot_dimension_numbers<[1], [0], [0], [1], [0, 0, 1, 1], [], []>} : vector<256x4xbf16>, vector<4x128xbf16>, vector<256x128xf32> -> vector<256x128xf32>
    %21 = arith.addf %14, %20 : vector<256x128xf32>
    %c0_21 = arith.constant 0 : index
    %c1_22 = arith.constant 1 : index
    %c0_23 = arith.constant 0 : index
    %c0_24 = arith.constant 0 : index
    %22 = vector.load %arg2[%c0_21, %c1_22, %c0_23, %c0_24] : memref<1x18x18x4xbf16, #tpu.memory_space<vmem>>, vector<1x16x16x4xbf16>
    %23 = vector.shape_cast %22 : vector<1x16x16x4xbf16> to vector<16x16x4xbf16>
    %24 = vector.shape_cast %23 : vector<16x16x4xbf16> to vector<256x4xbf16>
    %c3 = arith.constant 3 : index
    %c0_25 = arith.constant 0 : index
    %c0_26 = arith.constant 0 : index
    %25 = vector.load %arg3[%c3, %c0_25, %c0_26] : memref<9x4x128xbf16, #tpu.memory_space<vmem>>, vector<1x4x128xbf16>
    %26 = vector.shape_cast %25 : vector<1x4x128xbf16> to vector<4x128xbf16>
    %cst_27 = arith.constant dense<0.000000e+00> : vector<256x128xf32>
    %27 = tpu.matmul %24, %26, %cst_27 {dimension_numbers = #tpu.dot_dimension_numbers<[1], [0], [0], [1], [0, 0, 1, 1], [], []>} : vector<256x4xbf16>, vector<4x128xbf16>, vector<256x128xf32> -> vector<256x128xf32>
    %28 = arith.addf %21, %27 : vector<256x128xf32>
    %c0_28 = arith.constant 0 : index
    %c1_29 = arith.constant 1 : index
    %c1_30 = arith.constant 1 : index
    %c0_31 = arith.constant 0 : index
    %29 = vector.load %arg2[%c0_28, %c1_29, %c1_30, %c0_31] : memref<1x18x18x4xbf16, #tpu.memory_space<vmem>>, vector<1x16x16x4xbf16>
    %30 = vector.shape_cast %29 : vector<1x16x16x4xbf16> to vector<16x16x4xbf16>
    %31 = vector.shape_cast %30 : vector<16x16x4xbf16> to vector<256x4xbf16>
    %c4 = arith.constant 4 : index
    %c0_32 = arith.constant 0 : index
    %c0_33 = arith.constant 0 : index
    %32 = vector.load %arg3[%c4, %c0_32, %c0_33] : memref<9x4x128xbf16, #tpu.memory_space<vmem>>, vector<1x4x128xbf16>
    %33 = vector.shape_cast %32 : vector<1x4x128xbf16> to vector<4x128xbf16>
    %cst_34 = arith.constant dense<0.000000e+00> : vector<256x128xf32>
    %34 = tpu.matmul %31, %33, %cst_34 {dimension_numbers = #tpu.dot_dimension_numbers<[1], [0], [0], [1], [0, 0, 1, 1], [], []>} : vector<256x4xbf16>, vector<4x128xbf16>, vector<256x128xf32> -> vector<256x128xf32>
    %35 = arith.addf %28, %34 : vector<256x128xf32>
    %c0_35 = arith.constant 0 : index
    %c1_36 = arith.constant 1 : index
    %c2_37 = arith.constant 2 : index
    %c0_38 = arith.constant 0 : index
    %36 = vector.load %arg2[%c0_35, %c1_36, %c2_37, %c0_38] : memref<1x18x18x4xbf16, #tpu.memory_space<vmem>>, vector<1x16x16x4xbf16>
    %37 = vector.shape_cast %36 : vector<1x16x16x4xbf16> to vector<16x16x4xbf16>
    %38 = vector.shape_cast %37 : vector<16x16x4xbf16> to vector<256x4xbf16>
    %c5 = arith.constant 5 : index
    %c0_39 = arith.constant 0 : index
    %c0_40 = arith.constant 0 : index
    %39 = vector.load %arg3[%c5, %c0_39, %c0_40] : memref<9x4x128xbf16, #tpu.memory_space<vmem>>, vector<1x4x128xbf16>
    %40 = vector.shape_cast %39 : vector<1x4x128xbf16> to vector<4x128xbf16>
    %cst_41 = arith.constant dense<0.000000e+00> : vector<256x128xf32>
    %41 = tpu.matmul %38, %40, %cst_41 {dimension_numbers = #tpu.dot_dimension_numbers<[1], [0], [0], [1], [0, 0, 1, 1], [], []>} : vector<256x4xbf16>, vector<4x128xbf16>, vector<256x128xf32> -> vector<256x128xf32>
    %42 = arith.addf %35, %41 : vector<256x128xf32>
    %c0_42 = arith.constant 0 : index
    %c2_43 = arith.constant 2 : index
    %c0_44 = arith.constant 0 : index
    %c0_45 = arith.constant 0 : index
    %43 = vector.load %arg2[%c0_42, %c2_43, %c0_44, %c0_45] : memref<1x18x18x4xbf16, #tpu.memory_space<vmem>>, vector<1x16x16x4xbf16>
    %44 = vector.shape_cast %43 : vector<1x16x16x4xbf16> to vector<16x16x4xbf16>
    %45 = vector.shape_cast %44 : vector<16x16x4xbf16> to vector<256x4xbf16>
    %c6 = arith.constant 6 : index
    %c0_46 = arith.constant 0 : index
    %c0_47 = arith.constant 0 : index
    %46 = vector.load %arg3[%c6, %c0_46, %c0_47] : memref<9x4x128xbf16, #tpu.memory_space<vmem>>, vector<1x4x128xbf16>
    %47 = vector.shape_cast %46 : vector<1x4x128xbf16> to vector<4x128xbf16>
    %cst_48 = arith.constant dense<0.000000e+00> : vector<256x128xf32>
    %48 = tpu.matmul %45, %47, %cst_48 {dimension_numbers = #tpu.dot_dimension_numbers<[1], [0], [0], [1], [0, 0, 1, 1], [], []>} : vector<256x4xbf16>, vector<4x128xbf16>, vector<256x128xf32> -> vector<256x128xf32>
    %49 = arith.addf %42, %48 : vector<256x128xf32>
    %c0_49 = arith.constant 0 : index
    %c2_50 = arith.constant 2 : index
    %c1_51 = arith.constant 1 : index
    %c0_52 = arith.constant 0 : index
    %50 = vector.load %arg2[%c0_49, %c2_50, %c1_51, %c0_52] : memref<1x18x18x4xbf16, #tpu.memory_space<vmem>>, vector<1x16x16x4xbf16>
    %51 = vector.shape_cast %50 : vector<1x16x16x4xbf16> to vector<16x16x4xbf16>
    %52 = vector.shape_cast %51 : vector<16x16x4xbf16> to vector<256x4xbf16>
    %c7 = arith.constant 7 : index
    %c0_53 = arith.constant 0 : index
    %c0_54 = arith.constant 0 : index
    %53 = vector.load %arg3[%c7, %c0_53, %c0_54] : memref<9x4x128xbf16, #tpu.memory_space<vmem>>, vector<1x4x128xbf16>
    %54 = vector.shape_cast %53 : vector<1x4x128xbf16> to vector<4x128xbf16>
    %cst_55 = arith.constant dense<0.000000e+00> : vector<256x128xf32>
    %55 = tpu.matmul %52, %54, %cst_55 {dimension_numbers = #tpu.dot_dimension_numbers<[1], [0], [0], [1], [0, 0, 1, 1], [], []>} : vector<256x4xbf16>, vector<4x128xbf16>, vector<256x128xf32> -> vector<256x128xf32>
    %56 = arith.addf %49, %55 : vector<256x128xf32>
    %c0_56 = arith.constant 0 : index
    %c2_57 = arith.constant 2 : index
    %c2_58 = arith.constant 2 : index
    %c0_59 = arith.constant 0 : index
    %57 = vector.load %arg2[%c0_56, %c2_57, %c2_58, %c0_59] : memref<1x18x18x4xbf16, #tpu.memory_space<vmem>>, vector<1x16x16x4xbf16>
    %58 = vector.shape_cast %57 : vector<1x16x16x4xbf16> to vector<16x16x4xbf16>
    %59 = vector.shape_cast %58 : vector<16x16x4xbf16> to vector<256x4xbf16>
    %c8 = arith.constant 8 : index
    %c0_60 = arith.constant 0 : index
    %c0_61 = arith.constant 0 : index
    %60 = vector.load %arg3[%c8, %c0_60, %c0_61] : memref<9x4x128xbf16, #tpu.memory_space<vmem>>, vector<1x4x128xbf16>
    %61 = vector.shape_cast %60 : vector<1x4x128xbf16> to vector<4x128xbf16>
    %cst_62 = arith.constant dense<0.000000e+00> : vector<256x128xf32>
    %62 = tpu.matmul %59, %61, %cst_62 {dimension_numbers = #tpu.dot_dimension_numbers<[1], [0], [0], [1], [0, 0, 1, 1], [], []>} : vector<256x4xbf16>, vector<4x128xbf16>, vector<256x128xf32> -> vector<256x128xf32>
    %63 = arith.addf %56, %62 : vector<256x128xf32>
    %c0_63 = arith.constant 0 : index
    %c0_64 = arith.constant 0 : index
    %64 = vector.load %arg4[%c0_63, %c0_64] : memref<1x128xf32, #tpu.memory_space<vmem>>, vector<1x128xf32>
    %65 = vector.broadcast %64 : vector<1x128xf32> to vector<256x128xf32>
    %66 = arith.addf %63, %65 : vector<256x128xf32>
    %cst_65 = arith.constant 0.000000e+00 : f32
    %67 = vector.broadcast %cst_65 : f32 to vector<256x128xf32>
    %68 = arith.maximumf %66, %67 : vector<256x128xf32>
    %69 = arith.truncf %68 : vector<256x128xf32> to vector<256x128xbf16>
    %c0_66 = arith.constant 0 : index
    %c0_67 = arith.constant 0 : index
    %c0_68 = arith.constant 0 : index
    %70 = vector.load %arg5[%c0_66, %c0_67, %c0_68] : memref<1x256x128xbf16, #tpu.memory_space<vmem>>, vector<1x256x128xbf16>
    %71 = vector.shape_cast %70 : vector<1x256x128xbf16> to vector<256x128xbf16>
    %72 = vector.shape_cast %69 : vector<256x128xbf16> to vector<1x256x128xbf16>
    tpu.vector_store %arg5[%c0_66, %c0_67, %c0_68], %72 {strides = array<i32>} : memref<1x256x128xbf16, #tpu.memory_space<vmem>>, vector<1x256x128xbf16>,
    return
  }
  func.func @transform_0(%arg0: i32, %arg1: i32) -> (i32, i32, i32, i32) {
    %c0_i32 = arith.constant 0 : i32
    %c0_i32_0 = arith.constant 0 : i32
    %c0_i32_1 = arith.constant 0 : i32
    %c0_i32_2 = arith.constant 0 : i32
    return %arg0, %c0_i32, %c0_i32_0, %c0_i32_1 : i32, i32, i32, i32
  }
  func.func @transform_1(%arg0: i32, %arg1: i32) -> (i32, i32, i32) {
    %c0_i32 = arith.constant 0 : i32
    %c0_i32_0 = arith.constant 0 : i32
    %c0_i32_1 = arith.constant 0 : i32
    return %c0_i32, %c0_i32_0, %arg1 : i32, i32, i32
  }
  func.func @transform_2(%arg0: i32, %arg1: i32) -> (i32, i32) {
    %c0_i32 = arith.constant 0 : i32
    %c0_i32_0 = arith.constant 0 : i32
    return %c0_i32, %arg1 : i32, i32
  }
  func.func @transform_3(%arg0: i32, %arg1: i32) -> (i32, i32, i32) {
    %c0_i32 = arith.constant 0 : i32
    %c0_i32_0 = arith.constant 0 : i32
    return %arg0, %c0_i32, %arg1 : i32, i32, i32
  }
}

</mosaic_0001>

<bundles_post_ra>
// kernel: tpu_custom_call.1
= control target key start
LH: loop header
LB: loop body
LE: loop exit
PB: predicated region body
PF: predicated region fallthrough
CT: control target
= control target key end

     0   :  { %8 = vsyncpa [#allocation3], 0  ;;  %s9198_s0 = inlined_call_operand.vmem [shape: bf16[2,18,18,4], index: 0, kind: input, shape index: {}]   ;;  %s9199_s1 = inlined_call_operand.vmem [shape: bf16[9,4,128], index: 1, kind: input, shape index: {}]   ;;  %s9200_s2 = inlined_call_operand.vmem [shape: f32[1,128], index: 2, kind: input, shape index: {}]   ;;  %s9201_s3 = inlined_call_operand.hbm [shape: bf16[2,256,128], index: 3, kind: output, shape index: {}]  }
   0x1   :  { %10 = vsyncpa [#allocation3 + $0x1], 0  ;;  %s6510_s12 = smov 0   ;;  %s6512_s13 = smov 0  }
   0x2   :  { %s6514_s14 = smov 0   ;;  %s6516_s15 = smov 0  }
   0x3   :  { %s6518_s16 = smov 0   ;;  %s6520_s17 = smov 0  }
   0x4 LB: > { %s5119_s18 = sadd.s32 4294967295, %s6485_s17   ;;  %s5120_s19 = sadd.s32 4294967294, %s6485_s17   ;;  %s6485_s17 = sphi %s6520_s17, %s16_s17   ;;  %s6481_s16 = sphi %s6518_s16, %s9428_s16   ;;  %s6477_s15 = sphi %s6516_s15, %s9427_s15   ;;  %s6473_s14 = sphi %s6514_s14, %s9426_s14   ;;  %s6469_s13 = sphi %s6512_s13, %s9425_s13   ;;  %s6465_s12 = sphi %s6510_s12, %s9424_s12  }
   0x5   : > { %s28_s20 = sadd.s32 1, %s6481_s16  ;;  %s115_s21 = sadd.s32 1, %s6473_s14 }
   0x6   : > { %p30_p0 = scmp.ge.s32.totalorder %s28_s20, 2  ;;  %p125_p1 = scmp.ne.s32.totalorder %s6473_s14, %s6469_s13 }
   0x7   : > { %p126_p2 = scmp.eq.s32.totalorder %s5119_s18, 1  ;;  %p131_p3 = scmp.ne.s32.totalorder %s6469_s13, %s6465_s12 }
   0x8   : > { %s9430_s20 = smov (%p30_p0, %s28_s20), 0  ;;  %p132_p5 = scmp.eq.s32.totalorder %s5120_s19, 1 }
   0x9   : > { %p6550_p4 = por %p126_p2, %p125_p1  ;;  %s110_s23 = ssub.s32 %s6481_s16, %s9430_s20 }
   0xa   : > { %p5125_p6 = scmp.ge.s32.totalorder %s6485_s17, 1  ;;  %p113_p7 = scmp.eq.s32.totalorder %s110_s23, 0 }
   0xb   : > { %p6557_p8 = por %p132_p5, %p131_p3  ;;  %p171_p9 = scmp.lt.s32.totalorder %s6485_s17, 3 }
   0xc   : > { %s6563_s25 = scalar_select %p113_p7, %s6473_s14, %s115_s21  }
   0xd   : > { %p172_p10 = pnand %p5125_p6, %p171_p9 }
   0xf   : > { %175 = sbr.rel (%p172_p10) target bundleno = 581 (0x245), region = 32 }
  0x14   : > { %v5128_v0 = vld [vmem:[%s9199_s1 + $0x2] sm:$0x3]  ;;  %vm750_vm0 = vcmask 1041408   ;;  %p202_p11 = scmp.lt.s32.totalorder %s6477_s15, 1  ;;  %v247_v2 = vld [vmem:[%s9199_s1] sm:$0x3] }
  0x15   : > { %6292 = vmatprep.subr.msk.bf16.mxu1 %vm750_vm0, %v5128_v0  ;;  %6291 = vmatprep.subr.msk.bf16.mxu0 %vm750_vm0, %v5128_v0  ;;  %v752_v1 = vsel %vm750_vm0, %v5128_v0, 0  ;;  %v5209_v3 = vld [vmem:[%s9199_s1 + $0x4] sm:$0x3]  ;;  %vm264_vm1 = vsmask.f32 3328  ;;  %v6587_v4 = vsel %vm750_vm0, %v247_v2, 0 }
  0x16   : > { %6290 = vmatpush3.bf16.msra.mxu1 %v752_v1  ;;  %5984 = vmatpush3.bf16.msra.mxu0 %v752_v1  ;;  %s203_s30 = scalar_select %p202_p11, %s6477_s15, 1  ;;  %vm265_vm2 = vsmask.f32 7440  ;;  %vm701_vm3 = vcmask 31744   ;;  %v6613_v16 = vsel %vm750_vm0, %v5209_v3, 0  ;;  %vm1255_vm5 = vcmask 1042432  }
  0x17   : > { %6293 = vmatprep.subr.msk.bf16.mxu1 %vm750_vm0, %v247_v2  ;;  %6294 = vmatprep.subr.msk.bf16.mxu0 %vm750_vm0, %v5209_v3  ;;  %vm6628_vm4 = vmor %vm264_vm1, %vm265_vm2  ;;  %vm1256_vm6 = vcmask 1046532   ;;  %s199_s7 = sand.u32 1, %s6469_s13   ;;  %s5734_s10 = sshll.u32 %s6477_s15, 11 }
  0x18   : > { %s6301_s6 = smul.u32 216, %s203_s30  ;;  %vm6914_vm7 = vmor %vm1255_vm5, %vm1256_vm6  ;;  %s5126_s8 = sshll.u32 %s199_s7, 7 }
  0x19   : > { %s9145_s21 = scalar_lea.hbm %s9201_s3, %s5734_s10  ;;  %s9153_s15 = scalar_lea.sflag [#allocation3], %s199_s7 }
  0x1a   : > { %s6584_s9 = scalar_lea.vmem %s9198_s0, %s6301_s6  ;;  %s6487_s26 = smov [#allocation2]  }
  0x1b   : > { %v6590_v5 = vld [vmem:[%s6584_s9] sm:$0xf]  ;;  %v6593_v6 = vld [vmem:[%s6584_s9 + $0x4] sm:$0xf]  ;;  %v6596_v7 = vld [vmem:[%s6584_s9 + $0x8] sm:$0x1] }
  0x1c   : > { %v268_v8 = vshrl.u32 %v6590_v5, 16  ;;  %v271_v9 = vshll.u32 %v6590_v5, 16  ;;  %v277_v10 = vshll.u32 %v6593_v6, 16  ;;  %v281_v11 = vshrl.u32 %v6593_v6, 16  ;;  %v6603_v12 = vld [vmem:[%s6584_s9 + $0x60] sm:$0xf] }
  0x1d   : > { %v287_v13 = vshll.u32 %v6596_v7, 16  ;;  %v6607_v14 = vld [vmem:[%s6584_s9 + $0x64] sm:$0xf]  ;;  %v6610_v15 = vld [vmem:[%s6584_s9 + $0x68] sm:$0x1]  ;;  %v460_v22 = vshrl.u32 %v6603_v12, 16 }
  0x1e   : > { %v270_v17 = vrot.slane %v268_v8, 4  ;;  %v273_v18 = vrot.slane %v271_v9, 5  ;;  %v279_v19 = vrot.slane %v277_v10, 5  ;;  %v283_v20 = vrot.slane %v281_v11, 4  ;;  %v6621_v29 = vld [vmem:[%s6584_s9 + $0xc] sm:$0xf] }
  0x1f   : > { %v289_v21 = vrot.slane %v287_v13, 5  ;;  %v463_v23 = vshll.u32 %v6603_v12, 16  ;;  %v469_v24 = vshll.u32 %v6607_v14, 16  ;;  %v473_v27 = vshrl.u32 %v6607_v14, 16  ;;  %v6624_v30 = vld [vmem:[%s6584_s9 + $0x10] sm:$0xf] }
  0x20   : > { %v274_v25 = vor.u32 %v273_v18, %v270_v17  ;;  %v284_v26 = vor.u32 %v283_v20, %v279_v19  ;;  %v479_v28 = vshll.u32 %v6610_v15, 16  ;;  %v462_v33 = vrot.slane %v460_v22, 4  ;;  %v6634_v41 = vld [vmem:[%s6584_s9 + $0x14] sm:$0x1]  ;;  %v6645_v53 = vld [vmem:[%s6584_s9 + $0x6c] sm:$0xf] }
  0x21   : > { %v465_v34 = vrot.slane %v463_v23, 5  ;;  %v471_v35 = vrot.slane %v469_v24, 5  ;;  %v475_v38 = vrot.slane %v473_v27, 4  ;;  %v292_v42 = vshrl.u32 %v6621_v29, 16  ;;  %v6649_v58 = vld [vmem:[%s6584_s9 + $0x70] sm:$0xf] }
  0x22   : > { %v275_v36 = vrot.slane %v274_v25, 4  ;;  %v285_v37 = vrot.slane %v284_v26, 4  ;;  %v481_v39 = vrot.slane %v479_v28, 5  ;;  %v295_v43 = vshll.u32 %v6621_v29, 16  ;;  %v6657_v63 = vld [vmem:[%s6584_s9 + $0x74] sm:$0x1] }
  0x23   : > { %v466_v40 = vor.u32 %v465_v34, %v462_v33  ;;  %v301_v44 = vshll.u32 %v6624_v30, 16  ;;  %v476_v47 = vor.u32 %v475_v38, %v471_v35  ;;  %v305_v48 = vshrl.u32 %v6624_v30, 16  ;;  %v6663_v8 = vld [vmem:[%s6584_s9 + $0x18] sm:$0xf]  ;;  %v6676_v25 = vld [vmem:[%s6584_s9 + $0x20] sm:$0x1] }
  0x24   : > { %v280_v45 = vsel %vm6628_vm4, %v275_v36, %v279_v19  ;;  %v290_v46 = vsel %vm6628_vm4, %v285_v37, %v289_v21  ;;  %v294_v51 = vrot.slane %v292_v42, 4  ;;  %v297_v52 = vrot.slane %v295_v43, 5  ;;  %v6670_v21 = vld [vmem:[%s6584_s9 + $0x1c] sm:$0xf]  ;;  %s6413_s27 = sshll.u32 %s6487_s26, 4  ;;  %s6414_s27 = int_to_ptr.vmem [resolvable:$false] %s6413_s27 }
  0x25   : > { %v5129_v49 = vcombine.low %v280_v45, %v290_v46  ;;  %v467_v50 = vrot.slane %v466_v40, 4  ;;  %v477_v54 = vrot.slane %v476_v47, 4  ;;  %v303_v55 = vrot.slane %v301_v44, 5  ;;  %v6689_v40 = vld [vmem:[%s9199_s1 + $0x8] sm:$0x3]  ;;  %s6415_s28 = scalar_lea.vmem %s6414_s27, 4096 }
  0x26   : > { %v307_v56 = vrot.slane %v305_v48, 4  ;;  %v311_v57 = vshll.u32 %v6634_v41, 16  ;;  %v298_v60 = vor.u32 %v297_v52, %v294_v51  ;;  %v484_v3 = vshrl.u32 %v6645_v53, 16  ;;  %v6694_v46 = vld [vmem:[%s6584_s9 + $0x7c] sm:$0xf] }
  0x27   : > { %5985 = vmatprep.mubr.msk.bf16.mxu0 %vm701_vm3, %v5129_v49  ;;  %v472_v59 = vsel %vm6628_vm4, %v467_v50, %v471_v35  ;;  %v482_v0 = vsel %vm6628_vm4, %v477_v54, %v481_v39  ;;  %v487_v11 = vshll.u32 %v6645_v53, 16  ;;  %v493_v13 = vshll.u32 %v6649_v58, 16  ;;  %v6683_v35 = vld [vmem:[%s6584_s9 + $0x78] sm:$0xf] }
  0x28   : > { %v308_v1 = vor.u32 %v307_v56, %v303_v55  ;;  %v313_v2 = vrot.slane %v311_v57, 5  ;;  %v5137_v9 = vcombine.low %v472_v59, %v482_v0  ;;  %v299_v10 = vrot.slane %v298_v60, 4  ;;  %v6701_v56 = vld [vmem:[%s6584_s9 + $0x80] sm:$0x1] }
  0x29   : > { %v486_v18 = vrot.slane %v484_v3, 4  ;;  %v497_v19 = vshrl.u32 %v6649_v58, 16  ;;  %v503_v20 = vshll.u32 %v6657_v63, 16  ;;  %v489_v23 = vrot.slane %v487_v11, 5  ;;  %9239 = vst [vmem:[#allocation5_spill] sm:$0xff] %v6701_v56 }
  0x2a   : > { %v309_v17 = vrot.slane %v308_v1, 4  ;;  %6001 = vmatprep.mubr.msk.bf16.mxu1 %vm701_vm3, %v5137_v9  ;;  %v304_v22 = vsel %vm6628_vm4, %v299_v10, %v303_v55  ;;  %v495_v24 = vrot.slane %v493_v13, 5  ;;  %v316_v26 = vshrl.u32 %v6663_v8, 16  ;;  %v6707_v1 = vld [vmem:[%s6584_s9 + $0x24] sm:$0xf] }
  0x2b   : > { %v499_v28 = vrot.slane %v497_v19, 4  ;;  %v505_v33 = vrot.slane %v503_v20, 5  ;;  %v319_v34 = vshll.u32 %v6663_v8, 16  ;;  %v490_v37 = vor.u32 %v489_v23, %v486_v18  ;;  %v6715_v10 = vld [vmem:[%s6584_s9 + $0x28] sm:$0xf] }
  0x2c   : > { %v314_v27 = vsel %vm6628_vm4, %v309_v17, %v313_v2  ;;  %v318_v38 = vrot.slane %v316_v26, 4  ;;  %v325_v39 = vshll.u32 %v6670_v21, 16  ;;  %v329_v44 = vshrl.u32 %v6670_v21, 16  ;;  %v6721_v19 = vld [vmem:[%s9199_s1 + $0x6] sm:$0x3] }
  0x2d   : > { %v5130_v36 = vcombine.low %v304_v22, %v314_v27  ;;  %v500_v42 = vor.u32 %v499_v28, %v495_v24  ;;  %v321_v43 = vrot.slane %v319_v34, 5  ;;  %v335_v45 = vshll.u32 %v6676_v25, 16 }
  0x2e   : > { %v491_v47 = vrot.slane %v490_v37, 4  ;;  %v327_v48 = vrot.slane %v325_v39, 5  ;;  %v508_v49 = vshrl.u32 %v6683_v35, 16  ;;  %v511_v50 = vshll.u32 %v6683_v35, 16 }
  0x2f   : > { %5986 = vmatmul.mubr.msk.bf16.vlgmr.msra.gmra.mxu0 %vm701_vm3, %v5130_v36  ;;  %v501_v51 = vrot.slane %v500_v42, 4  ;;  %v322_v52 = vor.u32 %v321_v43, %v318_v38  ;;  %v331_v54 = vrot.slane %v329_v44, 4  ;;  %v337_v55 = vrot.slane %v335_v45, 5  ;;  %v6733_v36 = vld [vmem:[%s6584_s9 + $0x84] sm:$0xf] }
  0x30   : > { %6052 = vmatpush3.bf16.msra.mxu0 %v6613_v16  ;;  %v496_v57 = vsel %vm6628_vm4, %v491_v47, %v495_v24  ;;  %v510_v59 = vrot.slane %v508_v49, 4  ;;  %v513_v60 = vrot.slane %v511_v50, 5  ;;  %v517_v0 = vshll.u32 %v6694_v46, 16  ;;  %v6726_v24 = vld [vmem:[%s6584_s9 + $0x2c] sm:$0x1] }
  0x31   : > { %6296 = vmatprep.subr.msk.bf16.mxu0 %vm750_vm0, %v6689_v40  ;;  %v506_v16 = vsel %vm6628_vm4, %v501_v51, %v505_v33  ;;  %v323_v2 = vrot.slane %v322_v52, 4  ;;  %v332_v3 = vor.u32 %v331_v54, %v327_v48  ;;  %v521_v9 = vshrl.u32 %v6694_v46, 16  ;;  %v6740_v43 = vld [vmem:[%s6584_s9 + $0x88] sm:$0xf]  ;;  %v6748_v51 = vld [vmem:[%s6584_s9 + $0x8c] sm:$0x1] }
  0x32   : > { %v5138_v11 = vcombine.low %v496_v57, %v506_v16  ;;  %v514_v13 = vor.u32 %v513_v60, %v510_v59  ;;  %v519_v17 = vrot.slane %v517_v0, 5  ;;  %v527_v18 = vshll.u32 %v6701_v56, 16  ;;  %9240 = vst [vmem:[#allocation6_spill] sm:$0xff] %v6748_v51  ;;  %v6756_v60 = vld [vmem:[%s6584_s9 + $0x30] sm:$0xf] }
  0x33   : > { %v328_v20 = vsel %vm6628_vm4, %v323_v2, %v327_v48  ;;  %v333_v22 = vrot.slane %v332_v3, 4  ;;  %v523_v23 = vrot.slane %v521_v9, 4  ;;  %v340_v26 = vshrl.u32 %v6707_v1, 16  ;;  %v6761_v9 = vld [vmem:[%s6584_s9 + $0x34] sm:$0xf] }
  0x34   : > { %6002 = vmatmul.mubr.msk.bf16.vlgmr.msra.gmra.mxu1 %vm701_vm3, %v5138_v11  ;;  %v515_v27 = vrot.slane %v514_v13, 4  ;;  %v529_v28 = vrot.slane %v527_v18, 5  ;;  %v343_v33 = vshll.u32 %v6707_v1, 16  ;;  %v349_v34 = vshll.u32 %v6715_v10, 16 }
  0x35   : > { %6018 = vmatpush3.bf16.msra.mxu1 %v6587_v4  ;;  %v338_v37 = vsel %vm6628_vm4, %v333_v22, %v337_v55  ;;  %v524_v38 = vor.u32 %v523_v23, %v519_v17  ;;  %v342_v39 = vrot.slane %v340_v26, 4  ;;  %v353_v42 = vshrl.u32 %v6715_v10, 16 }
  0x36   : > { %v5131_v44 = vcombine.low %v328_v20, %v338_v37  ;;  %v520_v45 = vsel %vm6628_vm4, %v515_v27, %v519_v17  ;;  %v345_v47 = vrot.slane %v343_v33, 5  ;;  %v351_v48 = vrot.slane %v349_v34, 5  ;;  %6295 = vmatprep.subr.msk.bf16.mxu1 %vm750_vm0, %v6721_v19  ;;  %v6769_v33 = vld [vmem:[%s6584_s9 + $0x38] sm:$0x1] }
  0x37   : > { %v525_v4 = vrot.slane %v524_v38, 4  ;;  %v355_v49 = vrot.slane %v353_v42, 4  ;;  %v359_v50 = vshll.u32 %v6726_v24, 16  ;;  %v532_v52 = vshrl.u32 %v6733_v36, 16  ;;  %v6774_v38 = vld [vmem:[%s6584_s9 + $0x90] sm:$0xf] }
  0x38   : > { %5989 = vmatprep.mubr.msk.bf16.mxu0 %vm701_vm3, %v5131_v44  ;;  %v346_v54 = vor.u32 %v345_v47, %v342_v39  ;;  %v535_v55 = vshll.u32 %v6733_v36, 16  ;;  %v541_v57 = vshll.u32 %v6740_v43, 16  ;;  %v545_v59 = vshrl.u32 %v6740_v43, 16  ;;  %9241 = vst [vmem:[#allocation7_spill] sm:$0xff] %v6774_v38  ;;  %v6779_v47 = vld [vmem:[%s6584_s9 + $0x94] sm:$0xf] }
  0x39   : > { %v530_v0 = vsel %vm6628_vm4, %v525_v4, %v529_v28  ;;  %v356_v16 = vor.u32 %v355_v49, %v351_v48  ;;  %v361_v2 = vrot.slane %v359_v50, 5  ;;  %v534_v3 = vrot.slane %v532_v52, 4  ;;  %9242 = vst [vmem:[#allocation8_spill] sm:$0xff] %v6779_v47 }
  0x3a   : > { %v5139_v11 = vcombine.low %v520_v45, %v530_v0  ;;  %v347_v13 = vrot.slane %v346_v54, 4  ;;  %v537_v17 = vrot.slane %v535_v55, 5  ;;  %v543_v18 = vrot.slane %v541_v57, 5 }
  0x3b   : > { %v357_v20 = vrot.slane %v356_v16, 4  ;;  %v547_v22 = vrot.slane %v545_v59, 4  ;;  %v551_v23 = vshll.u32 %v6748_v51, 16  ;;  %v364_v26 = vshrl.u32 %v6756_v60, 16  ;;  %v6788_v16 = vld [vmem:[%s6584_s9 + $0x98] sm:$0x1] }
  0x3c   : > { %6005 = vmatprep.mubr.msk.bf16.mxu1 %vm701_vm3, %v5139_v11  ;;  %v352_v27 = vsel %vm6628_vm4, %v347_v13, %v351_v48  ;;  %v538_v28 = vor.u32 %v537_v17, %v534_v3  ;;  %v367_v34 = vshll.u32 %v6756_v60, 16  ;;  %v373_v37 = vshll.u32 %v6761_v9, 16  ;;  %9243 = vst [vmem:[#allocation9_spill] sm:$0xff] %v6788_v16  ;;  %v6793_v11 = vld [vmem:[%s6584_s9 + $0x3c] sm:$0xf] }
  0x3d   : > { %v362_v39 = vsel %vm6628_vm4, %v357_v20, %v361_v2  ;;  %v548_v42 = vor.u32 %v547_v22, %v543_v18  ;;  %v553_v44 = vrot.slane %v551_v23, 5  ;;  %v366_v45 = vrot.slane %v364_v26, 4  ;;  %v6798_v23 = vld [vmem:[%s6584_s9 + $0x40] sm:$0xf]  ;;  %v1208_v51 = vld [vmem:[%s6584_s9 + $0xc] sm:$0xe] }
  0x3e   : > { %v5132_v48 = vcombine.low %v352_v27, %v362_v39  ;;  %v539_v4 = vrot.slane %v538_v28, 4  ;;  %v369_v49 = vrot.slane %v367_v34, 5  ;;  %v375_v50 = vrot.slane %v373_v37, 5 }
  0x3f   : > { %v549_v52 = vrot.slane %v548_v42, 4  ;;  %v377_v54 = vshrl.u32 %v6761_v9, 16  ;;  %v383_v55 = vshll.u32 %v6769_v33, 16  ;;  %v556_v57 = vshrl.u32 %v6774_v38, 16 }
  0x40   : > { %5990 = vmatmul.mubr.msk.bf16.gmra.mxu0 %vm701_vm3, %v5132_v48  ;;  %v544_v59 = vsel %vm6628_vm4, %v539_v4, %v543_v18  ;;  %v370_v0 = vor.u32 %v369_v49, %v366_v45  ;;  %v559_v2 = vshll.u32 %v6774_v38, 16  ;;  %v565_v3 = vshll.u32 %v6779_v47, 16  ;;  %v6807_v48 = vld [vmem:[%s6584_s9 + $0x44] sm:$0x1] }
  0x41   : > { %v554_v13 = vsel %vm6628_vm4, %v549_v52, %v553_v44  ;;  %v379_v17 = vrot.slane %v377_v54, 4  ;;  %v385_v20 = vrot.slane %v383_v55, 5  ;;  %v558_v22 = vrot.slane %v556_v57, 4  ;;  %v6812_v52 = vld [vmem:[%s6584_s9 + $0x9c] sm:$0xf] }
  0x42   : > { %v5140_v18 = vcombine.low %v544_v59, %v554_v13  ;;  %v371_v26 = vrot.slane %v370_v0, 4  ;;  %v561_v27 = vrot.slane %v559_v2, 5  ;;  %v567_v28 = vrot.slane %v565_v3, 5  ;;  %9244 = vst [vmem:[#allocation10_spill] sm:$0xff] %v6812_v52  ;;  %v6816_v13 = vld [vmem:[%s6584_s9 + $0xa0] sm:$0xf] }
  0x43   : > { %v380_v34 = vor.u32 %v379_v17, %v375_v50  ;;  %v569_v37 = vshrl.u32 %v6779_v47, 16  ;;  %v575_v39 = vshll.u32 %v6788_v16, 16  ;;  %v388_v42 = vshrl.u32 %v6793_v11, 16  ;;  %9245 = vst [vmem:[#allocation11_spill] sm:$0xff] %v6816_v13 }
  0x44   : > { %6006 = vmatmul.mubr.msk.bf16.gmra.mxu1 %vm701_vm3, %v5140_v18  ;;  %v376_v44 = vsel %vm6628_vm4, %v371_v26, %v375_v50  ;;  %v562_v45 = vor.u32 %v561_v27, %v558_v22  ;;  %v391_v4 = vshll.u32 %v6793_v11, 16  ;;  %v397_v49 = vshll.u32 %v6798_v23, 16  ;;  %v6822_v26 = vld [vmem:[%s6584_s9 + $0xa4] sm:$0x1] }
  0x45   : > { %v381_v54 = vrot.slane %v380_v34, 4  ;;  %v571_v55 = vrot.slane %v569_v37, 4  ;;  %v577_v57 = vrot.slane %v575_v39, 5  ;;  %v390_v59 = vrot.slane %v388_v42, 4  ;;  %9246 = vst [vmem:[#allocation12_spill] sm:$0xff] %v6822_v26 }
  0x46   : > { %v563_v0 = vrot.slane %v562_v45, 4  ;;  %v393_v2 = vrot.slane %v391_v4, 5  ;;  %v399_v3 = vrot.slane %v397_v49, 5  ;;  %v401_v50 = vshrl.u32 %v6798_v23, 16  ;;  %v6826_v34 = vld [vmem:[%s6584_s9 + $0x48] sm:$0xf] }
  0x47   : > { %v386_v17 = vsel %vm6628_vm4, %v381_v54, %v385_v20  ;;  %v572_v22 = vor.u32 %v571_v55, %v567_v28  ;;  %v407_v18 = vshll.u32 %v6807_v48, 16  ;;  %v580_v27 = vshrl.u32 %v6812_v52, 16 }
  0x48   : > { %v5133_v37 = vcombine.low %v376_v44, %v386_v17  ;;  %v568_v39 = vsel %vm6628_vm4, %v563_v0, %v567_v28  ;;  %v394_v42 = vor.u32 %v393_v2, %v390_v59  ;;  %v403_v45 = vrot.slane %v401_v50, 4  ;;  %v6835_v17 = vld [vmem:[%s6584_s9 + $0x4c] sm:$0xf]  ;;  %v6841_v2 = vld [vmem:[%s6584_s9 + $0x50] sm:$0x1] }
  0x49   : > { %v573_v4 = vrot.slane %v572_v22, 4  ;;  %v409_v49 = vrot.slane %v407_v18, 5  ;;  %v582_v20 = vrot.slane %v580_v27, 4  ;;  %v583_v54 = vshll.u32 %v6812_v52, 16 }
  0x4a   : > { %5993 = vmatprep.mubr.msk.bf16.mxu0 %vm701_vm3, %v5133_v37  ;;  %v395_v55 = vrot.slane %v394_v42, 4  ;;  %v404_v62 = vor.u32 %v403_v45, %v399_v3  ;;  %v589_v32 = vshll.u32 %v6816_v13, 16  ;;  %v593_v44 = vshrl.u32 %v6816_v13, 16  ;;  %v6847_v42 = vld [vmem:[%s6584_s9 + $0xa8] sm:$0xf] }
  0x4b   : > { %v578_v28 = vsel %vm6628_vm4, %v573_v4, %v577_v57  ;;  %v585_v59 = vrot.slane %v583_v54, 5  ;;  %v599_v0 = vshll.u32 %v6822_v26, 16  ;;  %v412_v50 = vshrl.u32 %v6826_v34, 16  ;;  %9247 = vst [vmem:[#allocation13_spill] sm:$0xff] %v6847_v42 }
  0x4c   : > { %v5141_v22 = vcombine.low %v568_v39, %v578_v28  ;;  %v400_v18 = vsel %vm6628_vm4, %v395_v55, %v399_v3  ;;  %v405_v27 = vrot.slane %v404_v62, 4  ;;  %v591_v37 = vrot.slane %v589_v32, 5 }
  0x4d   : > { %v586_v45 = vor.u32 %v585_v59, %v582_v20  ;;  %v595_v61 = vrot.slane %v593_v44, 4  ;;  %v601_v57 = vrot.slane %v599_v0, 5  ;;  %v414_v4 = vrot.slane %v412_v50, 4  ;;  %v6857_v44 = vld [vmem:[%s6584_s9 + $0xac] sm:$0xf] }
  0x4e   : > { %6009 = vmatprep.mubr.msk.bf16.mxu1 %vm701_vm3, %v5141_v22  ;;  %v410_v54 = vsel %vm6628_vm4, %v405_v27, %v409_v49  ;;  %v415_v39 = vshll.u32 %v6826_v34, 16  ;;  %v421_v28 = vshll.u32 %v6835_v17, 16  ;;  %v425_v62 = vshrl.u32 %v6835_v17, 16  ;;  %9248 = vst [vmem:[#allocation14_spill] sm:$0xff] %v6857_v44  ;;  %v6860_v22 = vld [vmem:[%s6584_s9 + $0xb0] sm:$0x1] }
  0x4f   : > { %v5134_v3 = vcombine.low %v400_v18, %v410_v54  ;;  %v587_v32 = vrot.slane %v586_v45, 4  ;;  %v596_v55 = vor.u32 %v595_v61, %v591_v37  ;;  %v431_v20 = vshll.u32 %v6841_v2, 16  ;;  %9249 = vst [vmem:[#allocation15_spill] sm:$0xff] %v6860_v22 }
  0x50   : > { %v417_v59 = vrot.slane %v415_v39, 5  ;;  %v423_v0 = vrot.slane %v421_v28, 5  ;;  %v427_v50 = vrot.slane %v425_v62, 4  ;;  %v604_v49 = vshrl.u32 %v6847_v42, 16  ;;  %v6869_v62 = vld [vmem:[%s6584_s9 + $0x54] sm:$0xf] }
  0x51   : > { %5994 = vmatmul.mubr.msk.bf16.gmra.mxu0 %vm701_vm3, %v5134_v3  ;;  %v592_v18 = vsel %vm6628_vm4, %v587_v32, %v591_v37  ;;  %v597_v27 = vrot.slane %v596_v55, 4  ;;  %v433_v61 = vrot.slane %v431_v20, 5  ;;  %v607_v45 = vshll.u32 %v6847_v42, 16  ;;  %v6876_v55 = vld [vmem:[%s6584_s9 + $0x58] sm:$0xf] }
  0x52   : > { %v418_v54 = vor.u32 %v417_v59, %v414_v4  ;;  %v428_v56 = vor.u32 %v427_v50, %v423_v0  ;;  %v606_v39 = vrot.slane %v604_v49, 4  ;;  %v613_v28 = vshll.u32 %v6857_v44, 16  ;;  %v6879_v49 = vld [vmem:[%s6584_s9 + $0x5c] sm:$0x1] }
  0x53   : > { %v602_v3 = vsel %vm6628_vm4, %v597_v27, %v601_v57  ;;  %v609_v26 = vrot.slane %v607_v45, 5  ;;  %v617_v37 = vshrl.u32 %v6857_v44, 16  ;;  %v623_v32 = vshll.u32 %v6860_v22, 16  ;;  %v1207_v22 = vld [vmem:[%s6584_s9] sm:$0xe] }
  0x54   : > { %v5142_v4 = vcombine.low %v592_v18, %v602_v3  ;;  %v419_v20 = vrot.slane %v418_v54, 4  ;;  %v429_v59 = vrot.slane %v428_v56, 4  ;;  %v615_v50 = vrot.slane %v613_v28, 5  ;;  %v6890_v54 = vld [vmem:[%s6584_s9 + $0xb4] sm:$0xf] }
  0x55   : > { %v610_v42 = vor.u32 %v609_v26, %v606_v39  ;;  %v619_v52 = vrot.slane %v617_v37, 4  ;;  %v625_v13 = vrot.slane %v623_v32, 5  ;;  %v436_v57 = vshrl.u32 %v6869_v62, 16  ;;  %9250 = vst [vmem:[#allocation16_spill] sm:$0xff] %v6890_v54  ;;  %v6893_v37 = vld [vmem:[%s6584_s9 + $0xb8] sm:$0xf] }
  0x56   : > { %6010 = vmatmul.mubr.msk.bf16.gmra.mxu1 %vm701_vm3, %v5142_v4  ;;  %v424_v27 = vsel %vm6628_vm4, %v419_v20, %v423_v0  ;;  %v434_v18 = vsel %vm6628_vm4, %v429_v59, %v433_v61  ;;  %v439_v56 = vshll.u32 %v6869_v62, 16  ;;  %v445_v45 = vshll.u32 %v6876_v55, 16  ;;  %v6898_v61 = vld [vmem:[%s6584_s9 + $0xbc] sm:$0x1] }
  0x57   : > { %v5135_v26 = vcombine.low %v424_v27, %v434_v18  ;;  %v611_v39 = vrot.slane %v610_v42, 4  ;;  %v620_v28 = vor.u32 %v619_v52, %v615_v50  ;;  %v438_v3 = vrot.slane %v436_v57, 4 }
  0x58   : > { %v441_v32 = vrot.slane %v439_v56, 5  ;;  %v447_v4 = vrot.slane %v445_v45, 5  ;;  %v449_v0 = vshrl.u32 %v6876_v55, 16  ;;  %v455_v20 = vshll.u32 %v6879_v49, 16 }
  0x59   : > { %5997 = vmatprep.mubr.msk.bf16.mxu0 %vm701_vm3, %v5135_v26  ;;  %v616_v59 = vsel %vm6628_vm4, %v611_v39, %v615_v50  ;;  %v621_v27 = vrot.slane %v620_v28, 4  ;;  %v628_v52 = vshrl.u32 %v6890_v54, 16  ;;  %v631_v42 = vshll.u32 %v6890_v54, 16 }
  0x5a   : > { %v442_v57 = vor.u32 %v441_v32, %v438_v3  ;;  %v451_v18 = vrot.slane %v449_v0, 4  ;;  %v457_v56 = vrot.slane %v455_v20, 5  ;;  %v637_v45 = vshll.u32 %v6893_v37, 16 }
  0x5b   : > { %v626_v44 = vsel %vm6628_vm4, %v621_v27, %v625_v13  ;;  %v630_v16 = vrot.slane %v628_v52, 4  ;;  %v633_v26 = vrot.slane %v631_v42, 5  ;;  %v641_v38 = vshrl.u32 %v6893_v37, 16 }
  0x5c   : > { %v5143_v50 = vcombine.low %v616_v59, %v626_v44  ;;  %v443_v39 = vrot.slane %v442_v57, 4  ;;  %v452_v28 = vor.u32 %v451_v18, %v447_v4  ;;  %v639_v47 = vrot.slane %v637_v45, 5  ;;  %v1209_v57 = vld [vmem:[%s6584_s9 + $0x18] sm:$0xe] }
  0x5d   : > { %v634_v54 = vor.u32 %v633_v26, %v630_v16  ;;  %v643_v3 = vrot.slane %v641_v38, 4  ;;  %v647_v32 = vshll.u32 %v6898_v61, 16  ;;  %v5193_v13 = vrot.slane %v1207_v22, 9 }
  0x5e   : > { %6013 = vmatprep.mubr.msk.bf16.mxu1 %vm701_vm3, %v5143_v50  ;;  %v448_v44 = vsel %vm6628_vm4, %v443_v39, %v447_v4  ;;  %v453_v20 = vrot.slane %v452_v28, 4  ;;  %v1260_v59 = vrot.slane %v6593_v6, 5  ;;  %v5162_v38 = vcombine.low %v6621_v29, %v6624_v30 }
  0x5f   : > { %v635_v16 = vrot.slane %v634_v54, 4  ;;  %v644_v27 = vor.u32 %v643_v3, %v639_v47  ;;  %v649_v52 = vrot.slane %v647_v32, 5  ;;  %v5194_v42 = vrot.slane %v1208_v51, 9 }
  0x60   : > { %v458_v18 = vsel %vm6628_vm4, %v453_v20, %v457_v56  ;;  %v1261_v22 = vsel %vm6914_vm7, %v5193_v13, %v1260_v59  ;;  %v1262_v45 = vrot.slane %v1260_v59, 4  ;;  %v9253_v4 = vrot.slane %v6624_v30, 5 }
  0x61   : > { %v5136_v50 = vcombine.low %v448_v44, %v458_v18  ;;  %v640_v54 = vsel %vm6628_vm4, %v635_v16, %v639_v47  ;;  %v645_v39 = vrot.slane %v644_v27, 4  ;;  %v5161_v51 = vcombine.low %v6590_v5, %v6593_v6  ;;  %v1210_v27 = vld [vmem:[%s6584_s9 + $0x24] sm:$0xe] }
  0x62   : > { %v1269_v26 = vrot.slane %v9253_v4, 4  ;;  %v9254_v28 = vrot.slane %v6596_v7, 5  ;;  %v9255_v3 = vmov %v9253_v4  ;;  %v5163_v13 = vcombine.low %v6663_v8, %v6670_v21  ;;  %v1212_v4 = vld [vmem:[%s6584_s9 + $0x3c] sm:$0xe] }
  0x63   : > { %v1268_v32 = vsel %vm6914_vm7, %v5194_v42, %v9255_v3  ;;  %v5195_v44 = vrot.slane %v1209_v57, 9  ;;  %5998 = vmatmul.mubr.msk.bf16.gmra.mxu0 %vm701_vm3, %v5136_v50  ;;  %v650_v47 = vsel %vm6628_vm4, %v645_v39, %v649_v52  ;;  %v9256_v6 = vrot.slane %v6634_v41, 5  ;;  %v1211_v42 = vld [vmem:[%s6584_s9 + $0x30] sm:$0xe]  ;;  %v1213_v39 = vld [vmem:[%s6584_s9 + $0x48] sm:$0xe] }
  0x64   : > { %v1264_v56 = vsel %vm6914_vm7, %v1262_v45, %v9254_v28  ;;  %v1274_v20 = vrot.slane %v6670_v21, 5  ;;  %v5144_v59 = vcombine.low %v640_v54, %v650_v47  ;;  %v1277_v16 = vrot.slane %v6676_v25, 5  ;;  %v1214_v47 = vld [vmem:[%s6584_s9 + $0x54] sm:$0xe]  ;;  %v7209_v21 = vld [vmem:[%s6584_s9 + $0x2c] sm:$0x1] }
  0x65   : > { %v5210_v5 = vcombine.low %v1261_v22, %v1264_v56  ;;  %v1271_v7 = vsel %vm6914_vm7, %v1269_v26, %v9256_v6  ;;  %v1828_v52 = vsel %vm750_vm0, %v6721_v19, 0  ;;  %v1281_v18 = vrot.slane %v6715_v10, 5 }
  0x66   : > { %v1275_v41 = vsel %vm6914_vm7, %v5195_v44, %v1274_v20  ;;  %v1276_v57 = vrot.slane %v1274_v20, 4  ;;  %6014 = vmatmul.mubr.msk.bf16.gmra.mxu1 %vm701_vm3, %v5144_v59  ;;  %v5211_v22 = vcombine.low %v1268_v32, %v1271_v7  ;;  %v2554_v25 = vsel %vm750_vm0, %v6689_v40, 0 }
  0x67   : > { %6053 = vmatprep.mubr.msk.bf16.mxu0 %vm701_vm3, %v5210_v5  ;;  %v1288_v45 = vrot.slane %v6761_v9, 5  ;;  %6019 = vmatprep.mubr.msk.bf16.mxu1 %vm701_vm3, %v5161_v51  ;;  %v5196_v26 = vrot.slane %v1210_v27, 9  ;;  %v1284_v50 = vrot.slane %v6726_v24, 5  ;;  %v5197_v54 = vrot.slane %v1211_v42, 9  ;;  %v6981_v24 = vld [vmem:[%s9199_s1 + $0xc] sm:$0x3] }
  0x68   : > { %v1278_v19 = vsel %vm6914_vm7, %v1276_v57, %v1277_v16  ;;  %v1283_v56 = vrot.slane %v1281_v18, 4  ;;  %v1291_v32 = vrot.slane %v6769_v33, 5  ;;  %v5198_v44 = vrot.slane %v1212_v4, 9 }
  0x69   : > { %v5212_v28 = vcombine.low %v1275_v41, %v1278_v19  ;;  %v1290_v3 = vrot.slane %v1288_v45, 4  ;;  %v1295_v40 = vrot.slane %v6798_v23, 5  ;;  %v1319_v5 = vrot.slane %v6610_v15, 5 }
  0x6a   : > { %v1298_v51 = vrot.slane %v6807_v48, 5  ;;  %v5199_v6 = vrot.slane %v1213_v39, 9  ;;  %v1302_v7 = vrot.slane %v6835_v17, 5  ;;  %v5164_v33 = vcombine.low %v6707_v1, %v6715_v10  ;;  %v1215_v1 = vld [vmem:[%s6584_s9 + $0x60] sm:$0xe] }
  0x6b   : > { %6054 = vmatmul.mubr.msk.bf16.vlgmr.msra.gmra.mxu0 %vm701_vm3, %v5211_v22  ;;  %v1282_v20 = vsel %vm6914_vm7, %v5196_v26, %v1281_v18  ;;  %v1297_v59 = vrot.slane %v1295_v40, 4  ;;  %v1305_v16 = vrot.slane %v6841_v2, 5  ;;  %v1285_v48 = vsel %vm6914_vm7, %v1283_v56, %v1284_v50  ;;  %v7009_v22 = vld [vmem:[%s9199_s1 + $0xa] sm:$0x3]  ;;  %v7034_v50 = vld [vmem:[%s6584_s9 + $0x6c] sm:$0xe] }
  0x6c   : > { %6120 = vmatpush3.bf16.msra.mxu0 %v2554_v25  ;;  %6057 = vmatprep.mubr.msk.bf16.mxu0 %vm701_vm3, %v5212_v28  ;;  %v1289_v27 = vsel %vm6914_vm7, %v5197_v54, %v1288_v45  ;;  %v1292_v42 = vsel %vm6914_vm7, %v1290_v3, %v1291_v32  ;;  %v1304_v41 = vrot.slane %v1302_v7, 4  ;;  %v6999_v10 = vsel %vm6914_vm7, %v5198_v44, %v1295_v40  ;;  %v1218_v39 = vld [vmem:[%s6584_s9 + $0x84] sm:$0xe]  ;;  %v7063_v44 = vld [vmem:[%s6584_s9 + $0x78] sm:$0xe] }
  0x6d   : > { %v7003_v2 = vsel %vm6914_vm7, %v5199_v6, %v1302_v7  ;;  %v5200_v57 = vrot.slane %v1214_v47, 9  ;;  %v1309_v18 = vrot.slane %v6876_v55, 5  ;;  %6298 = vmatprep.subr.msk.bf16.mxu0 %vm750_vm0, %v6981_v24  ;;  %v7019_v25 = vsel %vm6914_vm7, %v1297_v59, %v1298_v51  ;;  %v1219_v40 = vld [vmem:[%s6584_s9 + $0x90] sm:$0xe] }
  0x6e   : > { %6020 = vmatmul.mubr.msk.bf16.vlgmr.msra.gmra.mxu1 %vm701_vm3, %v5162_v38  ;;  %v7023_v45 = vsel %vm6914_vm7, %v1304_v41, %v1305_v16  ;;  %v1312_v4 = vrot.slane %v6879_v49, 5  ;;  %v1316_v19 = vrot.slane %v6607_v14, 5  ;;  %v5213_v29 = vcombine.low %v1282_v20, %v1285_v48  ;;  %v9257_v48 = vld [vmem:[#allocation6_spill] sm:$0xff] }
  0x6f   : > { %6086 = vmatpush3.bf16.msra.mxu1 %v1828_v52  ;;  %6023 = vmatprep.mubr.msk.bf16.mxu1 %vm701_vm3, %v5163_v13  ;;  %v5165_v30 = vcombine.low %v6756_v60, %v6761_v9  ;;  %v1311_v38 = vrot.slane %v1309_v18, 4  ;;  %v5201_v26 = vrot.slane %v1215_v1, 9  ;;  %v5214_v49 = vcombine.low %v1289_v27, %v1292_v42  ;;  %v1220_v42 = vld [vmem:[%s6584_s9 + $0x9c] sm:$0xe] }
  0x70   : > { %v5166_v52 = vcombine.low %v6793_v11, %v6798_v23  ;;  %v5167_v8 = vcombine.low %v6826_v34, %v6835_v17  ;;  %6297 = vmatprep.subr.msk.bf16.mxu1 %vm750_vm0, %v7009_v22  ;;  %v5215_v60 = vcombine.low %v6999_v10, %v7019_v25  ;;  %v5216_v9 = vcombine.low %v7003_v2, %v7023_v45  ;;  %v9258_v10 = vld [vmem:[#allocation8_spill] sm:$0xff]  ;;  %v9259_v2 = vld [vmem:[#allocation7_spill] sm:$0xff] }
  0x71   : > { %v1318_v54 = vrot.slane %v1316_v19, 4  ;;  %v7053_v28 = vsel %vm6914_vm7, %v5200_v57, %v1309_v18  ;;  %v7057_v56 = vsel %vm6914_vm7, %v1311_v38, %v1312_v4  ;;  %v5202_v32 = vrot.slane %v7034_v50, 9  ;;  %v1221_v18 = vld [vmem:[%s6584_s9 + $0xa8] sm:$0xe]  ;;  %v9261_v38 = vld [vmem:[#allocation11_spill] sm:$0xff] }
  0x72   : > { %v7069_v47 = vsel %vm6914_vm7, %v5201_v26, %v1316_v19  ;;  %v1323_v51 = vrot.slane %v6649_v58, 5  ;;  %v1326_v6 = vrot.slane %v6657_v63, 5  ;;  %v5204_v59 = vrot.slane %v1218_v39, 9  ;;  %v9260_v19 = vld [vmem:[#allocation9_spill] sm:$0xff]  ;;  %v9262_v26 = vld [vmem:[#allocation10_spill] sm:$0xff] }
  0x73   : > { %6058 = vmatmul.mubr.msk.bf16.gmra.mxu0 %vm701_vm3, %v5213_v29  ;;  %v1337_v16 = vrot.slane %v6740_v43, 5  ;;  %v1340_v27 = vrot.slane %v9257_v48, 5  ;;  %v5217_v41 = vcombine.low %v7053_v28, %v7057_v56  ;;  %v7087_v63 = vsel %vm6914_vm7, %v1318_v54, %v1319_v5  ;;  %v9264_v48 = vld [vmem:[#allocation14_spill] sm:$0xff] }
  0x74   : > { %6061 = vmatprep.mubr.msk.bf16.mxu0 %vm701_vm3, %v5214_v49  ;;  %v5203_v1 = vrot.slane %v7063_v44, 9  ;;  %v5205_v4 = vrot.slane %v1219_v40, 9  ;;  %v1344_v15 = vrot.slane %v9258_v10, 5  ;;  %v1325_v5 = vrot.slane %v1323_v51, 4  ;;  %v5307_v57 = vld [vmem:[%s6584_s9 + $0xc] sm:$0xf] }
  0x75   : > { %v7096_v25 = vsel %vm6914_vm7, %v5204_v59, %v1337_v16  ;;  %v1339_v45 = vrot.slane %v1337_v16, 4  ;;  %v1347_v29 = vrot.slane %v9260_v19, 5  ;;  %v5206_v49 = vrot.slane %v1220_v42, 9  ;;  %v9263_v59 = vld [vmem:[#allocation12_spill] sm:$0xff]  ;;  %v9265_v42 = vld [vmem:[#allocation13_spill] sm:$0xff] }
  0x76   : > { %6024 = vmatmul.mubr.msk.bf16.gmra.mxu1 %vm701_vm3, %v5164_v33  ;;  %v1330_v33 = vrot.slane %v6694_v46, 5  ;;  %v7110_v39 = vsel %vm6914_vm7, %v5205_v4, %v1344_v15  ;;  %v1346_v44 = vrot.slane %v1344_v15, 4  ;;  %v1351_v40 = vrot.slane %v9261_v38, 5  ;;  %v9266_v15 = vld [vmem:[#allocation15_spill] sm:$0xff] }
  0x77   : > { %6027 = vmatprep.mubr.msk.bf16.mxu1 %vm701_vm3, %v5165_v30  ;;  %v7106_v54 = vsel %vm6914_vm7, %v1339_v45, %v1340_v27  ;;  %v1354_v16 = vrot.slane %v9263_v59, 5  ;;  %v5207_v45 = vrot.slane %v1221_v18, 9  ;;  %v1358_v4 = vrot.slane %v9264_v48, 5 }
  0x78   : > { %v7120_v27 = vsel %vm6914_vm7, %v1346_v44, %v1347_v29  ;;  %v1361_v50 = vrot.slane %v9266_v15, 5  ;;  %v7130_v19 = vsel %vm6914_vm7, %v5206_v49, %v1351_v40  ;;  %v1353_v7 = vrot.slane %v1351_v40, 4  ;;  %v9267_v29 = vld [vmem:[#allocation16_spill] sm:$0xff]  ;;  %v9268_v15 = vld [vmem:[#allocation5_spill] sm:$0xff]  ;;  %v7145_v49 = vld [vmem:[%s6584_s9 + $0x10] sm:$0xf] }
  0x79   : > { %v7137_v18 = vsel %vm6914_vm7, %v5202_v32, %v1323_v51  ;;  %v7142_v59 = vsel %vm6914_vm7, %v5207_v45, %v1358_v4  ;;  %v1360_v30 = vrot.slane %v1358_v4, 4  ;;  %v5310_v40 = vld [vmem:[%s6584_s9 + $0x18] sm:$0xf]  ;;  %v1332_v20 = vrot.slane %v1330_v33, 4 }
  0x7a   : > { %v2072_v44 = vshrl.u32 %v5307_v57, 16  ;;  %v2075_v32 = vshll.u32 %v5307_v57, 16  ;;  %v5218_v51 = vcombine.low %v7069_v47, %v7087_v63  ;;  %v7160_v45 = vsel %vm6914_vm7, %v1325_v5, %v1326_v6  ;;  %v1222_v57 = vld [vmem:[%s6584_s9 + $0xb4] sm:$0xe]  ;;  %v7181_v47 = vld [vmem:[%s6584_s9 + $0x14] sm:$0x1] }
  0x7b   : > { %6062 = vmatmul.mubr.msk.bf16.gmra.mxu0 %vm701_vm3, %v5215_v60  ;;  %v1333_v60 = vrot.slane %v9268_v15, 5  ;;  %v7175_v11 = vsel %vm6914_vm7, %v5203_v1, %v1330_v33  ;;  %v2081_v6 = vshll.u32 %v7145_v49, 16  ;;  %v5311_v63 = vld [vmem:[%s6584_s9 + $0x1c] sm:$0xf]  ;;  %v2085_v17 = vshrl.u32 %v7145_v49, 16 }
  0x7c   : > { %6065 = vmatprep.mubr.msk.bf16.mxu0 %vm701_vm3, %v5216_v9  ;;  %v7150_v9 = vsel %vm6914_vm7, %v1353_v7, %v1354_v16  ;;  %v7166_v7 = vsel %vm6914_vm7, %v1360_v30, %v1361_v50  ;;  %v2074_v5 = vrot.slane %v2072_v44, 4  ;;  %v2077_v34 = vrot.slane %v2075_v32, 5  ;;  %v5313_v15 = vld [vmem:[%s6584_s9 + $0x24] sm:$0xf]  ;;  %v7194_v44 = vld [vmem:[%s6584_s9 + $0x28] sm:$0xf] }
  0x7d   : > { %v2096_v50 = vshrl.u32 %v5310_v40, 16  ;;  %v1334_v1 = vsel %vm6914_vm7, %v1332_v20, %v1333_v60  ;;  %v5208_v33 = vrot.slane %v1222_v57, 9  ;;  %v7189_v30 = vrot.slane %v2081_v6, 5 }
  0x7e   : > { %6028 = vmatmul.mubr.msk.bf16.gmra.mxu1 %vm701_vm3, %v5166_v52  ;;  %v1365_v52 = vrot.slane %v6893_v37, 5  ;;  %v2099_v16 = vshll.u32 %v5310_v40, 16  ;;  %v1368_v23 = vrot.slane %v6898_v61, 5  ;;  %v2087_v4 = vrot.slane %v2085_v17, 4 }
  0x7f   : > { %6031 = vmatprep.mubr.msk.bf16.mxu1 %vm701_vm3, %v5167_v8  ;;  %v5312_v8 = vld [vmem:[%s6584_s9 + $0x20] sm:$0x1]  ;;  %v2098_v3 = vrot.slane %v2096_v50, 4  ;;  %v2105_v13 = vshll.u32 %v5311_v63, 16  ;;  %v2091_v20 = vshll.u32 %v7181_v47, 16  ;;  %v2109_v57 = vshrl.u32 %v5311_v63, 16 }
  0x80   : > { %v1367_v32 = vrot.slane %v1365_v52, 4  ;;  %v2101_v60 = vrot.slane %v2099_v16, 5  ;;  %v5219_v61 = vcombine.low %v7137_v18, %v7160_v45  ;;  %v5220_v40 = vcombine.low %v7175_v11, %v1334_v1 }
  0x81   : > { %v2078_v6 = vor.u32 %v2077_v34, %v2074_v5  ;;  %v7205_v17 = vrot.slane %v2105_v13, 5  ;;  %v2088_v28 = vor.u32 %v2087_v4, %v7189_v30  ;;  %v2115_v50 = vshll.u32 %v5312_v8, 16  ;;  %v7232_v5 = vld [vmem:[%s6584_s9 + $0x34] sm:$0xf] }
  0x82   : > { %v2102_v56 = vor.u32 %v2101_v60, %v2098_v3  ;;  %v7217_v18 = vsel %vm6914_vm7, %v5208_v33, %v1365_v52  ;;  %v2120_v13 = vshrl.u32 %v5313_v15, 16  ;;  %v2123_v45 = vshll.u32 %v5313_v15, 16  ;;  %v5316_v52 = vld [vmem:[%s6584_s9 + $0x30] sm:$0xf] }
  0x83   : > { %6066 = vmatmul.mubr.msk.bf16.gmra.mxu0 %vm701_vm3, %v5217_v41  ;;  %v2111_v41 = vrot.slane %v2109_v57, 4  ;;  %v2129_v11 = vshll.u32 %v7194_v44, 16  ;;  %v9270_v3 = vcombine.low %v6603_v12, %v6607_v14  ;;  %v7226_v4 = vsel %vm6914_vm7, %v1367_v32, %v1368_v23 }
  0x84   : > { %6069 = vmatprep.mubr.msk.bf16.mxu0 %vm701_vm3, %v5218_v51  ;;  %v9269_v51 = vcombine.low %v6869_v62, %v6876_v55  ;;  %v2093_v62 = vrot.slane %v2091_v20, 5  ;;  %v2133_v63 = vshrl.u32 %v7194_v44, 16  ;;  %v2079_v34 = vrot.slane %v2078_v6, 4 }
  0x85   : > { %v2112_v55 = vor.u32 %v2111_v41, %v7205_v17  ;;  %v2122_v8 = vrot.slane %v2120_v13, 4  ;;  %v2125_v1 = vrot.slane %v2123_v45, 5  ;;  %v7234_v33 = vrot.slane %v2129_v11, 5  ;;  %v7240_v41 = vld [vmem:[%s6584_s9 + $0x38] sm:$0x1] }
  0x86   : > { %6032 = vmatmul.mubr.msk.bf16.gmra.mxu1 %vm701_vm3, %v9269_v51  ;;  %v2089_v12 = vrot.slane %v2088_v28, 4  ;;  %v2103_v14 = vrot.slane %v2102_v56, 4  ;;  %v2117_v16 = vrot.slane %v2115_v50, 5  ;;  %v2135_v23 = vrot.slane %v2133_v63, 4  ;;  %v5319_v13 = vld [vmem:[%s6584_s9 + $0x3c] sm:$0xf] }
  0x87   : > { %6035 = vmatprep.mubr.msk.bf16.mxu1 %vm701_vm3, %v9270_v3  ;;  %v2113_v15 = vrot.slane %v2112_v55, 4  ;;  %v2139_v32 = vshll.u32 %v7209_v21, 16  ;;  %v2144_v20 = vshrl.u32 %v5316_v52, 16  ;;  %v2147_v60 = vshll.u32 %v5316_v52, 16 }
  0x88   : > { %v2126_v57 = vor.u32 %v2125_v1, %v2122_v8  ;;  %v2136_v6 = vor.u32 %v2135_v23, %v7234_v33  ;;  %v2153_v28 = vshll.u32 %v7232_v5, 16  ;;  %v2157_v56 = vshrl.u32 %v7232_v5, 16  ;;  %v5322_v8 = vld [vmem:[%s6584_s9 + $0x48] sm:$0xf]  ;;  %v7267_v1 = vld [vmem:[%s6584_s9 + $0x4c] sm:$0xf] }
  0x89   : > { %v2146_v50 = vrot.slane %v2144_v20, 4  ;;  %v2149_v51 = vrot.slane %v2147_v60, 5  ;;  %v9271_v3 = vcombine.low %v6645_v53, %v6649_v58  ;;  %v5225_v55 = vcombine.low %v7217_v18, %v7226_v4 }
  0x8a   : > { %v7246_v45 = vrot.slane %v2153_v28, 5  ;;  %v2159_v11 = vrot.slane %v2157_v56, 4  ;;  %v2094_v63 = vsel %vm6628_vm4, %v2089_v12, %v2093_v62  ;;  %v2108_v52 = vsel %vm6628_vm4, %v2103_v14, %v7205_v17 }
  0x8b   : > { %6070 = vmatmul.mubr.msk.bf16.gmra.mxu0 %vm701_vm3, %v5219_v61  ;;  %v7249_v61 = vld [vmem:[%s6584_s9 + $0x40] sm:$0xf]  ;;  %v9272_v53 = vcombine.low %v6683_v35, %v6694_v46  ;;  %v2118_v58 = vsel %vm6628_vm4, %v2113_v15, %v2117_v16  ;;  %v2127_v23 = vrot.slane %v2126_v57, 4  ;;  %v2150_v20 = vor.u32 %v2149_v51, %v2146_v50  ;;  %v7301_v50 = vld [vmem:[%s6584_s9 + $0x44] sm:$0x1] }
  0x8c   : > { %6073 = vmatprep.mubr.msk.bf16.mxu0 %vm701_vm3, %v5220_v40  ;;  %v2084_v40 = vsel %vm6628_vm4, %v2079_v34, %v7189_v30  ;;  %v2137_v30 = vrot.slane %v2136_v6, 4  ;;  %v2141_v34 = vrot.slane %v2139_v32, 5  ;;  %v2163_v62 = vshll.u32 %v7240_v41, 16  ;;  %v5325_v51 = vld [vmem:[%s6584_s9 + $0x54] sm:$0xf] }
  0x8d   : > { %v2168_v12 = vshrl.u32 %v5319_v13, 16  ;;  %v2171_v17 = vshll.u32 %v5319_v13, 16  ;;  %v7278_v14 = vsel %vm750_vm0, %v7009_v22, 0  ;;  %v2160_v35 = vor.u32 %v2159_v11, %v7246_v45 }
  0x8e   : > { %6036 = vmatmul.mubr.msk.bf16.gmra.mxu1 %vm701_vm3, %v9271_v3  ;;  %v2177_v46 = vshll.u32 %v7249_v61, 16  ;;  %v2181_v16 = vshrl.u32 %v7249_v61, 16  ;;  %v7283_v15 = vcombine.low %v2084_v40, %v2094_v63  ;;  %v7287_v32 = vsel %vm750_vm0, %v6981_v24, 0  ;;  %v7310_v40 = vld [vmem:[%s6584_s9 + $0x58] sm:$0xf] }
  0x8f   : > { %6039 = vmatprep.mubr.msk.bf16.mxu1 %vm701_vm3, %v9272_v53  ;;  %v2192_v60 = vshrl.u32 %v5322_v8, 16  ;;  %v2195_v57 = vshll.u32 %v5322_v8, 16  ;;  %v9273_v6 = vcombine.low %v7096_v25, %v7106_v54  ;;  %v7293_v22 = vcombine.low %v2108_v52, %v2118_v58  ;;  %v7315_v8 = vld [vmem:[%s6584_s9 + $0x50] sm:$0x1] }
  0x90   : > { %v2132_v28 = vsel %vm6628_vm4, %v2127_v23, %v7234_v33  ;;  %v2142_v56 = vsel %vm6628_vm4, %v2137_v30, %v2141_v34  ;;  %v2201_v24 = vshll.u32 %v7267_v1, 16  ;;  %v9274_v25 = vcombine.low %v7110_v39, %v7120_v27  ;;  %v5328_v34 = vld [vmem:[%s6584_s9 + $0x60] sm:$0xf] }
  0x91   : > { %v2151_v54 = vrot.slane %v2150_v20, 4  ;;  %v2165_v13 = vrot.slane %v2163_v62, 5  ;;  %v2170_v11 = vrot.slane %v2168_v12, 4  ;;  %v2173_v3 = vrot.slane %v2171_v17, 5 }
  0x92   : > { %v2161_v33 = vrot.slane %v2160_v35, 4  ;;  %v7312_v63 = vrot.slane %v2177_v46, 5  ;;  %v2183_v52 = vrot.slane %v2181_v16, 4  ;;  %v2205_v53 = vshrl.u32 %v7267_v1, 16  ;;  %v7332_v35 = vld [vmem:[%s6584_s9 + $0x5c] sm:$0x1] }
  0x93   : > { %6074 = vmatmul.mubr.msk.bf16.gmra.mxu0 %vm701_vm3, %v9273_v6  ;;  %v9275_v39 = vcombine.low %v6733_v36, %v6740_v43  ;;  %v2194_v27 = vrot.slane %v2192_v60, 4  ;;  %v2197_v58 = vrot.slane %v2195_v57, 5  ;;  %v2216_v23 = vshrl.u32 %v5325_v51, 16 }
  0x94   : > { %6077 = vmatprep.mubr.msk.bf16.mxu0 %vm701_vm3, %v9274_v25  ;;  %v2219_v30 = vshll.u32 %v5325_v51, 16  ;;  %v9276_v20 = vcombine.low %v9259_v2, %v9258_v10  ;;  %v7327_v62 = vcombine.low %v2132_v28, %v2142_v56  ;;  %v7329_v12 = vrot.slane %v2201_v24, 5  ;;  %v7345_v28 = vld [vmem:[%s6584_s9 + $0x64] sm:$0xf] }
  0x95   : > { %v2207_v17 = vrot.slane %v2205_v53, 4  ;;  %v2225_v36 = vshll.u32 %v7310_v40, 16  ;;  %v2187_v43 = vshll.u32 %v7301_v50, 16  ;;  %v2218_v46 = vrot.slane %v2216_v23, 4 }
  0x96   : > { %6040 = vmatmul.mubr.msk.bf16.gmra.mxu1 %vm701_vm3, %v9275_v39  ;;  %v2221_v16 = vrot.slane %v2219_v30, 5  ;;  %v2229_v60 = vshrl.u32 %v7310_v40, 16  ;;  %v2156_v10 = vsel %vm6628_vm4, %v2151_v54, %v7246_v45  ;;  %v2166_v2 = vsel %vm6628_vm4, %v2161_v33, %v2165_v13  ;;  %v7367_v30 = vld [vmem:[%s6584_s9 + $0x68] sm:$0x1] }
  0x97   : > { %6043 = vmatprep.mubr.msk.bf16.mxu1 %vm701_vm3, %v9276_v20  ;;  %v2174_v57 = vor.u32 %v2173_v3, %v2170_v11  ;;  %v7342_v6 = vrot.slane %v2225_v36, 5  ;;  %v2184_v56 = vor.u32 %v2183_v52, %v7312_v63  ;;  %v2198_v24 = vor.u32 %v2197_v58, %v2194_v27  ;;  %v5331_v3 = vld [vmem:[%s6584_s9 + $0x6c] sm:$0xf]  ;;  %v7364_v27 = vld [vmem:[%s6584_s9 + $0x70] sm:$0xf] }
  0x98   : > { %v2211_v51 = vshll.u32 %v7315_v8, 16  ;;  %v2231_v25 = vrot.slane %v2229_v60, 4  ;;  %v9277_v53 = vcombine.low %v7130_v19, %v7150_v9  ;;  %v2208_v45 = vor.u32 %v2207_v17, %v7329_v12 }
  0x99   : > { %v2222_v54 = vor.u32 %v2221_v16, %v2218_v46  ;;  %v2240_v13 = vshrl.u32 %v5328_v34, 16  ;;  %v2243_v11 = vshll.u32 %v5328_v34, 16  ;;  %v9278_v33 = vcombine.low %v7142_v59, %v7166_v7  ;;  %v5334_v16 = vld [vmem:[%s6584_s9 + $0x78] sm:$0xf] }
  0x9a   : > { %v2232_v52 = vor.u32 %v2231_v25, %v7342_v6  ;;  %v2235_v39 = vshll.u32 %v7332_v35, 16  ;;  %v2249_v19 = vshll.u32 %v7345_v28, 16  ;;  %v2253_v9 = vshrl.u32 %v7345_v28, 16 }
  0x9b   : > { %6078 = vmatmul.mubr.msk.bf16.gmra.mxu0 %vm701_vm3, %v9277_v53  ;;  %v2175_v58 = vrot.slane %v2174_v57, 4  ;;  %v2189_v23 = vrot.slane %v2187_v43, 5  ;;  %v2242_v34 = vrot.slane %v2240_v13, 4  ;;  %v2245_v20 = vrot.slane %v2243_v11, 5 }
  0x9c   : > { %6081 = vmatprep.mubr.msk.bf16.mxu0 %vm701_vm3, %v9278_v33  ;;  %v9279_v59 = vcombine.low %v9262_v26, %v9261_v38  ;;  %v7373_v7 = vcombine.low %v2156_v10, %v2166_v2  ;;  %v2185_v17 = vrot.slane %v2184_v56, 4  ;;  %v2199_v36 = vrot.slane %v2198_v24, 4  ;;  %v7383_v2 = vld [vmem:[%s6584_s9 + $0x7c] sm:$0xf] }
  0x9d   : > { %v7375_v46 = vrot.slane %v2249_v19, 5  ;;  %v9280_v43 = vcombine.low %v9265_v42, %v9264_v48  ;;  %v2209_v60 = vrot.slane %v2208_v45, 4  ;;  %v2213_v57 = vrot.slane %v2211_v51, 5  ;;  %9281 = vst [vmem:[#allocation6_spill] sm:$0xff] %v7383_v2  ;;  %v5337_v19 = vld [vmem:[%s6584_s9 + $0x84] sm:$0xf] }
  0x9e   : > { %6044 = vmatmul.mubr.msk.bf16.gmra.mxu1 %vm701_vm3, %v9279_v59  ;;  %v2223_v25 = vrot.slane %v2222_v54, 4  ;;  %v2255_v38 = vrot.slane %v2253_v9, 4  ;;  %v2233_v26 = vrot.slane %v2232_v52, 4  ;;  %v2237_v53 = vrot.slane %v2235_v39, 5 }
  0x9f   : > { %6047 = vmatprep.mubr.msk.bf16.mxu1 %vm701_vm3, %v9280_v43  ;;  %v2246_v13 = vor.u32 %v2245_v20, %v2242_v34  ;;  %v2264_v10 = vshrl.u32 %v5331_v3, 16  ;;  %v2180_v56 = vsel %vm6628_vm4, %v2175_v58, %v7312_v63  ;;  %v2267_v24 = vshll.u32 %v5331_v3, 16  ;;  %v6375_v63 = vld [vmem:[%s6584_s9 + $0xc] sm:$0xff]   ;;  %v7417_v34 = vld [vmem:[%s6584_s9 + $0x88] sm:$0xf] }
  0xa0   : > { %v2273_v48 = vshll.u32 %v7364_v27, 16  ;;  %v2277_v42 = vshrl.u32 %v7364_v27, 16  ;;  %v2190_v51 = vsel %vm6628_vm4, %v2185_v17, %v2189_v23  ;;  %v2204_v45 = vsel %vm6628_vm4, %v2199_v36, %v7329_v12  ;;  %9282 = vst [vmem:[#allocation8_spill] sm:$0xff] %v7417_v34  ;;  %v7426_v36 = vld [vmem:[%s6584_s9 + $0x74] sm:$0x1] }
  0xa1   : > { %v2256_v54 = vor.u32 %v2255_v38, %v7375_v46  ;;  %v2259_v11 = vshll.u32 %v7367_v30, 16  ;;  %v2214_v3 = vsel %vm6628_vm4, %v2209_v60, %v2213_v57  ;;  %v2228_v33 = vsel %vm6628_vm4, %v2223_v25, %v7342_v6  ;;  %9284 = vst [vmem:[#allocation7_spill] sm:$0xff] %v7426_v36  ;;  %v7436_v38 = vld [vmem:[%s6584_s9 + $0x80] sm:$0x1] }
  0xa2   : > { %v2288_v52 = vshrl.u32 %v5334_v16, 16  ;;  %v2291_v12 = vshll.u32 %v5334_v16, 16  ;;  %v2238_v18 = vsel %vm6628_vm4, %v2233_v26, %v2237_v53  ;;  %v2247_v4 = vrot.slane %v2246_v13, 4  ;;  %9285 = vst [vmem:[#allocation9_spill] sm:$0xff] %v7436_v38  ;;  %v7439_v26 = vld [vmem:[%s6584_s9 + $0x8c] sm:$0x1] }
  0xa3   : > { %6082 = vmatmul.mubr.msk.bf16.gmra.mxu0 %vm701_vm3, %v5225_v55  ;;  %v2266_v55 = vrot.slane %v2264_v10, 4  ;;  %v2297_v39 = vshll.u32 %v7383_v2, 16  ;;  %v2269_v9 = vrot.slane %v2267_v24, 5  ;;  %v7413_v58 = vrot.slane %v2273_v48, 5  ;;  %9286 = vst [vmem:[#allocation11_spill] sm:$0xff] %v7439_v26  ;;  %v6376_v10 = vld [vmem:[%s6584_s9 + $0x18] sm:$0xff]  }
  0xa4   : > { %6121 = vmatprep.mubr.msk.bf16.mxu0 %vm701_vm3, %v7283_v15  ;;  %v2279_v23 = vrot.slane %v2277_v42, 4  ;;  %v2301_v6 = vshrl.u32 %v7383_v2, 16  ;;  %v9283_v15 = vcombine.low %v9267_v29, %v6893_v37  ;;  %v7423_v20 = vcombine.low %v2180_v56, %v2190_v51  ;;  %v5340_v51 = vld [vmem:[%s6584_s9 + $0x90] sm:$0xf] }
  0xa5   : > { %v2257_v59 = vrot.slane %v2256_v54, 4  ;;  %v2261_v17 = vrot.slane %v2259_v11, 5  ;;  %v2290_v16 = vrot.slane %v2288_v52, 4  ;;  %v2293_v43 = vrot.slane %v2291_v12, 5 }
  0xa6   : > { %6048 = vmatmul.mubr.msk.bf16.gmra.mxu1 %vm701_vm3, %v9283_v15  ;;  %v7429_v60 = vrot.slane %v2297_v39, 5  ;;  %v2303_v57 = vrot.slane %v2301_v6, 4  ;;  %v2312_v25 = vshrl.u32 %v5337_v19, 16  ;;  %v7431_v37 = vcombine.low %v2204_v45, %v2214_v3  ;;  %v7450_v45 = vld [vmem:[%s6584_s9 + $0x94] sm:$0xf] }
  0xa7   : > { %6087 = vmatprep.mubr.msk.bf16.mxu1 %vm701_vm3, %v6375_v63  ;;  %v7433_v29 = vcombine.low %v2228_v33, %v2238_v18  ;;  %v2315_v53 = vshll.u32 %v5337_v19, 16  ;;  %v2321_v13 = vshll.u32 %v7417_v34, 16  ;;  %v2252_v56 = vsel %vm6628_vm4, %v2247_v4, %v7375_v46  ;;  %9287 = vst [vmem:[#allocation10_spill] sm:$0xff] %v7450_v45  ;;  %v7458_v33 = vld [vmem:[%s9199_s1 + $0x10] sm:$0x3]  ;;  %v6377_v46 = vld [vmem:[%s6584_s9 + $0x24] sm:$0xff]  }
  0xa8   : > { %v2270_v24 = vor.u32 %v2269_v9, %v2266_v55  ;;  %v2280_v48 = vor.u32 %v2279_v23, %v7413_v58  ;;  %v2283_v42 = vshll.u32 %v7426_v36, 16  ;;  %v2314_v54 = vrot.slane %v2312_v25, 4  ;;  %9288 = vst [vmem:[#allocation12_spill] sm:$0xff] %v7458_v33 }
  0xa9   : > { %v2317_v11 = vrot.slane %v2315_v53, 5  ;;  %v7452_v63 = vrot.slane %v2321_v13, 5  ;;  %v2325_v3 = vshrl.u32 %v7417_v34, 16  ;;  %v2262_v52 = vsel %vm6628_vm4, %v2257_v59, %v2261_v17 }
  0xaa   : > { %v2294_v12 = vor.u32 %v2293_v43, %v2290_v16  ;;  %v2304_v18 = vor.u32 %v2303_v57, %v7429_v60  ;;  %v2307_v4 = vshll.u32 %v7436_v38, 16  ;;  %v2336_v19 = vshrl.u32 %v5340_v51, 16  ;;  %v7492_v57 = vld [vmem:[%s6584_s9 + $0xa0] sm:$0xf] }
  0xab   : > { %6122 = vmatmul.mubr.msk.bf16.vlgmr.msra.gmra.mxu0 %vm701_vm3, %v7293_v22  ;;  %v2318_v55 = vor.u32 %v2317_v11, %v2314_v54  ;;  %v2327_v39 = vrot.slane %v2325_v3, 4  ;;  %v2339_v9 = vshll.u32 %v5340_v51, 16  ;;  %v5343_v22 = vld [vmem:[%s6584_s9 + $0x9c] sm:$0xf]  ;;  %v7471_v23 = vrot.slane %v2270_v24, 4  ;;  %9290 = vst [vmem:[#allocation13_spill] sm:$0xff] %v7492_v57 }
  0xac   : > { %6188 = vmatpush3.bf16.msra.mxu0 %v7287_v32  ;;  %6125 = vmatprep.mubr.msk.bf16.mxu0 %vm701_vm3, %v7327_v62  ;;  %v7473_v6 = vrot.slane %v2283_v42, 5  ;;  %v2331_v15 = vshll.u32 %v7439_v26, 16  ;;  %v2345_v59 = vshll.u32 %v7450_v45, 16  ;;  %v7480_v32 = vld [vmem:[%s9199_s1 + $0xe] sm:$0x3]  ;;  %v7485_v62 = vcombine.low %v2252_v56, %v2262_v52 }
  0xad   : > { %9289 = vst [vmem:[#allocation14_spill] sm:$0xff] %v7480_v32  ;;  %6300 = vmatprep.subr.msk.bf16.mxu0 %vm750_vm0, %v7458_v33  ;;  %v7487_v17 = vrot.slane %v2280_v48, 4  ;;  %v2328_v16 = vor.u32 %v2327_v39, %v7452_v63  ;;  %v2349_v43 = vshrl.u32 %v7450_v45, 16  ;;  %v7496_v25 = vrot.slane %v2294_v12, 4  ;;  %v7505_v56 = vld [vmem:[%s6584_s9 + $0x98] sm:$0x1] }
  0xae   : > { %6088 = vmatmul.mubr.msk.bf16.vlgmr.msra.gmra.mxu1 %vm701_vm3, %v6376_v10  ;;  %v7498_v53 = vrot.slane %v2304_v18, 4  ;;  %v7500_v13 = vrot.slane %v2307_v4, 5  ;;  %v7502_v10 = vrot.slane %v2318_v55, 4  ;;  %9291 = vst [vmem:[#allocation15_spill] sm:$0xff] %v7505_v56  ;;  %v2338_v24 = vrot.slane %v2336_v19, 4  ;;  %v6379_v19 = vld [vmem:[%s6584_s9 + $0x3c] sm:$0xff]  }
  0xaf   : > { %6154 = vmatpush3.bf16.msra.mxu1 %v7278_v14  ;;  %6091 = vmatprep.mubr.msk.bf16.mxu1 %vm701_vm3, %v6377_v46  ;;  %v2341_v48 = vrot.slane %v2339_v9, 5  ;;  %v2360_v42 = vshrl.u32 %v5343_v22, 16  ;;  %v2363_v51 = vshll.u32 %v5343_v22, 16  ;;  %v6378_v14 = vld [vmem:[%s6584_s9 + $0x30] sm:$0xff]   ;;  %v7514_v11 = vrot.slane %v2331_v15, 5 }
  0xb0   : > { %6299 = vmatprep.subr.msk.bf16.mxu1 %vm750_vm0, %v7480_v32  ;;  %v7516_v3 = vrot.slane %v2345_v59, 5  ;;  %v2369_v46 = vshll.u32 %v7492_v57, 16  ;;  %v5346_v52 = vld [vmem:[%s6584_s9 + $0xa8] sm:$0xf]  ;;  %v7520_v12 = vrot.slane %v2328_v16, 4  ;;  %v2351_v18 = vrot.slane %v2349_v43, 4 }
  0xb1   : > { %v2355_v4 = vshll.u32 %v7505_v56, 16  ;;  %v2373_v55 = vshrl.u32 %v7492_v57, 16  ;;  %v7525_v39 = vld [vmem:[%s6584_s9 + $0xac] sm:$0xf]  ;;  %v2342_v59 = vor.u32 %v2341_v48, %v2338_v24  ;;  %v7549_v16 = vld [vmem:[%s6584_s9 + $0xa4] sm:$0x1] }
  0xb2   : > { %9292 = vst [vmem:[#allocation16_spill] sm:$0xff] %v7525_v39  ;;  %9293 = vst [vmem:[#allocation5_spill] sm:$0xff] %v7549_v16  ;;  %v2362_v43 = vrot.slane %v2360_v42, 4  ;;  %v2365_v22 = vrot.slane %v2363_v51, 5  ;;  %v2384_v54 = vshrl.u32 %v5346_v52, 16  ;;  %v7551_v9 = vrot.slane %v2369_v46, 5 }
  0xb3   : > { %6126 = vmatmul.mubr.msk.bf16.gmra.mxu0 %vm701_vm3, %v7373_v7  ;;  %v2375_v32 = vrot.slane %v2373_v55, 4  ;;  %v2387_v15 = vshll.u32 %v5346_v52, 16  ;;  %v2393_v33 = vshll.u32 %v7525_v39, 16  ;;  %v5349_v57 = vld [vmem:[%s6584_s9 + $0xb4] sm:$0xf]  ;;  %v2352_v24 = vor.u32 %v2351_v18, %v7516_v3 }
  0xb4   : > { %6129 = vmatprep.mubr.msk.bf16.mxu0 %vm701_vm3, %v7423_v20  ;;  %v2334_v20 = vsel %vm6628_vm4, %v7520_v12, %v7514_v11  ;;  %v7561_v48 = vrot.slane %v2355_v4, 5  ;;  %v7564_v42 = vld [vmem:[%s6584_s9 + $0xb0] sm:$0x1]  ;;  %v2386_v51 = vrot.slane %v2384_v54, 4  ;;  %v7567_v46 = vld [vmem:[%s6584_s9 + $0xb8] sm:$0xf]  ;;  %v2366_v18 = vor.u32 %v2365_v22, %v2362_v43 }
  0xb5   : > { %9294 = vst [vmem:[#allocation17_spill] sm:$0xff] %v7564_v42  ;;  %9295 = vst [vmem:[#allocation18_spill] sm:$0xff] %v7567_v46  ;;  %v2389_v52 = vrot.slane %v2387_v15, 5  ;;  %v7571_v55 = vrot.slane %v2393_v33, 5  ;;  %v2397_v11 = vshrl.u32 %v7525_v39, 16  ;;  %v7574_v12 = vrot.slane %v2342_v59, 4 }
  0xb6   : > { %6092 = vmatmul.mubr.msk.bf16.gmra.mxu1 %vm701_vm3, %v6378_v14  ;;  %v2379_v14 = vshll.u32 %v7549_v16, 16  ;;  %v7577_v4 = vld [vmem:[%s6584_s9 + $0xbc] sm:$0x1]  ;;  %v2408_v54 = vshrl.u32 %v5349_v57, 16  ;;  %v2411_v7 = vshll.u32 %v5349_v57, 16  ;;  %v2376_v56 = vor.u32 %v2375_v32, %v7551_v9  ;;  %v6380_v16 = vld [vmem:[%s6584_s9 + $0x48] sm:$0xff]  }
  0xb7   : > { %6095 = vmatprep.mubr.msk.bf16.mxu1 %vm701_vm3, %v6379_v19  ;;  %v2399_v45 = vrot.slane %v2397_v11, 4  ;;  %v2403_v19 = vshll.u32 %v7564_v42, 16  ;;  %v2417_v15 = vshll.u32 %v7567_v46, 16  ;;  %v5352_v33 = vld [vmem:[%s6584_s9 + $0xc0] sm:$0xf]  ;;  %v2390_v26 = vor.u32 %v2389_v52, %v2386_v51  ;;  %v6381_v57 = vld [vmem:[%s6584_s9 + $0x54] sm:$0xff]  }
  0xb8   : > { %v2410_v39 = vrot.slane %v2408_v54, 4  ;;  %v2413_v34 = vrot.slane %v2411_v7, 5  ;;  %v2421_v59 = vshrl.u32 %v7567_v46, 16  ;;  %v7586_v22 = vld [vmem:[%s6584_s9 + $0xc4] sm:$0xf]  ;;  %v2353_v43 = vrot.slane %v2352_v24, 4 }
  0xb9   : > { %v2381_v32 = vrot.slane %v2379_v14, 5  ;;  %v2400_v11 = vor.u32 %v2399_v45, %v7571_v55  ;;  %v2419_v42 = vrot.slane %v2417_v15, 5  ;;  %v2427_v7 = vshll.u32 %v7577_v4, 16  ;;  %v7598_v45 = vld [vmem:[%s6584_s9 + $0xc8] sm:$0x1] }
  0xba   : > { %v2414_v51 = vor.u32 %v2413_v34, %v2410_v39  ;;  %v2423_v52 = vrot.slane %v2421_v59, 4  ;;  %v2432_v54 = vshrl.u32 %v5352_v33, 16  ;;  %v2367_v46 = vrot.slane %v2366_v18, 4 }
  0xbb   : > { %6130 = vmatmul.mubr.msk.bf16.gmra.mxu0 %vm701_vm3, %v7431_v37  ;;  %v2377_v38 = vrot.slane %v2376_v56, 4  ;;  %v2435_v2 = vshll.u32 %v5352_v33, 16  ;;  %v2441_v37 = vshll.u32 %v7586_v22, 16  ;;  %v2391_v24 = vrot.slane %v2390_v26, 4 }
  0xbc   : > { %6133 = vmatprep.mubr.msk.bf16.mxu0 %vm701_vm3, %v7433_v29  ;;  %v2405_v14 = vrot.slane %v2403_v19, 5  ;;  %v2424_v36 = vor.u32 %v2423_v52, %v2419_v42  ;;  %v2434_v15 = vrot.slane %v2432_v54, 4  ;;  %v2401_v34 = vrot.slane %v2400_v11, 4 }
  0xbd   : > { %v2437_v29 = vrot.slane %v2435_v2, 5  ;;  %v7601_v39 = vrot.slane %v2441_v37, 5  ;;  %v2445_v56 = vshrl.u32 %v7586_v22, 16  ;;  %v9296_v26 = vsel %vm6628_vm4, %v7487_v17, %v7473_v6 }
  0xbe   : > { %6096 = vmatmul.mubr.msk.bf16.gmra.mxu1 %vm701_vm3, %v6380_v16  ;;  %v9297_v16 = vsel %vm6628_vm4, %v7471_v23, %v7413_v58  ;;  %v2415_v19 = vrot.slane %v2414_v51, 4  ;;  %v2425_v33 = vrot.slane %v2424_v36, 4  ;;  %v2429_v2 = vrot.slane %v2427_v7, 5  ;;  %v6382_v23 = vld [vmem:[%s6584_s9 + $0x60] sm:$0xff]  }
  0xbf   : > { %6099 = vmatprep.mubr.msk.bf16.mxu1 %vm701_vm3, %v6381_v57  ;;  %v5364_v18 = vcombine.low %v9297_v16, %v9296_v26  ;;  %v9298_v59 = vsel %vm6628_vm4, %v7498_v53, %v7500_v13  ;;  %v9299_v6 = vsel %vm6628_vm4, %v7496_v25, %v7429_v60  ;;  %v2438_v57 = vor.u32 %v2437_v29, %v2434_v15  ;;  %v5390_v13 = vld [vmem:[%s6584_s9 + $0x24] sm:$0xe]  ;;  %v5393_v26 = vld [vmem:[%s6584_s9 + $0x48] sm:$0xe] }
  0xc0   : > { %v5365_v17 = vcombine.low %v9299_v6, %v9298_v59  ;;  %v2447_v11 = vrot.slane %v2445_v56, 4  ;;  %v2451_v58 = vshll.u32 %v7598_v45, 16  ;;  %v9300_v36 = vsel %vm6628_vm4, %v7502_v10, %v7452_v63  ;;  %v6383_v63 = vld [vmem:[%s6584_s9 + $0x6c] sm:$0xff]   ;;  %v5394_v6 = vld [vmem:[%s6584_s9 + $0x54] sm:$0xe] }
  0xc1   : > { %v5366_v51 = vcombine.low %v9300_v36, %v2334_v20  ;;  %v2348_v53 = vsel %vm6628_vm4, %v7574_v12, %v7516_v3  ;;  %v2358_v60 = vsel %vm6628_vm4, %v2353_v43, %v7561_v48  ;;  %v2372_v25 = vsel %vm6628_vm4, %v2367_v46, %v7551_v9  ;;  %v7654_v12 = vld [vmem:[%s6584_s9 + $0xc] sm:$0xe] }
  0xc2   : > { %v2382_v10 = vsel %vm6628_vm4, %v2377_v38, %v2381_v32  ;;  %v2396_v3 = vsel %vm6628_vm4, %v2391_v24, %v7571_v55  ;;  %v2406_v20 = vsel %vm6628_vm4, %v2401_v34, %v2405_v14  ;;  %v2448_v48 = vor.u32 %v2447_v11, %v7601_v39  ;;  %v5391_v55 = vld [vmem:[%s6584_s9 + $0x30] sm:$0xe]  ;;  %v5392_v14 = vld [vmem:[%s6584_s9 + $0x3c] sm:$0xe] }
  0xc3   : > { %6134 = vmatmul.mubr.msk.bf16.gmra.mxu0 %vm701_vm3, %v7485_v62  ;;  %v2420_v62 = vsel %vm6628_vm4, %v2415_v19, %v2419_v42  ;;  %v2430_v38 = vsel %vm6628_vm4, %v2425_v33, %v2429_v2  ;;  %v7661_v9 = vrot.slane %v2438_v57, 4  ;;  %v2815_v46 = vrot.slane %v7145_v49, 5  ;;  %v6384_v57 = vld [vmem:[%s6584_s9 + $0x78] sm:$0xff]  }
  0xc4   : > { %6137 = vmatprep.mubr.msk.bf16.mxu0 %vm701_vm3, %v5364_v18  ;;  %v7665_v43 = vcombine.low %v2348_v53, %v2358_v60  ;;  %v7667_v32 = vrot.slane %v2448_v48, 4  ;;  %v7669_v52 = vrot.slane %v2451_v58, 5  ;;  %v5406_v7 = vrot.slane %v5390_v13, 9  ;;  %v6385_v53 = vld [vmem:[%s6584_s9 + $0x84] sm:$0xff]   ;;  %v5395_v13 = vld [vmem:[%s6584_s9 + $0x60] sm:$0xe] }
  0xc5   : > { %v7672_v54 = vcombine.low %v2372_v25, %v2382_v10  ;;  %v7674_v42 = vcombine.low %v2396_v3, %v2406_v20  ;;  %v5404_v37 = vrot.slane %v7654_v12, 9  ;;  %v2829_v24 = vrot.slane %v7194_v44, 5  ;;  %v6391_v49 = vld [vmem:[%s6584_s9 + $0x18] sm:$0xff]  }
  0xc6   : > { %6100 = vmatmul.mubr.msk.bf16.gmra.mxu1 %vm701_vm3, %v6382_v23  ;;  %v7680_v15 = vcombine.low %v2420_v62, %v2430_v38  ;;  %v2818_v34 = vrot.slane %v7181_v47, 5  ;;  %v2832_v29 = vrot.slane %v7209_v21, 5  ;;  %v5407_v56 = vrot.slane %v5391_v55, 9  ;;  %v5397_v55 = vld [vmem:[%s6584_s9 + $0x78] sm:$0xe] }
  0xc7   : > { %6103 = vmatprep.mubr.msk.bf16.mxu1 %vm701_vm3, %v6383_v63  ;;  %v2444_v16 = vsel %vm6628_vm4, %v7661_v9, %v7601_v39  ;;  %v7691_v44 = vrot.slane %v2815_v46, 4  ;;  %v7695_v18 = vsel %vm6914_vm7, %v5406_v7, %v2829_v24  ;;  %v2831_v19 = vrot.slane %v2829_v24, 4 }
  0xc8   : > { %v2454_v21 = vsel %vm6628_vm4, %v7667_v32, %v7669_v52  ;;  %v2836_v33 = vrot.slane %v7232_v5, 5  ;;  %v2839_v2 = vrot.slane %v7240_v41, 5  ;;  %v5408_v59 = vrot.slane %v5392_v14, 9  ;;  %v6390_v52 = vld [vmem:[%s6584_s9 + $0xc0] sm:$0xff]  }
  0xc9   : > { %v7707_v11 = vsel %vm6914_vm7, %v2831_v19, %v2832_v29  ;;  %v2843_v58 = vrot.slane %v7249_v61, 5  ;;  %v2846_v23 = vrot.slane %v7301_v50, 5  ;;  %v5409_v36 = vrot.slane %v5393_v26, 9  ;;  %v5398_v19 = vld [vmem:[%s6584_s9 + $0x84] sm:$0xe] }
  0xca   : > { %v5423_v5 = vcombine.low %v7695_v18, %v7707_v11  ;;  %v7717_v41 = vsel %vm6914_vm7, %v5407_v56, %v2836_v33  ;;  %v2838_v60 = vrot.slane %v2836_v33, 4  ;;  %v2850_v25 = vrot.slane %v7267_v1, 5 }
  0xcb   : > { %6138 = vmatmul.mubr.msk.bf16.gmra.mxu0 %vm701_vm3, %v5365_v17  ;;  %v7724_v61 = vsel %vm6914_vm7, %v5408_v59, %v2843_v58  ;;  %v2845_v50 = vrot.slane %v2843_v58, 4  ;;  %v2853_v17 = vrot.slane %v7315_v8, 5  ;;  %v5410_v63 = vrot.slane %v5394_v6, 9  ;;  %v9301_v59 = vld [vmem:[#allocation7_spill] sm:$0xff] }
  0xcc   : > { %6141 = vmatprep.mubr.msk.bf16.mxu0 %vm701_vm3, %v5366_v51  ;;  %v7729_v10 = vsel %vm6914_vm7, %v2838_v60, %v2839_v2  ;;  %v7733_v3 = vsel %vm6914_vm7, %v5409_v36, %v2850_v25  ;;  %v2852_v1 = vrot.slane %v2850_v25, 4  ;;  %v2857_v20 = vrot.slane %v7310_v40, 5  ;;  %v5396_v51 = vld [vmem:[%s6584_s9 + $0x6c] sm:$0xe]  ;;  %v6386_v58 = vld [vmem:[%s6584_s9 + $0x90] sm:$0xff]  }
  0xcd   : > { %v5424_v48 = vcombine.low %v7717_v41, %v7729_v10  ;;  %v7742_v8 = vsel %vm6914_vm7, %v2845_v50, %v2846_v23  ;;  %v2860_v62 = vrot.slane %v7332_v35, 5  ;;  %v5411_v38 = vrot.slane %v5395_v13, 9  ;;  %v9302_v36 = vld [vmem:[#allocation6_spill] sm:$0xff]  ;;  %v5399_v60 = vld [vmem:[%s6584_s9 + $0x90] sm:$0xe]  ;;  %v9303_v50 = vld [vmem:[#allocation9_spill] sm:$0xff] }
  0xce   : > { %6104 = vmatmul.mubr.msk.bf16.gmra.mxu1 %vm701_vm3, %v6384_v57  ;;  %v5425_v40 = vcombine.low %v7724_v61, %v7742_v8  ;;  %v7751_v7 = vsel %vm6914_vm7, %v2852_v1, %v2853_v17  ;;  %v7755_v24 = vsel %vm6914_vm7, %v5410_v63, %v2857_v20  ;;  %v2859_v14 = vrot.slane %v2857_v20, 4 }
  0xcf   : > { %6107 = vmatprep.mubr.msk.bf16.mxu1 %vm701_vm3, %v6385_v53  ;;  %v5426_v35 = vcombine.low %v7733_v3, %v7751_v7  ;;  %v2864_v29 = vrot.slane %v7345_v28, 5  ;;  %v2867_v56 = vrot.slane %v7367_v30, 5  ;;  %v5412_v26 = vrot.slane %v5396_v51, 9  ;;  %v9304_v51 = vld [vmem:[#allocation8_spill] sm:$0xff]  ;;  %v5530_v3 = vld [vmem:[%s6584_s9 + $0x48] sm:$0xf] }
  0xd0   : > { %v7764_v33 = vsel %vm6914_vm7, %v2859_v14, %v2860_v62  ;;  %v2871_v2 = vrot.slane %v7364_v27, 5  ;;  %v2874_v6 = vrot.slane %v9301_v59, 5  ;;  %v5413_v57 = vrot.slane %v5397_v55, 9  ;;  %v6387_v27 = vld [vmem:[%s6584_s9 + $0x9c] sm:$0xff]   ;;  %v9312_v55 = vld [vmem:[#allocation18_spill] sm:$0xff] }
  0xd1   : > { %v5427_v23 = vcombine.low %v7755_v24, %v7764_v33  ;;  %v7773_v28 = vsel %vm6914_vm7, %v5411_v38, %v2864_v29  ;;  %v2866_v30 = vrot.slane %v2864_v29, 4  ;;  %v2878_v53 = vrot.slane %v9302_v36, 5  ;;  %v5400_v38 = vld [vmem:[%s6584_s9 + $0x9c] sm:$0xe]  ;;  %v9307_v36 = vld [vmem:[#allocation15_spill] sm:$0xff] }
  0xd2   : > { %v7782_v25 = vsel %vm6914_vm7, %v5412_v26, %v2871_v2  ;;  %v2873_v13 = vrot.slane %v2871_v2, 4  ;;  %v2881_v17 = vrot.slane %v9303_v50, 5  ;;  %v5414_v63 = vrot.slane %v5398_v19, 9  ;;  %v5401_v26 = vld [vmem:[%s6584_s9 + $0xa8] sm:$0xe] }
  0xd3   : > { %6142 = vmatmul.mubr.msk.bf16.gmra.mxu0 %vm701_vm3, %v7665_v43  ;;  %v7789_v1 = vsel %vm6914_vm7, %v2866_v30, %v2867_v56  ;;  %v7793_v43 = vsel %vm6914_vm7, %v5413_v57, %v2878_v53  ;;  %v2880_v20 = vrot.slane %v2878_v53, 4  ;;  %v2885_v62 = vrot.slane %v9304_v51, 5  ;;  %v5403_v57 = vld [vmem:[%s6584_s9 + $0xc0] sm:$0xe]  ;;  %v6388_v19 = vld [vmem:[%s6584_s9 + $0xa8] sm:$0xff]  }
  0xd4   : > { %6145 = vmatprep.mubr.msk.bf16.mxu0 %vm701_vm3, %v7672_v54  ;;  %v7801_v14 = vsel %vm6914_vm7, %v2873_v13, %v2874_v6  ;;  %v9305_v54 = vld [vmem:[#allocation11_spill] sm:$0xff]  ;;  %v5415_v56 = vrot.slane %v5399_v60, 9  ;;  %v2895_v53 = vrot.slane %v9307_v36, 5  ;;  %v5416_v60 = vrot.slane %v5400_v38, 9  ;;  %v9310_v38 = vld [vmem:[#allocation16_spill] sm:$0xff] }
  0xd5   : > { %v2888_v29 = vrot.slane %v9305_v54, 5  ;;  %v7810_v2 = vsel %vm6914_vm7, %v2880_v20, %v2881_v17  ;;  %v7814_v59 = vsel %vm6914_vm7, %v5414_v63, %v2885_v62  ;;  %v2887_v6 = vrot.slane %v2885_v62, 4  ;;  %v5402_v13 = vld [vmem:[%s6584_s9 + $0xb4] sm:$0xe]  ;;  %v9308_v17 = vld [vmem:[#allocation13_spill] sm:$0xff] }
  0xd6   : > { %6108 = vmatmul.mubr.msk.bf16.gmra.mxu1 %vm701_vm3, %v6386_v58  ;;  %v9306_v58 = vld [vmem:[#allocation10_spill] sm:$0xff]  ;;  %v2899_v63 = vrot.slane %v9308_v17, 5  ;;  %v9309_v20 = vld [vmem:[#allocation5_spill] sm:$0xff]  ;;  %v5417_v62 = vrot.slane %v5401_v26, 9  ;;  %v2906_v36 = vrot.slane %v9310_v38, 5  ;;  %v5418_v26 = vrot.slane %v5402_v13, 9 }
  0xd7   : > { %6111 = vmatprep.mubr.msk.bf16.mxu1 %vm701_vm3, %v6387_v27  ;;  %v2892_v30 = vrot.slane %v9306_v58, 5  ;;  %v7824_v50 = vsel %vm6914_vm7, %v2887_v6, %v2888_v29  ;;  %v2902_v51 = vrot.slane %v9309_v20, 5  ;;  %v9311_v17 = vld [vmem:[#allocation17_spill] sm:$0xff]  ;;  %v6389_v27 = vld [vmem:[%s6584_s9 + $0xb4] sm:$0xff]   ;;  %v2819_v39 = vsel %vm6914_vm7, %v7691_v44, %v2818_v34  ;;  %v8041_v7 = vld [vmem:[%s6584_s9 + $0x4c] sm:$0xf] }
  0xd8   : > { %v7839_v29 = vsel %vm6914_vm7, %v5416_v60, %v2899_v63  ;;  %v2901_v6 = vrot.slane %v2899_v63, 4  ;;  %v2909_v20 = vrot.slane %v9311_v17, 5  ;;  %v2908_v38 = vrot.slane %v2906_v36, 4  ;;  %v6408_v44 = vld [vmem:[%s6584_s9 + $0x20] sm:$0x1] }
  0xd9   : > { %v7832_v54 = vsel %vm6914_vm7, %v5415_v56, %v2892_v30  ;;  %v2894_v58 = vrot.slane %v2892_v30, 4  ;;  %v7851_v30 = vsel %vm6914_vm7, %v5417_v62, %v2906_v36  ;;  %v2913_v60 = vrot.slane %v9312_v55, 5 }
  0xda   : > { %v5419_v63 = vrot.slane %v5403_v57, 9  ;;  %v7867_v55 = vsel %vm6914_vm7, %v2908_v38, %v2909_v20  ;;  %v2920_v57 = vrot.slane %v7586_v22, 5  ;;  %v2816_v22 = vsel %vm6914_vm7, %v5404_v37, %v2815_v46  ;;  %v6393_v38 = vld [vmem:[%s6584_s9 + $0x30] sm:$0xff]  }
  0xdb   : > { %6146 = vmatmul.mubr.msk.bf16.gmra.mxu0 %vm701_vm3, %v7674_v42  ;;  %v7847_v56 = vsel %vm6914_vm7, %v2894_v58, %v2895_v53  ;;  %v7860_v42 = vsel %vm6914_vm7, %v2901_v6, %v2902_v51  ;;  %v2916_v53 = vrot.slane %v7577_v4, 5  ;;  %v2915_v58 = vrot.slane %v2913_v60, 4 }
  0xdc   : > { %6149 = vmatprep.mubr.msk.bf16.mxu0 %vm701_vm3, %v7680_v15  ;;  %v7871_v15 = vsel %vm6914_vm7, %v5418_v26, %v2913_v60  ;;  %v2923_v51 = vrot.slane %v7598_v45, 5  ;;  %v5389_v45 = vld [vmem:[%s6584_s9 + $0x18] sm:$0xe]  ;;  %v7911_v9 = vsel %vm6914_vm7, %v5419_v63, %v2920_v57  ;;  %v2922_v46 = vrot.slane %v2920_v57, 4  ;;  %v6392_v26 = vld [vmem:[%s6584_s9 + $0x24] sm:$0xff]  }
  0xdd   : > { %v7899_v32 = vsel %vm6914_vm7, %v2915_v58, %v2916_v53  ;;  %v5405_v37 = vrot.slane %v5389_v45, 9  ;;  %v5421_v34 = vcombine.low %v2816_v22, %v2819_v39  ;;  %v9313_v60 = vld [vmem:[#allocation12_spill] sm:$0xff] }
  0xde   : > { %6112 = vmatmul.mubr.msk.bf16.gmra.mxu1 %vm701_vm3, %v6388_v19  ;;  %v5371_v19 = vcombine.low %v2444_v16, %v2454_v21  ;;  %v7916_v47 = vsel %vm6914_vm7, %v2922_v46, %v2923_v51  ;;  %v2825_v21 = vrot.slane %v6408_v44, 5  ;;  %v4579_v53 = vsel %vm750_vm0, %v9313_v60, 0  ;;  %v5518_v63 = vld [vmem:[%s6584_s9 + $0x18] sm:$0xf]  ;;  %v5519_v57 = vld [vmem:[%s6584_s9 + $0x1c] sm:$0xf] }
  0xdf   : > { %6115 = vmatprep.mubr.msk.bf16.mxu1 %vm701_vm3, %v6389_v27  ;;  %v6407_v27 = vld [vmem:[%s6584_s9 + $0x1c] sm:$0xf]  ;;  %v5521_v51 = vld [vmem:[%s6584_s9 + $0x24] sm:$0xf]  ;;  %v3627_v45 = vshrl.u32 %v5518_v63, 16  ;;  %v3636_v39 = vshll.u32 %v5519_v57, 16 }
  0xe0   : > { %v2822_v36 = vrot.slane %v6407_v27, 5  ;;  %v3630_v27 = vshll.u32 %v5518_v63, 16  ;;  %v3651_v46 = vshrl.u32 %v5521_v51, 16  ;;  %v6395_v44 = vld [vmem:[%s6584_s9 + $0x48] sm:$0xff]   ;;  %v5599_v60 = vld [vmem:[%s6584_s9 + $0x18] sm:$0xe] }
  0xe1   : > { %v7957_v63 = vld [vmem:[%s6584_s9 + $0x2c] sm:$0x1] }
  0xe2   : > { %v2824_v16 = vrot.slane %v2822_v36, 4  ;;  %v2823_v17 = vsel %vm6914_vm7, %v5405_v37, %v2822_v36  ;;  %v7941_v36 = vld [vmem:[%s6584_s9 + $0x28] sm:$0xf]  ;;  %v6394_v37 = vld [vmem:[%s6584_s9 + $0x3c] sm:$0xff]   ;;  %v3653_v18 = vrot.slane %v3651_v46, 4 }
  0xe3   : > { %6150 = vmatmul.mubr.msk.bf16.gmra.mxu0 %vm701_vm3, %v5371_v19  ;;  %v9314_v19 = vld [vmem:[#allocation14_spill] sm:$0xff] }
  0xe4   : > { %6189 = vmatprep.mubr.msk.bf16.mxu0 %vm701_vm3, %v6391_v49  ;;  %v2826_v20 = vsel %vm6914_vm7, %v2824_v16, %v2825_v21  ;;  %v4109_v22 = vsel %vm750_vm0, %v9314_v19, 0  ;;  %v3640_v49 = vshrl.u32 %v5519_v57, 16  ;;  %v3664_v16 = vshrl.u32 %v7941_v36, 16  ;;  %v5520_v21 = vld [vmem:[%s6584_s9 + $0x20] sm:$0x1] }
  0xe5   : > { %v5422_v58 = vcombine.low %v2823_v17, %v2826_v20  ;;  %v3629_v17 = vrot.slane %v3627_v45, 4  ;;  %v3632_v20 = vrot.slane %v3630_v27, 5  ;;  %v5524_v19 = vld [vmem:[%s6584_s9 + $0x30] sm:$0xf]  ;;  %v3646_v45 = vshll.u32 %v5520_v21, 16 }
  0xe6   : > { %6116 = vmatmul.mubr.msk.bf16.gmra.mxu1 %vm701_vm3, %v6390_v52  ;;  %v3654_v52 = vshll.u32 %v5521_v51, 16  ;;  %v3666_v51 = vrot.slane %v3664_v16, 4  ;;  %v5615_v27 = vrot.slane %v5599_v60, 9  ;;  %v4373_v46 = vrot.slane %v5520_v21, 5  ;;  %v5600_v16 = vld [vmem:[%s6584_s9 + $0x24] sm:$0xe] }
  0xe7   : > { %6155 = vmatprep.mubr.msk.bf16.mxu1 %vm701_vm3, %v5421_v34  ;;  %v3660_v34 = vshll.u32 %v7941_v36, 16  ;;  %v6396_v21 = vld [vmem:[%s6584_s9 + $0x54] sm:$0xff]   ;;  %v3678_v10 = vshll.u32 %v5524_v19, 16  ;;  %v6397_v60 = vld [vmem:[%s6584_s9 + $0x60] sm:$0xff]  }
  0xe8   : > { %v3656_v11 = vrot.slane %v3654_v52, 5  ;;  %v3670_v52 = vshll.u32 %v7957_v63, 16 }
  0xeb   : > { %6190 = vmatmul.mubr.msk.bf16.vlgmr.msra.gmra.mxu0 %vm701_vm3, %v6392_v26  ;;  %v7953_v26 = vrot.slane %v3636_v39, 5 }
  0xec   : > { %6256 = vmatpush3.bf16.msra.mxu0 %v4579_v53  ;;  %6193 = vmatprep.mubr.msk.bf16.mxu0 %vm701_vm3, %v6393_v38  ;;  %v3642_v38 = vrot.slane %v3640_v49, 4  ;;  %v4370_v53 = vrot.slane %v5519_v57, 5  ;;  %v7967_v57 = vld [vmem:[%s6584_s9 + $0x34] sm:$0xf] }
  0xee   : > { %6156 = vmatmul.mubr.msk.bf16.vlgmr.msra.gmra.mxu1 %vm701_vm3, %v5422_v58  ;;  %v7962_v58 = vrot.slane %v3660_v34, 5  ;;  %v3643_v39 = vor.u32 %v3642_v38, %v7953_v26  ;;  %v4372_v49 = vrot.slane %v4370_v53, 4  ;;  %v3657_v34 = vor.u32 %v3656_v11, %v3653_v18 }
  0xef   : > { %6222 = vmatpush3.bf16.msra.mxu1 %v4109_v22  ;;  %6159 = vmatprep.mubr.msk.bf16.mxu1 %vm701_vm3, %v5423_v5  ;;  %v7960_v5 = vpop.f32.mrf.mxu0  ;;  %v3633_v22 = vor.u32 %v3632_v20, %v3629_v17  ;;  %v3675_v17 = vshrl.u32 %v5524_v19, 16  ;;  %v3688_v38 = vshrl.u32 %v7967_v57, 16  ;;  %v7992_v61 = vsel %vm6914_vm7, %v5615_v27, %v4370_v53  ;;  %v5527_v19 = vld [vmem:[%s6584_s9 + $0x3c] sm:$0xf] }
  0xf0   : > { %v3667_v41 = vor.u32 %v3666_v51, %v7962_v58  ;;  %v3644_v8 = vrot.slane %v3643_v39, 4  ;;  %v3672_v11 = vrot.slane %v3670_v52, 5  ;;  %v5616_v51 = vrot.slane %v5600_v16, 9  ;;  %v8006_v39 = vld [vmem:[%s6584_s9 + $0x38] sm:$0x1] }
  0xf1   : > { %v7984_v20 = vpop.f32.mrf.mxu0  ;;  %v3634_v18 = vrot.slane %v3633_v22, 4  ;;  %v3658_v12 = vrot.slane %v3657_v34, 4  ;;  %v4380_v22 = vrot.slane %v7957_v63, 5  ;;  %v3690_v52 = vrot.slane %v3688_v38, 4 }
  0xf2   : > { %v3668_v27 = vrot.slane %v3667_v41, 4  ;;  %v3699_v34 = vshrl.u32 %v5527_v19, 16  ;;  %v3702_v16 = vshll.u32 %v5527_v19, 16  ;;  %v8019_v41 = vld [vmem:[%s6584_s9 + $0x40] sm:$0xf] }
  0xf3   : > { %6194 = vmatmul.mubr.msk.bf16.gmra.mxu0 %vm701_vm3, %v6394_v37  ;;  %v8003_v53 = vpop.f32.mrf.mxu0  ;;  %v3639_v63 = vsel %vm6628_vm4, %v3634_v18, %v7953_v26  ;;  %v3663_v26 = vsel %vm6628_vm4, %v3658_v12, %v7962_v58  ;;  %v5601_v18 = vld [vmem:[%s6584_s9 + $0x30] sm:$0xe]  ;;  %v3708_v24 = vshll.u32 %v8019_v41, 16  ;;  %v3712_v33 = vshrl.u32 %v8019_v41, 16 }
  0xf4   : > { %6197 = vmatprep.mubr.msk.bf16.mxu0 %vm701_vm3, %v6395_v44  ;;  %v7975_v37 = vpop.f32.mrf.mxu1  ;;  %v4377_v44 = vrot.slane %v7941_v36, 5  ;;  %v3648_v36 = vrot.slane %v3646_v45, 5  ;;  %v3677_v45 = vrot.slane %v3675_v17, 4  ;;  %v3673_v58 = vsel %vm6628_vm4, %v3668_v27, %v3672_v11 }
  0xf5   : > { %9315 = vst [vmem:[#allocation7_spill] sm:$0xff] %v7975_v37  ;;  %v8048_v12 = vpop.f32.mrf.mxu0  ;;  %v3704_v19 = vrot.slane %v3702_v16, 5  ;;  %v3736_v11 = vshrl.u32 %v8041_v7, 16 }
  0xf6   : > { %6160 = vmatmul.mubr.msk.bf16.gmra.mxu1 %vm701_vm3, %v5424_v48  ;;  %v3684_v48 = vshll.u32 %v7967_v57, 16  ;;  %v7999_v6 = vpop.f32.mrf.mxu1  ;;  %v4379_v4 = vrot.slane %v4377_v44, 4  ;;  %v3649_v17 = vsel %vm6628_vm4, %v3644_v8, %v3648_v36  ;;  %v4384_v36 = vrot.slane %v7967_v57, 5  ;;  %v6399_v8 = vld [vmem:[%s6584_s9 + $0x78] sm:$0xff]  }
  0xf7   : > { %6163 = vmatprep.mubr.msk.bf16.mxu1 %vm701_vm3, %v5425_v40  ;;  %v7996_v40 = vsel %vm6914_vm7, %v4372_v49, %v4373_v46  ;;  %9316 = vst [vmem:[#allocation6_spill] sm:$0xff] %v7999_v6  ;;  %v3680_v49 = vrot.slane %v3678_v10, 5  ;;  %v8062_v27 = vcombine.low %v3639_v63, %v3649_v17  ;;  %v8064_v57 = vcombine.low %v3663_v26, %v3673_v58  ;;  %v8078_v17 = vld [vmem:[%s6584_s9 + $0x58] sm:$0xf]  ;;  %v8084_v58 = vld [vmem:[%s6584_s9 + $0x44] sm:$0x1] }
  0xf8   : > { %v8008_v46 = vrot.slane %v3684_v48, 5  ;;  %v8025_v10 = vpop.f32.mrf.mxu1  ;;  %v8032_v48 = vsel %vm6914_vm7, %v5616_v51, %v4377_v44  ;;  %v8036_v38 = vsel %vm6914_vm7, %v4379_v4, %v4380_v22  ;;  %v3701_v51 = vrot.slane %v3699_v34, 4  ;;  %v5533_v34 = vld [vmem:[%s6584_s9 + $0x54] sm:$0xf] }
  0xf9   : > { %9317 = vst [vmem:[#allocation9_spill] sm:$0xff] %v8025_v10  ;;  %v3681_v44 = vor.u32 %v3680_v49, %v3677_v45  ;;  %v3726_v22 = vshll.u32 %v5530_v3, 16  ;;  %v4386_v13 = vrot.slane %v4384_v36, 4  ;;  %v4387_v63 = vrot.slane %v8006_v39, 5  ;;  %v5602_v49 = vld [vmem:[%s6584_s9 + $0x3c] sm:$0xe] }
  0xfa   : > { %v3691_v4 = vor.u32 %v3690_v52, %v8008_v46  ;;  %v8060_v45 = vpop.f32.mrf.mxu1  ;;  %v5617_v52 = vrot.slane %v5601_v18, 9  ;;  %v3705_v18 = vor.u32 %v3704_v19, %v3701_v51  ;;  %v9320_v6 = vcombine.low %v7773_v28, %v7789_v1 }
  0xfb   : > { %6198 = vmatmul.mubr.msk.bf16.gmra.mxu0 %vm701_vm3, %v6396_v21  ;;  %v3732_v21 = vshll.u32 %v8041_v7, 16  ;;  %9318 = vst [vmem:[#allocation8_spill] sm:$0xff] %v8060_v45  ;;  %v3728_v45 = vrot.slane %v3726_v22, 5  ;;  %v3747_v51 = vshrl.u32 %v5533_v34, 16  ;;  %v3750_v19 = vshll.u32 %v5533_v34, 16 }
  0xfc   : > { %6201 = vmatprep.mubr.msk.bf16.mxu0 %vm701_vm3, %v6397_v60  ;;  %v3694_v60 = vshll.u32 %v8006_v39, 16  ;;  %v8081_v26 = vrot.slane %v3691_v4, 4  ;;  %v3738_v39 = vrot.slane %v3736_v11, 4  ;;  %v8119_v22 = vsel %vm6914_vm7, %v4386_v13, %v4387_v63 }
  0xfd   : > { %v8089_v10 = vrot.slane %v3732_v21, 5  ;;  %v9322_v21 = vcombine.low %v7782_v25, %v7801_v14  ;;  %v4391_v25 = vrot.slane %v8019_v41, 5  ;;  %v6401_v14 = vld [vmem:[%s6584_s9 + $0x90] sm:$0xff]   ;;  %v5618_v1 = vrot.slane %v5602_v49, 9  ;;  %v5536_v41 = vld [vmem:[%s6584_s9 + $0x60] sm:$0xf] }
  0xfe   : > { %6164 = vmatmul.mubr.msk.bf16.gmra.mxu1 %vm701_vm3, %v5426_v35  ;;  %v6398_v35 = vld [vmem:[%s6584_s9 + $0x6c] sm:$0xff]   ;;  %v8074_v62 = vrot.slane %v3694_v60, 5  ;;  %v3749_v37 = vrot.slane %v3747_v51, 4 }
  0xff   : > { %6167 = vmatprep.mubr.msk.bf16.mxu1 %vm701_vm3, %v5427_v23  ;;  %v3723_v23 = vshrl.u32 %v5530_v3, 16  ;;  %v8072_v3 = vrot.slane %v3681_v44, 4  ;;  %v3714_v44 = vrot.slane %v3712_v33, 4  ;;  %v3760_v33 = vshrl.u32 %v8078_v17, 16 }
 0x100   : > { %v8070_v16 = vpop.f32.mrf.mxu0  ;;  %v3739_v13 = vor.u32 %v3738_v39, %v8089_v10  ;;  %v4398_v39 = vrot.slane %v8041_v7, 5  ;;  %v9326_v7 = vcombine.low %v7793_v43, %v7810_v2  ;;  %v9328_v43 = vcombine.low %v7814_v59, %v7824_v50  ;;  %v6402_v2 = vld [vmem:[%s6584_s9 + $0x9c] sm:$0xff]  }
 0x101   : > { %9319 = vst [vmem:[#allocation11_spill] sm:$0xff] %v8070_v16  ;;  %v3725_v60 = vrot.slane %v3723_v23, 4  ;;  %v6400_v23 = vld [vmem:[%s6584_s9 + $0x84] sm:$0xff]   ;;  %v8146_v16 = vld [vmem:[%s6584_s9 + $0x5c] sm:$0x1]  ;;  %v4405_v59 = vrot.slane %v8078_v17, 5 }
 0x102   : > { %v8107_v28 = vpop.f32.mrf.mxu0 }
 0x103   : > { %6202 = vmatmul.mubr.msk.bf16.gmra.mxu0 %vm701_vm3, %v6398_v35  ;;  %v8086_v35 = vrot.slane %v3708_v24, 5  ;;  %v3756_v24 = vshll.u32 %v8078_v17, 16  ;;  %9323 = vst [vmem:[#allocation15_spill] sm:$0xff] %v8107_v28  ;;  %v3752_v28 = vrot.slane %v3750_v19, 5 }
 0x104   : > { %6205 = vmatprep.mubr.msk.bf16.mxu0 %vm701_vm3, %v6399_v8  ;;  %v8095_v4 = vpop.f32.mrf.mxu1  ;;  %v8098_v8 = vld [vmem:[%s6584_s9 + $0x50] sm:$0x1]  ;;  %v8139_v49 = vpop.f32.mrf.mxu0 }
 0x105   : > { %9321 = vst [vmem:[#allocation10_spill] sm:$0xff] %v8095_v4  ;;  %v3715_v34 = vor.u32 %v3714_v44, %v8086_v35  ;;  %v8129_v4 = vrot.slane %v3705_v18, 4  ;;  %v8136_v11 = vrot.slane %v3756_v24, 5  ;;  %v3762_v44 = vrot.slane %v3760_v33, 4  ;;  %9325 = vst [vmem:[#allocation5_spill] sm:$0xff] %v8139_v49 }
 0x106   : > { %6168 = vmatmul.mubr.msk.bf16.gmra.mxu1 %vm701_vm3, %v9320_v6  ;;  %v8115_v6 = vsel %vm6914_vm7, %v5617_v52, %v4384_v36  ;;  %v3729_v36 = vor.u32 %v3728_v45, %v3725_v60  ;;  %v3742_v52 = vshll.u32 %v8098_v8, 16  ;;  %v8134_v63 = vpop.f32.mrf.mxu1  ;;  %v4393_v18 = vrot.slane %v4391_v25, 4  ;;  %v5603_v24 = vld [vmem:[%s6584_s9 + $0x48] sm:$0xe] }
 0x107   : > { %6171 = vmatprep.mubr.msk.bf16.mxu1 %vm701_vm3, %v9322_v21  ;;  %v3718_v21 = vshll.u32 %v8084_v58, 16  ;;  %9324 = vst [vmem:[#allocation13_spill] sm:$0xff] %v8134_v63  ;;  %v4394_v60 = vrot.slane %v8084_v58, 5  ;;  %v3716_v51 = vrot.slane %v3715_v34, 4  ;;  %v3771_v33 = vshrl.u32 %v5536_v41, 16 }
 0x108   : > { %v8152_v63 = vsel %vm6914_vm7, %v5618_v1, %v4391_v25  ;;  %v3730_v45 = vrot.slane %v3729_v36, 4  ;;  %v3740_v49 = vrot.slane %v3739_v13, 4  ;;  %v3744_v58 = vrot.slane %v3742_v52, 5  ;;  %v8167_v36 = vld [vmem:[%s6584_s9 + $0x64] sm:$0xf]  ;;  %v8174_v13 = vpop.f32.mrf.mxu0 }
 0x109   : > { %v3720_v19 = vrot.slane %v3718_v21, 5  ;;  %v3711_v34 = vsel %vm6628_vm4, %v8129_v4, %v8086_v35  ;;  %v3753_v21 = vor.u32 %v3752_v28, %v3749_v37  ;;  %v3763_v1 = vor.u32 %v3762_v44, %v8136_v11  ;;  %9329 = vst [vmem:[#allocation17_spill] sm:$0xff] %v8174_v13  ;;  %v5604_v28 = vld [vmem:[%s6584_s9 + $0x54] sm:$0xe]  ;;  %v6406_v13 = vld [vmem:[%s6584_s9 + $0xcc] sm:$0xff]  }
 0x10a   : > { %v3766_v25 = vshll.u32 %v8146_v16, 16  ;;  %v8178_v52 = vsel %vm6914_vm7, %v4393_v18, %v4394_v60  ;;  %v5619_v35 = vrot.slane %v5603_v24, 9  ;;  %v4400_v37 = vrot.slane %v4398_v39, 4 }
 0x10b   : > { %6206 = vmatmul.mubr.msk.bf16.gmra.mxu0 %vm701_vm3, %v6400_v23  ;;  %v3774_v23 = vshll.u32 %v5536_v41, 16  ;;  %v4401_v4 = vrot.slane %v8098_v8, 5  ;;  %v6403_v41 = vld [vmem:[%s6584_s9 + $0xa8] sm:$0xff]   ;;  %v3721_v44 = vsel %vm6628_vm4, %v3716_v51, %v3720_v19  ;;  %v3773_v50 = vrot.slane %v3771_v33, 4 }
 0x10c   : > { %6209 = vmatprep.mubr.msk.bf16.mxu0 %vm701_vm3, %v6401_v14  ;;  %v8158_v14 = vpop.f32.mrf.mxu1  ;;  %v3745_v18 = vsel %vm6628_vm4, %v3740_v49, %v3744_v58  ;;  %v3780_v60 = vshll.u32 %v8167_v36, 16  ;;  %v3784_v8 = vshrl.u32 %v8167_v36, 16  ;;  %v3764_v51 = vrot.slane %v3763_v1, 4  ;;  %v8196_v33 = vld [vmem:[%s6584_s9 + $0x68] sm:$0x1] }
 0x10d   : > { %9327 = vst [vmem:[#allocation16_spill] sm:$0xff] %v8158_v14  ;;  %v3754_v14 = vrot.slane %v3753_v21, 4  ;;  %v3768_v17 = vrot.slane %v3766_v25, 5  ;;  %v5620_v19 = vrot.slane %v5604_v28, 9  ;;  %v9332_v49 = vsel %vm6628_vm4, %v8081_v26, %v8074_v62  ;;  %v5539_v25 = vld [vmem:[%s6584_s9 + $0x6c] sm:$0xf] }
 0x10e   : > { %6172 = vmatmul.mubr.msk.bf16.gmra.mxu1 %vm701_vm3, %v9326_v7  ;;  %v3776_v7 = vrot.slane %v3774_v23, 5  ;;  %v8193_v24 = vpop.f32.mrf.mxu1  ;;  %v8217_v21 = vsel %vm6914_vm7, %v5619_v35, %v4398_v39  ;;  %v8221_v1 = vsel %vm6914_vm7, %v4400_v37, %v4401_v4  ;;  %v8224_v62 = vcombine.low %v3711_v34, %v3721_v44  ;;  %v5605_v4 = vld [vmem:[%s6584_s9 + $0x60] sm:$0xe]  ;;  %v5545_v44 = vld [vmem:[%s6584_s9 + $0x84] sm:$0xf] }
 0x10f   : > { %6175 = vmatprep.mubr.msk.bf16.mxu1 %vm701_vm3, %v9328_v43  ;;  %v3735_v43 = vsel %vm6628_vm4, %v3730_v45, %v8089_v10  ;;  %9330 = vst [vmem:[#allocation18_spill] sm:$0xff] %v8193_v24  ;;  %v9333_v45 = vsel %vm6628_vm4, %v8072_v3, %v8008_v46  ;;  %v4407_v46 = vrot.slane %v4405_v59, 4  ;;  %v4408_v3 = vrot.slane %v8146_v16, 5 }
 0x110   : > { %v8211_v23 = vcombine.low %v9333_v45, %v9332_v49  ;;  %9334 = vst [vmem:[#allocation14_spill] sm:$0xff] %v8224_v62  ;;  %v3777_v26 = vor.u32 %v3776_v7, %v3773_v50  ;;  %v8231_v28 = vcombine.low %v3735_v43, %v3745_v18  ;;  %v8233_v39 = vrot.slane %v3780_v60, 5 }
 0x111   : > { %v8199_v10 = vpop.f32.mrf.mxu0  ;;  %v8235_v35 = vrot.slane %v3784_v8, 4  ;;  %v3790_v37 = vshll.u32 %v8196_v33, 16  ;;  %v9336_v34 = vcombine.low %v7832_v54, %v7847_v56  ;;  %v3759_v50 = vsel %vm6628_vm4, %v3754_v14, %v8136_v11  ;;  %v5542_v54 = vld [vmem:[%s6584_s9 + $0x78] sm:$0xf] }
 0x112   : > { %9331 = vst [vmem:[#allocation12_spill] sm:$0xff] %v8199_v10  ;;  %9335 = vst [vmem:[#allocation19_spill] sm:$0xff] %v8231_v28  ;;  %v3769_v7 = vsel %vm6628_vm4, %v3764_v51, %v3768_v17  ;;  %v8255_v43 = vsel %vm6914_vm7, %v5620_v19, %v4405_v59  ;;  %v9338_v56 = vcombine.low %v7839_v29, %v7860_v42  ;;  %v3795_v60 = vshrl.u32 %v5539_v25, 16  ;;  %v8267_v51 = vld [vmem:[%s6584_s9 + $0x7c] sm:$0xf]  ;;  %v6405_v59 = vld [vmem:[%s6584_s9 + $0xc0] sm:$0xff]  }
 0x113   : > { %6210 = vmatmul.mubr.msk.bf16.gmra.mxu0 %vm701_vm3, %v6402_v2  ;;  %v8229_v2 = vld [vmem:[%s6584_s9 + $0x70] sm:$0xf]  ;;  %v8262_v18 = vpop.f32.mrf.mxu0  ;;  %v3798_v8 = vshll.u32 %v5539_v25, 16  ;;  %v8272_v17 = vsel %vm6914_vm7, %v4407_v46, %v4408_v3  ;;  %v8274_v29 = vrot.slane %v3777_v26, 4  ;;  %v5621_v42 = vrot.slane %v5605_v4, 9 }
 0x114   : > { %6213 = vmatprep.mubr.msk.bf16.mxu0 %vm701_vm3, %v6403_v41  ;;  %v6404_v41 = vld [vmem:[%s6584_s9 + $0xb4] sm:$0xff]   ;;  %9339 = vst [vmem:[#allocation21_spill] sm:$0xff] %v8262_v18  ;;  %v3804_v11 = vshll.u32 %v8229_v2, 16  ;;  %v3808_v14 = vshrl.u32 %v8229_v2, 16  ;;  %v4412_v19 = vrot.slane %v8167_v36, 5  ;;  %v8277_v49 = vcombine.low %v3759_v50, %v3769_v7 }
 0x115   : > { %v3787_v45 = vor.u32 %v8235_v35, %v8233_v39  ;;  %v8281_v25 = vrot.slane %v3790_v37, 5  ;;  %v3819_v46 = vshrl.u32 %v5542_v54, 16  ;;  %v3822_v3 = vshll.u32 %v5542_v54, 16  ;;  %v8293_v4 = vld [vmem:[%s6584_s9 + $0x88] sm:$0xf]  ;;  %v8296_v35 = vpop.f32.mrf.mxu0 }
 0x116   : > { %6176 = vmatmul.mubr.msk.bf16.gmra.mxu1 %vm701_vm3, %v9336_v34  ;;  %v8243_v16 = vpop.f32.mrf.mxu1  ;;  %9340 = vst [vmem:[#allocation22_spill] sm:$0xff] %v8277_v49  ;;  %v4415_v34 = vrot.slane %v8196_v33, 5  ;;  %v3828_v36 = vshll.u32 %v8267_v51, 16  ;;  %v3832_v26 = vshrl.u32 %v8267_v51, 16  ;;  %9342 = vst [vmem:[#allocation24_spill] sm:$0xff] %v8296_v35  ;;  %v3797_v33 = vrot.slane %v3795_v60, 4 }
 0x117   : > { %9337 = vst [vmem:[#allocation20_spill] sm:$0xff] %v8243_v16  ;;  %6179 = vmatprep.mubr.msk.bf16.mxu1 %vm701_vm3, %v9338_v56  ;;  %v8285_v56 = vld [vmem:[%s6584_s9 + $0x74] sm:$0x1]  ;;  %v3800_v37 = vrot.slane %v3798_v8, 5  ;;  %v8298_v50 = vrot.slane %v3804_v11, 5  ;;  %v3810_v7 = vrot.slane %v3808_v14, 4  ;;  %v9343_v54 = vcombine.low %v7851_v30, %v7867_v55  ;;  %v8326_v49 = vpop.f32.mrf.mxu0 }
 0x118   : > { %v8288_v58 = vpop.f32.mrf.mxu1  ;;  %v4414_v16 = vrot.slane %v4412_v19, 4  ;;  %v8311_v60 = vld [vmem:[%s6584_s9 + $0x80] sm:$0x1]  ;;  %v8314_v8 = vld [vmem:[%s6584_s9 + $0x6c] sm:$0xe]  ;;  %v3843_v11 = vshrl.u32 %v5545_v44, 16 }
 0x119   : > { %9341 = vst [vmem:[#allocation23_spill] sm:$0xff] %v8288_v58  ;;  %v8307_v58 = vsel %vm6914_vm7, %v5621_v42, %v4412_v19  ;;  %v3846_v14 = vshll.u32 %v5545_v44, 16  ;;  %v3856_v24 = vshrl.u32 %v8293_v4, 16  ;;  %v3821_v19 = vrot.slane %v3819_v46, 4  ;;  %9345 = vst [vmem:[#allocation26_spill] sm:$0xff] %v8326_v49 }
 0x11a   : > { %v8322_v42 = vpop.f32.mrf.mxu1  ;;  %v3824_v35 = vrot.slane %v3822_v3, 5  ;;  %v8324_v18 = vrot.slane %v3828_v36, 5  ;;  %v3834_v10 = vrot.slane %v3832_v26, 4  ;;  %v9346_v44 = vcombine.low %v7871_v15, %v7899_v32  ;;  %v8345_v32 = vld [vmem:[%s6584_s9 + $0x8c] sm:$0x1] }
 0x11b   : > { %6214 = vmatmul.mubr.msk.bf16.gmra.mxu0 %vm701_vm3, %v6404_v41  ;;  %v3814_v41 = vshll.u32 %v8285_v56, 16  ;;  %9344 = vst [vmem:[#allocation25_spill] sm:$0xff] %v8322_v42  ;;  %v3801_v30 = vor.u32 %v3800_v37, %v3797_v33  ;;  %v3811_v55 = vor.u32 %v3810_v7, %v8298_v50  ;;  %v3838_v46 = vshll.u32 %v8311_v60, 16  ;;  %v5607_v33 = vld [vmem:[%s6584_s9 + $0x78] sm:$0xe] }
 0x11c   : > { %6217 = vmatprep.mubr.msk.bf16.mxu0 %vm701_vm3, %v6405_v59  ;;  %v3852_v59 = vshll.u32 %v8293_v4, 16  ;;  %v8336_v3 = vrot.slane %v3787_v45, 4  ;;  %v8340_v36 = vsel %vm6914_vm7, %v4414_v16, %v4415_v34  ;;  %v5622_v26 = vrot.slane %v8314_v8, 9  ;;  %v8350_v42 = vpop.f32.mrf.mxu1  ;;  %v5548_v8 = vld [vmem:[%s6584_s9 + $0x90] sm:$0xf] }
 0x11d   : > { %v4426_v15 = vrot.slane %v8267_v51, 5  ;;  %v3845_v37 = vrot.slane %v3843_v11, 4  ;;  %v3848_v7 = vrot.slane %v3846_v14, 5  ;;  %9347 = vst [vmem:[#allocation27_spill] sm:$0xff] %v8350_v42  ;;  %v3816_v45 = vrot.slane %v3814_v41, 5 }
 0x11e   : > { %6180 = vmatmul.mubr.msk.bf16.gmra.mxu1 %vm701_vm3, %v9343_v54  ;;  %v4419_v54 = vrot.slane %v8229_v2, 5  ;;  %v8348_v2 = vrot.slane %v3852_v59, 5  ;;  %v4422_v49 = vrot.slane %v8285_v56, 5  ;;  %v3825_v16 = vor.u32 %v3824_v35, %v3821_v19  ;;  %v8359_v59 = vld [vmem:[%s6584_s9 + $0x94] sm:$0xf] }
 0x11f   : > { %6183 = vmatprep.mubr.msk.bf16.mxu1 %vm701_vm3, %v9346_v44  ;;  %v3858_v44 = vrot.slane %v3856_v24, 4  ;;  %v3835_v34 = vor.u32 %v3834_v10, %v8324_v18  ;;  %v3802_v51 = vrot.slane %v3801_v30, 4  ;;  %v3812_v11 = vrot.slane %v3811_v55, 4 }
 0x120   : > { %v4421_v62 = vrot.slane %v4419_v54, 4  ;;  %v3840_v14 = vrot.slane %v3838_v46, 5  ;;  %v9348_v24 = vcombine.low %v7992_v61, %v7996_v40  ;;  %v5623_v56 = vrot.slane %v5607_v33, 9 }
 0x121   : > { %v4428_v35 = vrot.slane %v4426_v15, 4  ;;  %v4429_v10 = vrot.slane %v8311_v60, 5  ;;  %v3862_v41 = vshll.u32 %v8345_v32, 16  ;;  %v3859_v30 = vor.u32 %v3858_v44, %v8348_v2 }
 0x122   : > { %v3867_v55 = vshrl.u32 %v5548_v8, 16  ;;  %v3870_v46 = vshll.u32 %v5548_v8, 16  ;;  %v9350_v61 = vcombine.low %v7911_v9, %v7916_v47  ;;  %v3826_v40 = vrot.slane %v3825_v16, 4 }
 0x123   : > { %v8355_v28 = vpop.f32.mrf.mxu0  ;;  %6218 = vmatmul.mubr.msk.bf16.gmra.mxu0 %vm701_vm3, %v6406_v13  ;;  %v3849_v13 = vor.u32 %v3848_v7, %v3845_v37  ;;  %v3836_v33 = vrot.slane %v3835_v34, 4  ;;  %v3876_v60 = vshll.u32 %v8359_v59, 16  ;;  %v3793_v37 = vsel %vm6628_vm4, %v8336_v3, %v8281_v25 }
 0x124   : > { %6257 = vmatprep.mubr.msk.bf16.mxu0 %vm701_vm3, %v9348_v24  ;;  %v3880_v24 = vshrl.u32 %v8359_v59, 16  ;;  %v3807_v9 = vsel %vm6628_vm4, %v3802_v51, %v8298_v50  ;;  %v8391_v47 = vsel %vm6914_vm7, %v5622_v26, %v4419_v54  ;;  %v8395_v7 = vsel %vm6914_vm7, %v4421_v62, %v4422_v49  ;;  %v5608_v54 = vld [vmem:[%s6584_s9 + $0x84] sm:$0xe]  ;;  %v9389_v31 = vld [vmem:[#allocation27_spill] sm:$0xff] }
 0x125   : > { %v8367_v19 = vpop.f32.mrf.mxu0  ;;  %v8403_v25 = vsel %vm6914_vm7, %v5623_v56, %v4426_v15  ;;  %v8407_v50 = vsel %vm6914_vm7, %v4428_v35, %v4429_v10  ;;  %v3864_v3 = vrot.slane %v3862_v41, 5  ;;  %v3850_v62 = vrot.slane %v3849_v13, 4  ;;  %v8431_v13 = vld [vmem:[%s6584_s9 + $0x98] sm:$0x1] }
 0x126   : > { %9349 = vst [vmem:[#allocation28_spill] sm:$0xff] %v8367_v19  ;;  %v8370_v42 = vpop.f32.mrf.mxu1  ;;  %6184 = vmatmul.mubr.msk.bf16.gmra.mxu1 %vm701_vm3, %v9350_v61  ;;  %v3860_v49 = vrot.slane %v3859_v30, 4  ;;  %v3869_v16 = vrot.slane %v3867_v55, 4  ;;  %v3872_v34 = vrot.slane %v3870_v46, 5  ;;  %v3831_v15 = vsel %vm6628_vm4, %v3826_v40, %v8324_v18  ;;  %v5551_v30 = vld [vmem:[%s6584_s9 + $0x9c] sm:$0xf] }
 0x127   : > { %v8378_v19 = vpop.f32.mrf.mxu0  ;;  %6223 = vmatprep.mubr.msk.bf16.mxu1 %vm701_vm3, %v8062_v27  ;;  %v3817_v27 = vsel %vm6628_vm4, %v3812_v11, %v3816_v45  ;;  %v3841_v45 = vsel %vm6628_vm4, %v3836_v33, %v3840_v14  ;;  %v8419_v51 = vrot.slane %v3876_v60, 5  ;;  %v3882_v11 = vrot.slane %v3880_v24, 4  ;;  %v8462_v24 = vld [vmem:[%s6584_s9 + $0xa0] sm:$0xf] }
 0x128   : > { %v8397_v44 = vpop.f32.mrf.mxu1  ;;  %v9351_v35 = vcombine.low %v8032_v48, %v8036_v38  ;;  %v5637_v10 = vcombine.low %v8255_v43, %v8272_v17  ;;  %v5638_v41 = vcombine.low %v8307_v58, %v8340_v36  ;;  %v5624_v18 = vrot.slane %v5608_v54, 9 }
 0x129   : > { %v8410_v26 = vpop.f32.mrf.mxu0  ;;  %v4433_v14 = vrot.slane %v8293_v4, 5  ;;  %v9352_v48 = vcombine.low %v8115_v6, %v8119_v22  ;;  %v9353_v38 = vsel %vm6628_vm4, %v8274_v29, %v8233_v39  ;;  %v8447_v61 = vcombine.low %v3807_v9, %v3817_v27  ;;  %v5609_v29 = vld [vmem:[%s6584_s9 + $0x90] sm:$0xe]  ;;  %v9360_v4 = vld [vmem:[#allocation5_spill] sm:$0xff] }
 0x12a   : > { %v8412_v8 = vpop.f32.mrf.mxu1  ;;  %v8445_v46 = vcombine.low %v9353_v38, %v3793_v37  ;;  %v8453_v60 = vcombine.low %v3831_v15, %v3841_v45  ;;  %v3855_v6 = vsel %vm6628_vm4, %v3850_v62, %v8348_v2  ;;  %v3865_v22 = vsel %vm6628_vm4, %v3860_v49, %v3864_v3 }
 0x12b   : > { %v6055_v56 = vpop.f32.mrf.mxu0  ;;  %6258 = vmatmul.mubr.msk.bf16.vlgmr.msra.gmra.mxu0 %vm701_vm3, %v9351_v35  ;;  %v3873_v39 = vor.u32 %v3872_v34, %v3869_v16  ;;  %v3883_v9 = vor.u32 %v3882_v11, %v8419_v51  ;;  %v3886_v27 = vshll.u32 %v8431_v13, 16  ;;  %v3891_v54 = vshrl.u32 %v5551_v30, 16 }
 0x12c   : > { %v8434_v55 = vpop.f32.mrf.mxu1  ;;  %6261 = vmatprep.mubr.msk.bf16.mxu0 %vm701_vm3, %v9352_v48  ;;  %v3894_v15 = vshll.u32 %v5551_v30, 16  ;;  %v8473_v3 = vsel %vm6914_vm7, %v5624_v18, %v4433_v14  ;;  %v4435_v62 = vrot.slane %v4433_v14, 4  ;;  %v4436_v49 = vrot.slane %v8345_v32, 5 }
 0x12d   : > { %v1505_v33 = vpop.f32.mrf.mxu0  ;;  %v5625_v16 = vrot.slane %v5609_v29, 9  ;;  %v4440_v34 = vrot.slane %v8359_v59, 5  ;;  %v3900_v11 = vshll.u32 %v8462_v24, 16  ;;  %v3904_v35 = vshrl.u32 %v8462_v24, 16 }
 0x12e   : > { %v6021_v37 = vpop.f32.mrf.mxu1  ;;  %6224 = vmatmul.mubr.msk.bf16.vlgmr.msra.gmra.mxu1 %vm701_vm3, %v8064_v57  ;;  %v8482_v48 = vcombine.low %v3855_v6, %v3865_v22  ;;  %v8484_v18 = vrot.slane %v3873_v39, 4  ;;  %v3884_v32 = vrot.slane %v3883_v9, 4  ;;  %v3888_v38 = vrot.slane %v3886_v27, 5  ;;  %v5554_v22 = vld [vmem:[%s6584_s9 + $0xa8] sm:$0xf] }
 0x12f   : > { %v1089_v45 = vadd.f32 %v6021_v37, %v7960_v5  ;;  %v6056_v2 = vpop.f32.mrf.mxu0  ;;  %6227 = vmatprep.mubr.msk.bf16.mxu1 %vm701_vm3, %v8211_v23  ;;  %v3893_v29 = vrot.slane %v3891_v54, 4  ;;  %v3896_v59 = vrot.slane %v3894_v15, 5  ;;  %v4443_v6 = vrot.slane %v8431_v13, 5  ;;  %v8510_v27 = vld [vmem:[%s6584_s9 + $0xac] sm:$0xf] }
 0x130   : > { %v1080_v57 = vpop.f32.mrf.mxu1  ;;  %v3906_v9 = vrot.slane %v3904_v35, 4  ;;  %v9357_v35 = vld [vmem:[#allocation11_spill] sm:$0xff] }
 0x131   : > { %v8479_v5 = vadd.f32 %v6055_v56, %v1089_v45  ;;  %v1081_v23 = vadd.f32 %v1080_v57, %v7984_v20  ;;  %v1508_v30 = vpop.f32.mrf.mxu0  ;;  %v9354_v45 = vcombine.low %v8152_v63, %v8178_v52  ;;  %v8495_v20 = vsel %vm6914_vm7, %v4435_v62, %v4436_v49  ;;  %v5610_v62 = vld [vmem:[%s6584_s9 + $0x9c] sm:$0xe] }
 0x132   : > { %v6022_v14 = vpop.f32.mrf.mxu1  ;;  %v4442_v63 = vrot.slane %v4440_v34, 4  ;;  %v8507_v52 = vrot.slane %v3900_v11, 5  ;;  %v4447_v49 = vrot.slane %v8462_v24, 5  ;;  %v3924_v24 = vshll.u32 %v8510_v27, 16 }
 0x133   : > { %v8486_v37 = vadd.f32 %v1505_v33, %v1081_v23  ;;  %v1092_v40 = vadd.f32 %v6022_v14, %v8003_v53  ;;  %v6059_v56 = vpop.f32.mrf.mxu0  ;;  %6262 = vmatmul.mubr.msk.bf16.gmra.mxu0 %vm701_vm3, %v9354_v45  ;;  %v9355_v33 = vcombine.low %v8217_v21, %v8221_v1  ;;  %v8505_v53 = vsel %vm6914_vm7, %v5625_v16, %v4440_v34  ;;  %v5553_v1 = vld [vmem:[%s6584_s9 + $0xa4] sm:$0x1]  ;;  %v9356_v16 = vld [vmem:[#allocation14_spill] sm:$0xff] }
 0x134   : > { %v1083_v39 = vpop.f32.mrf.mxu1  ;;  %v3879_v21 = vsel %vm6628_vm4, %v8484_v18, %v8419_v51  ;;  %v3915_v34 = vshrl.u32 %v5554_v22, 16  ;;  %v9358_v51 = vld [vmem:[#allocation19_spill] sm:$0xff]  ;;  %v3928_v18 = vshrl.u32 %v8510_v27, 16 }
 0x135   : > { %6265 = vmatprep.mubr.msk.bf16.mxu0 %vm701_vm3, %v9355_v33  ;;  %v8512_v54 = vadd.f32 %v6056_v2, %v1092_v40  ;;  %v1084_v13 = vadd.f32 %v1083_v39, %v8048_v12  ;;  %v1521_v15 = vpop.f32.mrf.mxu0  ;;  %v3889_v40 = vsel %vm6628_vm4, %v3884_v32, %v3888_v38  ;;  %v3897_v2 = vor.u32 %v3896_v59, %v3893_v29  ;;  %v9359_v59 = vld [vmem:[#allocation15_spill] sm:$0xff] }
 0x136   : > { %v6025_v57 = vpop.f32.mrf.mxu1  ;;  %6228 = vmatmul.mubr.msk.bf16.gmra.mxu1 %vm701_vm3, %v9356_v16  ;;  %v3918_v12 = vshll.u32 %v5554_v22, 16  ;;  %v8535_v39 = vsel %vm6914_vm7, %v4442_v63, %v4443_v6  ;;  %v3907_v32 = vor.u32 %v3906_v9, %v8507_v52  ;;  %v3910_v38 = vshll.u32 %v5553_v1, 16 }
 0x137   : > { %v8526_v11 = vadd.f32 %v1508_v30, %v1084_v13  ;;  %v1105_v23 = vadd.f32 %v6025_v57, %v9357_v35  ;;  %v6060_v14 = vpop.f32.mrf.mxu0  ;;  %6231 = vmatprep.mubr.msk.bf16.mxu1 %vm701_vm3, %v9358_v51  ;;  %v5626_v30 = vrot.slane %v5610_v62, 9  ;;  %v4449_v13 = vrot.slane %v4447_v49, 4 }
 0x138   : > { %v1096_v45 = vpop.f32.mrf.mxu1  ;;  %v4450_v57 = vrot.slane %v5553_v1, 5  ;;  %v8543_v51 = vrot.slane %v3897_v2, 4  ;;  %v3917_v6 = vrot.slane %v3915_v34, 4  ;;  %v3920_v63 = vrot.slane %v3918_v12, 5  ;;  %v8553_v1 = vld [vmem:[%s6584_s9 + $0xb0] sm:$0x1] }
 0x139   : > { %v8538_v29 = vadd.f32 %v6059_v56, %v1105_v23  ;;  %v1097_v22 = vadd.f32 %v1096_v45, %v9359_v59  ;;  %v1524_v33 = vpop.f32.mrf.mxu0  ;;  %v8555_v23 = vrot.slane %v3924_v24, 5  ;;  %v3930_v2 = vrot.slane %v3928_v18, 4  ;;  %v9361_v12 = vld [vmem:[#allocation17_spill] sm:$0xff] }
 0x13a   : > { %v6026_v16 = vpop.f32.mrf.mxu1  ;;  %v8565_v43 = vrot.slane %v3907_v32, 4  ;;  %v8567_v17 = vrot.slane %v3910_v38, 5  ;;  %v8575_v58 = vsel %vm6914_vm7, %v5626_v30, %v4447_v49  ;;  %v8579_v36 = vsel %vm6914_vm7, %v4449_v13, %v4450_v57  ;;  %v8591_v30 = vld [vmem:[%s6584_s9 + $0xb8] sm:$0xf] }
 0x13b   : > { %v8545_v9 = vadd.f32 %v1521_v15, %v1097_v22  ;;  %v1108_v62 = vadd.f32 %v6026_v16, %v9360_v4  ;;  %v6063_v56 = vpop.f32.mrf.mxu0  ;;  %6266 = vmatmul.mubr.msk.bf16.gmra.mxu0 %vm701_vm3, %v5637_v10  ;;  %v8561_v15 = vcombine.low %v3879_v21, %v3889_v40  ;;  %v5611_v10 = vld [vmem:[%s6584_s9 + $0xa8] sm:$0xe]  ;;  %v3921_v32 = vor.u32 %v3920_v63, %v3917_v6  ;;  %v9363_v22 = vld [vmem:[#allocation12_spill] sm:$0xff] }
 0x13c   : > { %v1099_v45 = vpop.f32.mrf.mxu1  ;;  %6269 = vmatprep.mubr.msk.bf16.mxu0 %vm701_vm3, %v5638_v41  ;;  %v5557_v41 = vld [vmem:[%s6584_s9 + $0xb4] sm:$0xf]  ;;  %v9362_v40 = vld [vmem:[#allocation22_spill] sm:$0xff]  ;;  %v3934_v38 = vshll.u32 %v8553_v1, 16  ;;  %v4454_v49 = vrot.slane %v8510_v27, 5  ;;  %v3931_v16 = vor.u32 %v3930_v2, %v8555_v23  ;;  %v3913_v27 = vsel %vm6628_vm4, %v8565_v43, %v8567_v17 }
 0x13d   : > { %v8570_v34 = vadd.f32 %v6060_v14, %v1108_v62  ;;  %v1100_v24 = vadd.f32 %v1099_v45, %v9361_v12  ;;  %v1537_v18 = vpop.f32.mrf.mxu0  ;;  %v5627_v62 = vrot.slane %v5611_v10, 9  ;;  %v3939_v6 = vshrl.u32 %v5557_v41, 16 }
 0x13e   : > { %v6029_v21 = vpop.f32.mrf.mxu1  ;;  %6232 = vmatmul.mubr.msk.bf16.gmra.mxu1 %vm701_vm3, %v9362_v40  ;;  %v3942_v63 = vshll.u32 %v5557_v41, 16  ;;  %v3948_v2 = vshll.u32 %v8591_v30, 16  ;;  %v3952_v10 = vshrl.u32 %v8591_v30, 16  ;;  %v5560_v40 = vld [vmem:[%s6584_s9 + $0xc0] sm:$0xf]  ;;  %v3922_v4 = vrot.slane %v3921_v32, 4 }
 0x13f   : > { %v8593_v59 = vadd.f32 %v1524_v33, %v1100_v24  ;;  %v1121_v13 = vadd.f32 %v6029_v21, %v9363_v22  ;;  %v6064_v57 = vpop.f32.mrf.mxu0  ;;  %6235 = vmatprep.mubr.msk.bf16.mxu1 %vm701_vm3, %v8445_v46  ;;  %v9365_v24 = vld [vmem:[#allocation21_spill] sm:$0xff]  ;;  %v3936_v43 = vrot.slane %v3934_v38, 5  ;;  %v4456_v17 = vrot.slane %v4454_v49, 4 }
 0x140   : > { %v1112_v45 = vpop.f32.mrf.mxu1  ;;  %v4457_v33 = vrot.slane %v8553_v1, 5  ;;  %v8621_v14 = vsel %vm6914_vm7, %v5627_v62, %v4454_v49  ;;  %v8624_v32 = vld [vmem:[%s6584_s9 + $0xc4] sm:$0xf]  ;;  %v9369_v1 = vcombine.low %v8403_v25, %v8407_v50  ;;  %v8636_v62 = vrot.slane %v3948_v2, 5 }
 0x141   : > { %v8605_v12 = vadd.f32 %v6063_v56, %v1121_v13  ;;  %v1113_v21 = vadd.f32 %v1112_v45, %v9365_v24  ;;  %v1540_v46 = vpop.f32.mrf.mxu0  ;;  %v9367_v56 = vld [vmem:[#allocation24_spill] sm:$0xff]  ;;  %v9368_v45 = vcombine.low %v8391_v47, %v8395_v7  ;;  %v3932_v24 = vrot.slane %v3931_v16, 4  ;;  %v9370_v16 = vld [vmem:[#allocation26_spill] sm:$0xff] }
 0x142   : > { %v6030_v22 = vpop.f32.mrf.mxu1  ;;  %v3963_v47 = vshrl.u32 %v5560_v40, 16  ;;  %v3966_v7 = vshll.u32 %v5560_v40, 16  ;;  %v3927_v25 = vsel %vm6628_vm4, %v3922_v4, %v8555_v23  ;;  %v8645_v50 = vsel %vm6914_vm7, %v4456_v17, %v4457_v33  ;;  %v5612_v40 = vld [vmem:[%s6584_s9 + $0xb4] sm:$0xe] }
 0x143   : > { %9364 = vst [vmem:[#allocation14_spill] sm:$0xff] %v8605_v12  ;;  %v8612_v35 = vadd.f32 %v1537_v18, %v1113_v21  ;;  %v1124_v41 = vadd.f32 %v6030_v22, %v9367_v56  ;;  %v6067_v13 = vpop.f32.mrf.mxu0  ;;  %6270 = vmatmul.mubr.msk.bf16.gmra.mxu0 %vm701_vm3, %v9368_v45  ;;  %v8631_v18 = vld [vmem:[%s6584_s9 + $0xbc] sm:$0x1]  ;;  %v3941_v21 = vrot.slane %v3939_v6, 4  ;;  %v3944_v22 = vrot.slane %v3942_v63, 5 }
 0x144   : > { %v1115_v38 = vpop.f32.mrf.mxu1  ;;  %6273 = vmatprep.mubr.msk.bf16.mxu0 %vm701_vm3, %v9369_v1  ;;  %v3976_v6 = vshrl.u32 %v8624_v32, 16  ;;  %v3958_v23 = vshll.u32 %v8631_v18, 16  ;;  %v4461_v17 = vrot.slane %v8591_v30, 5  ;;  %v9371_v1 = vld [vmem:[#allocation28_spill] sm:$0xff] }
 0x145   : > { %9366 = vst [vmem:[#allocation11_spill] sm:$0xff] %v8612_v35  ;;  %v8633_v56 = vadd.f32 %v6064_v57, %v1124_v41  ;;  %v1116_v45 = vadd.f32 %v1115_v38, %v9370_v16  ;;  %v1553_v49 = vpop.f32.mrf.mxu0  ;;  %v3954_v35 = vrot.slane %v3952_v10, 4  ;;  %v3972_v57 = vshll.u32 %v8624_v32, 16 }
 0x146   : > { %v6033_v12 = vpop.f32.mrf.mxu1  ;;  %6236 = vmatmul.mubr.msk.bf16.gmra.mxu1 %vm701_vm3, %v8447_v61  ;;  %v3937_v61 = vsel %vm6628_vm4, %v3932_v24, %v3936_v43  ;;  %v3945_v33 = vor.u32 %v3944_v22, %v3941_v21  ;;  %v3965_v41 = vrot.slane %v3963_v47, 4  ;;  %v3968_v38 = vrot.slane %v3966_v7, 5 }
 0x147   : > { %v8649_v63 = vadd.f32 %v1540_v46, %v1116_v45  ;;  %v1137_v2 = vadd.f32 %v6033_v12, %v8355_v28  ;;  %v6068_v10 = vpop.f32.mrf.mxu0  ;;  %6239 = vmatprep.mubr.msk.bf16.mxu1 %vm701_vm3, %v8453_v60  ;;  %v9372_v60 = vsel %vm6628_vm4, %v8543_v51, %v8507_v52  ;;  %v3955_v24 = vor.u32 %v3954_v35, %v8636_v62 }
 0x148   : > { %v1128_v4 = vpop.f32.mrf.mxu1  ;;  %v8667_v43 = vcombine.low %v9372_v60, %v3913_v27  ;;  %v8670_v30 = vcombine.low %v3927_v25, %v3937_v61  ;;  %v8674_v22 = vrot.slane %v3972_v57, 5  ;;  %v3978_v47 = vrot.slane %v3976_v6, 4  ;;  %v5562_v27 = vld [vmem:[%s6584_s9 + $0xc8] sm:$0x1] }
 0x149   : > { %v8659_v46 = vadd.f32 %v6067_v13, %v1137_v2  ;;  %v1129_v28 = vadd.f32 %v1128_v4, %v9371_v1  ;;  %v1556_v12 = vpop.f32.mrf.mxu0  ;;  %v5644_v13 = vcombine.low %v8621_v14, %v8645_v50  ;;  %v9373_v52 = vcombine.low %v8473_v3, %v8495_v20  ;;  %v5563_v14 = vld [vmem:[%s6584_s9 + $0xcc] sm:$0xf]  ;;  %v8695_v20 = vld [vmem:[%s6584_s9 + $0xd0] sm:$0xf]  ;;  %v5613_v4 = vld [vmem:[%s6584_s9 + $0xc0] sm:$0xe] }
 0x14a   : > { %v6034_v21 = vpop.f32.mrf.mxu1  ;;  %v8683_v35 = vrot.slane %v3958_v23, 5  ;;  %v5628_v51 = vrot.slane %v5612_v40, 9  ;;  %v9374_v50 = vcombine.low %v8505_v53, %v8535_v39  ;;  %v4464_v57 = vrot.slane %v8631_v18, 5 }
 0x14b   : > { %v8676_v7 = vadd.f32 %v1553_v49, %v1129_v28  ;;  %v1140_v16 = vadd.f32 %v6034_v21, %v8378_v19  ;;  %v6071_v45 = vpop.f32.mrf.mxu0  ;;  %6274 = vmatmul.mubr.msk.bf16.gmra.mxu0 %vm701_vm3, %v9373_v52  ;;  %v8691_v49 = vrot.slane %v3945_v33, 4  ;;  %v4463_v19 = vrot.slane %v4461_v17, 4 }
 0x14c   : > { %v1131_v25 = vpop.f32.mrf.mxu1  ;;  %6277 = vmatprep.mubr.msk.bf16.mxu0 %vm701_vm3, %v9374_v50  ;;  %v3969_v3 = vor.u32 %v3968_v38, %v3965_v41  ;;  %v8700_v23 = vrot.slane %v3955_v24, 4  ;;  %v4468_v53 = vrot.slane %v8624_v32, 5  ;;  %v3979_v33 = vor.u32 %v3978_v47, %v8674_v22 }
 0x14d   : > { %v8697_v6 = vadd.f32 %v6068_v10, %v1140_v16  ;;  %v1132_v2 = vadd.f32 %v1131_v25, %v8410_v26  ;;  %v1569_v61 = vpop.f32.mrf.mxu0  ;;  %v3982_v18 = vshll.u32 %v5562_v27, 16  ;;  %v3987_v40 = vshrl.u32 %v5563_v14, 16  ;;  %v9377_v10 = vld [vmem:[#allocation7_spill] sm:$0xff]  ;;  %v9378_v16 = vld [vmem:[#allocation6_spill] sm:$0xff] }
 0x14e   : > { %v6037_v39 = vpop.f32.mrf.mxu1  ;;  %6240 = vmatmul.mubr.msk.bf16.gmra.mxu1 %vm701_vm3, %v8482_v48  ;;  %v3990_v41 = vshll.u32 %v5563_v14, 16  ;;  %v3996_v28 = vshll.u32 %v8695_v20, 16  ;;  %v4000_v32 = vshrl.u32 %v8695_v20, 16  ;;  %v4462_v48 = vsel %vm6914_vm7, %v5628_v51, %v4461_v17  ;;  %v9379_v17 = vld [vmem:[#allocation9_spill] sm:$0xff] }
 0x14f   : > { %9375 = vst [vmem:[#allocation19_spill] sm:$0xff] %v8697_v6  ;;  %v8707_v38 = vadd.f32 %v1556_v12, %v1132_v2  ;;  %v1153_v1 = vadd.f32 %v6037_v39, %v9377_v10  ;;  %v6072_v26 = vpop.f32.mrf.mxu0  ;;  %6243 = vmatprep.mubr.msk.bf16.mxu1 %vm701_vm3, %v8561_v15  ;;  %v4465_v24 = vsel %vm6914_vm7, %v4463_v19, %v4464_v57  ;;  %v3970_v21 = vrot.slane %v3969_v3, 4 }
 0x150   : > { %v1144_v60 = vpop.f32.mrf.mxu1  ;;  %v5629_v12 = vrot.slane %v5613_v4, 9  ;;  %v4470_v25 = vrot.slane %v4468_v53, 4  ;;  %v4471_v15 = vrot.slane %v5562_v27, 5  ;;  %v3980_v2 = vrot.slane %v3979_v33, 4  ;;  %v5565_v33 = vld [vmem:[%s6584_s9 + $0xd4] sm:$0x1] }
 0x151   : > { %9376 = vst [vmem:[#allocation15_spill] sm:$0xff] %v8707_v38  ;;  %v8718_v47 = vadd.f32 %v6071_v45, %v1153_v1  ;;  %v1145_v52 = vadd.f32 %v1144_v60, %v9378_v16  ;;  %v1572_v14 = vpop.f32.mrf.mxu0  ;;  %v3984_v39 = vrot.slane %v3982_v18, 5  ;;  %v3989_v10 = vrot.slane %v3987_v40, 4  ;;  %v9381_v18 = vld [vmem:[#allocation8_spill] sm:$0xff] }
 0x152   : > { %v6038_v50 = vpop.f32.mrf.mxu1  ;;  %v3992_v38 = vrot.slane %v3990_v41, 5  ;;  %v9380_v45 = vcombine.low %v8575_v58, %v8579_v36  ;;  %v8728_v57 = vrot.slane %v3996_v28, 5  ;;  %v4002_v27 = vrot.slane %v4000_v32, 4 }
 0x153   : > { %v8721_v6 = vadd.f32 %v1569_v61, %v1145_v52  ;;  %v1156_v51 = vadd.f32 %v6038_v50, %v9379_v17  ;;  %v6075_v19 = vpop.f32.mrf.mxu0  ;;  %v3951_v61 = vsel %vm6628_vm4, %v8691_v49, %v8636_v62  ;;  %v3961_v4 = vsel %vm6628_vm4, %v8700_v23, %v8683_v35  ;;  %v5614_v62 = vld [vmem:[%s6584_s9 + $0xcc] sm:$0xe]  ;;  %s9050_s9 = scalar_lea.vmem [#allocation2], %s5126_s8 }
 0x154   : > { %6278 = vmatmul.mubr.msk.bf16.gmra.mxu0 %vm701_vm3, %v9380_v45  ;;  %v1147_v3 = vpop.f32.mrf.mxu1  ;;  %v4475_v58 = vrot.slane %v8695_v20, 5  ;;  %v4472_v1 = vsel %vm6914_vm7, %v4470_v25, %v4471_v15  ;;  %v5645_v35 = vcombine.low %v4462_v48, %v4465_v24  ;;  %v3975_v20 = vsel %vm6628_vm4, %v3970_v21, %v8674_v22  ;;  %v9383_v25 = vld [vmem:[#allocation13_spill] sm:$0xff]  ;;  %s5020_s11 = sshll.u32 %s9050_s9, 4  ;;  %s9147_s11 = int_to_ptr.vmem [resolvable:$true] %s5020_s11 }
 0x155   : > { %6281 = vmatprep.mubr.msk.bf16.mxu0 %vm701_vm3, %v5644_v13  ;;  %v8741_v36 = vadd.f32 %v6072_v26, %v1156_v51  ;;  %v1148_v40 = vadd.f32 %v1147_v3, %v9381_v18  ;;  %v1585_v41 = vpop.f32.mrf.mxu0  ;;  %v4469_v13 = vsel %vm6914_vm7, %v5629_v12, %v4468_v53  ;;  %v3985_v23 = vsel %vm6628_vm4, %v3980_v2, %v3984_v39  ;;  %v9382_v53 = vld [vmem:[#allocation10_spill] sm:$0xff]  ;;  %s6409_s23 = scalar_lea.vmem %s9147_s11, 2048  ;;  %p6416_p1 = scmp.lt.s32.totalorder %s9147_s11, %s6414_s27 }
 0x156   : > { %v6041_v49 = vpop.f32.mrf.mxu1  ;;  %6244 = vmatmul.mubr.msk.bf16.gmra.mxu1 %vm701_vm3, %v8667_v43  ;;  %v3993_v26 = vor.u32 %v3992_v38, %v3989_v10  ;;  %v4003_v12 = vor.u32 %v4002_v27, %v8728_v57  ;;  %v4006_v43 = vshll.u32 %v5565_v33, 16  ;;  %v5646_v24 = vcombine.low %v4469_v13, %v4472_v1  ;;  %p6410_p12 = scmp.ne.s32.totalorder %s9147_s11, %s6409_s23  ;;  %p6417_p2 = scmp.lt.s32.totalorder %s6415_s28, %s6409_s23 }
 0x157   : > { %v8756_v28 = vadd.f32 %v1572_v14, %v1148_v40  ;;  %v1169_v32 = vadd.f32 %v6041_v49, %v9382_v53  ;;  %v6076_v60 = vpop.f32.mrf.mxu0  ;;  %6247 = vmatprep.mubr.msk.bf16.mxu1 %vm701_vm3, %v8670_v30  ;;  %v5630_v16 = vrot.slane %v5614_v62, 9  ;;  %v4477_v52 = vrot.slane %v4475_v58, 4  ;;  %v9384_v30 = vld [vmem:[#allocation16_spill] sm:$0xff] }
 0x158   : > { %v1160_v48 = vpop.f32.mrf.mxu1  ;;  %v4478_v22 = vrot.slane %v5565_v33, 5  ;;  %v5580_v50 = vcombine.low %v3951_v61, %v3961_v4  ;;  %v5581_v2 = vcombine.low %v3975_v20, %v3985_v23  ;;  %v3994_v39 = vrot.slane %v3993_v26, 4  ;;  %v9385_v33 = vld [vmem:[#allocation18_spill] sm:$0xff]  ;;  %v9386_v62 = vld [vmem:[#allocation20_spill] sm:$0xff]  ;;  %v9387_v26 = vld [vmem:[#allocation23_spill] sm:$0xff]  ;;  %p6411_p13 = pnand %p6410_p12, %p6550_p4  ;;  %p6418_p3 = por %p6417_p2, %p6416_p1 }
 0x159   : > { %v8762_v21 = vadd.f32 %v6075_v19, %v1169_v32  ;;  %v1161_v38 = vadd.f32 %v1160_v48, %v9383_v25  ;;  %v1588_v14 = vpop.f32.mrf.mxu0  ;;  %v4004_v45 = vrot.slane %v4003_v12, 4  ;;  %v4008_v27 = vrot.slane %v4006_v43, 5  ;;  %v9388_v43 = vld [vmem:[#allocation25_spill] sm:$0xff] }
 0x15a   : > { %v6042_v15 = vpop.f32.mrf.mxu1  ;;  %v4476_v19 = vsel %vm6914_vm7, %v5630_v16, %v4475_v58  ;;  %v4479_v61 = vsel %vm6914_vm7, %v4477_v52, %v4478_v22  ;;  %v3999_v13 = vsel %vm6628_vm4, %v3994_v39, %v8728_v57  ;;  %p6412_p0 = pneg %p6411_p13 }
 0x15b   : > { %v8765_v10 = vadd.f32 %v1585_v41, %v1161_v38  ;;  %v1172_v17 = vadd.f32 %v6042_v15, %v9384_v30  ;;  %v6079_v51 = vpop.f32.mrf.mxu0  ;;  %v4009_v0 = vsel %vm6628_vm4, %v4004_v45, %v4008_v27 }
 0x15c   : > { %6282 = vmatmul.mubr.msk.bf16.gmra.mxu0 %vm701_vm3, %v5645_v35  ;;  %v1163_v3 = vpop.f32.mrf.mxu1  ;;  %v5647_v35 = vcombine.low %v4476_v19, %v4479_v61  ;;  %v5582_v12 = vcombine.low %v3999_v13, %v4009_v0  ;;  %p6419_p5 = pnand %p6418_p3, %p6412_p0 }
 0x15d   : > { %6285 = vmatprep.mubr.msk.bf16.mxu0 %vm701_vm3, %v5646_v24  ;;  %v8774_v4 = vadd.f32 %v6076_v60, %v1172_v17  ;;  %v1164_v18 = vadd.f32 %v1163_v3, %v9385_v33  ;;  %v1601_v40 = vpop.f32.mrf.mxu0 }
 0x15e   : > { %v6045_v41 = vpop.f32.mrf.mxu1  ;;  %6248 = vmatmul.mubr.msk.bf16.gmra.mxu1 %vm701_vm3, %v5580_v50 }
 0x15f   : > { %v8781_v1 = vadd.f32 %v1588_v14, %v1164_v18  ;;  %v1185_v49 = vadd.f32 %v6045_v41, %v9386_v62  ;;  %v6080_v58 = vpop.f32.mrf.mxu0  ;;  %6251 = vmatprep.mubr.msk.bf16.mxu1 %vm701_vm3, %v5581_v2 }
 0x160   : > { %v1176_v20 = vpop.f32.mrf.mxu1 }
 0x161   : > { %v8787_v23 = vadd.f32 %v6079_v51, %v1185_v49  ;;  %v1177_v53 = vadd.f32 %v1176_v20, %v9387_v26  ;;  %v1604_v32 = vpop.f32.mrf.mxu0 }
 0x162   : > { %v6046_v60 = vpop.f32.mrf.mxu1 }
 0x163   : > { %v8790_v57 = vadd.f32 %v1601_v40, %v1177_v53  ;;  %v1188_v48 = vadd.f32 %v6046_v60, %v9388_v43  ;;  %v6083_v24 = vpop.f32.mrf.mxu0 }
 0x164   : > { %6286 = vmatmul.mubr.msk.bf16.gmra.mxu0 %vm701_vm3, %v5647_v35  ;;  %v1179_v16 = vpop.f32.mrf.mxu1 }
 0x165   : > { %v8794_v52 = vadd.f32 %v6080_v58, %v1188_v48  ;;  %v1180_v22 = vadd.f32 %v1179_v16, %v9389_v31  ;;  %v1617_v25 = vpop.f32.mrf.mxu0 }
 0x166   : > { %v6049_v38 = vpop.f32.mrf.mxu1  ;;  %6252 = vmatmul.mubr.msk.bf16.gmra.mxu1 %vm701_vm3, %v5582_v12 }
 0x167   : > { %v8798_v14 = vadd.f32 %v1604_v32, %v1180_v22  ;;  %v1201_v15 = vadd.f32 %v6049_v38, %v8370_v42  ;;  %v6084_v50 = vpop.f32.mrf.mxu0 }
 0x168   : > { %v1192_v2 = vpop.f32.mrf.mxu1 }
 0x169   : > { %v8801_v39 = vadd.f32 %v6083_v24, %v1201_v15  ;;  %v1193_v30 = vadd.f32 %v1192_v2, %v8397_v44  ;;  %v1620_v17 = vpop.f32.mrf.mxu0 }
 0x16a   : > { %v6050_v51 = vpop.f32.mrf.mxu1 }
 0x16b   : > { %v8804_v45 = vadd.f32 %v1617_v25, %v1193_v30  ;;  %v1204_v27 = vadd.f32 %v6050_v51, %v8412_v8  ;;  %v6123_v3 = vpop.f32.mrf.mxu0  ;;  %v9390_v30 = vld [vmem:[#allocation14_spill] sm:$0xff] }
 0x16c   : > { %v1195_v19 = vpop.f32.mrf.mxu1 }
 0x16d   : > { %v8807_v61 = vadd.f32 %v6084_v50, %v1204_v27  ;;  %v1196_v33 = vadd.f32 %v1195_v19, %v8434_v55  ;;  %v2590_v18 = vpop.f32.mrf.mxu0 }
 0x16e   : > { %v6089_v42 = vpop.f32.mrf.mxu1 }
 0x16f   : > { %v8810_v40 = vadd.f32 %v1620_v17, %v1196_v33  ;;  %v1993_v41 = vadd.f32 %v6089_v42, %v8479_v5  ;;  %v6124_v13 = vpop.f32.mrf.mxu0 }
 0x170   : > { %v1864_v44 = vpop.f32.mrf.mxu1 }
 0x171   : > { %v8813_v62 = vadd.f32 %v6123_v3, %v1993_v41  ;;  %v1991_v49 = vadd.f32 %v1864_v44, %v8486_v37  ;;  %v2593_v58 = vpop.f32.mrf.mxu0  ;;  %v9391_v3 = vld [vmem:[#allocation11_spill] sm:$0xff] }
 0x172   : > { %v6090_v8 = vpop.f32.mrf.mxu1 }
 0x173   : > { %v8816_v0 = vadd.f32 %v2590_v18, %v1991_v49  ;;  %v1994_v35 = vadd.f32 %v6090_v8, %v8512_v54  ;;  %v6127_v20 = vpop.f32.mrf.mxu0 }
 0x174   : > { %v1867_v55 = vpop.f32.mrf.mxu1 }
 0x175   : > { %v8819_v26 = vadd.f32 %v6124_v13, %v1994_v35  ;;  %v1992_v53 = vadd.f32 %v1867_v55, %v8526_v11  ;;  %v2606_v32 = vpop.f32.mrf.mxu0 }
 0x176   : > { %v6093_v5 = vpop.f32.mrf.mxu1 }
 0x177   : > { %v8822_v60 = vadd.f32 %v2593_v58, %v1992_v53  ;;  %v1997_v12 = vadd.f32 %v6093_v5, %v8538_v29  ;;  %v6128_v43 = vpop.f32.mrf.mxu0 }
 0x178   : > { %v1880_v37 = vpop.f32.mrf.mxu1 }
 0x179   : > { %v8825_v48 = vadd.f32 %v6127_v20, %v1997_v12  ;;  %v1995_v24 = vadd.f32 %v1880_v37, %v8545_v9  ;;  %v2609_v16 = vpop.f32.mrf.mxu0 }
 0x17a   : > { %v6094_v54 = vpop.f32.mrf.mxu1 }
 0x17b   : > { %v8828_v31 = vadd.f32 %v2606_v32, %v1995_v24  ;;  %v1998_v22 = vadd.f32 %v6094_v54, %v8570_v34  ;;  %v6131_v25 = vpop.f32.mrf.mxu0  ;;  %v9393_v54 = vld [vmem:[#allocation15_spill] sm:$0xff] }
 0x17c   : > { %v1883_v11 = vpop.f32.mrf.mxu1 }
 0x17d   : > { %v8831_v38 = vadd.f32 %v6128_v43, %v1998_v22  ;;  %v1996_v15 = vadd.f32 %v1883_v11, %v8593_v59  ;;  %v2622_v50 = vpop.f32.mrf.mxu0  ;;  %v9392_v43 = vld [vmem:[#allocation19_spill] sm:$0xff] }
 0x17e   : > { %v6097_v29 = vpop.f32.mrf.mxu1 }
 0x17f   : > { %v8834_v2 = vadd.f32 %v2609_v16, %v1996_v15  ;;  %v2001_v17 = vadd.f32 %v6097_v29, %v9390_v30  ;;  %v6132_v51 = vpop.f32.mrf.mxu0 }
 0x180   : > { %v1896_v9 = vpop.f32.mrf.mxu1 }
 0x181   : > { %v8837_v27 = vadd.f32 %v6131_v25, %v2001_v17  ;;  %v1999_v19 = vadd.f32 %v1896_v9, %v9391_v3  ;;  %v2625_v33 = vpop.f32.mrf.mxu0 }
 0x182   : > { %v6098_v34 = vpop.f32.mrf.mxu1 }
 0x183   : > { %v8840_v18 = vadd.f32 %v2622_v50, %v1999_v19  ;;  %v2002_v42 = vadd.f32 %v6098_v34, %v8633_v56  ;;  %v6135_v41 = vpop.f32.mrf.mxu0 }
 0x184   : > { %v1899_v59 = vpop.f32.mrf.mxu1 }
 0x185   : > { %v8843_v13 = vadd.f32 %v6132_v51, %v2002_v42  ;;  %v2000_v44 = vadd.f32 %v1899_v59, %v8649_v63  ;;  %v2638_v49 = vpop.f32.mrf.mxu0 }
 0x186   : > { %v6101_v58 = vpop.f32.mrf.mxu1 }
 0x187   : > { %v8846_v8 = vadd.f32 %v2625_v33, %v2000_v44  ;;  %v2005_v35 = vadd.f32 %v6101_v58, %v8659_v46  ;;  %v6136_v20 = vpop.f32.mrf.mxu0 }
 0x188   : > { %v1912_v55 = vpop.f32.mrf.mxu1 }
 0x189   : > { %v8849_v53 = vadd.f32 %v6135_v41, %v2005_v35  ;;  %v2003_v32 = vadd.f32 %v1912_v55, %v8676_v7  ;;  %v2641_v5 = vpop.f32.mrf.mxu0 }
 0x18a   : > { %v6102_v56 = vpop.f32.mrf.mxu1 }
 0x18b   : > { %v8852_v12 = vadd.f32 %v2638_v49, %v2003_v32  ;;  %v2006_v37 = vadd.f32 %v6102_v56, %v9392_v43  ;;  %v6139_v24 = vpop.f32.mrf.mxu0 }
 0x18c   : > { %v1915_v63 = vpop.f32.mrf.mxu1 }
 0x18d   : > { %v8855_v16 = vadd.f32 %v6136_v20, %v2006_v37  ;;  %v2004_v22 = vadd.f32 %v1915_v63, %v9393_v54  ;;  %v2654_v25 = vpop.f32.mrf.mxu0 }
 0x18e   : > { %v6105_v46 = vpop.f32.mrf.mxu1 }
 0x18f   : > { %v8858_v11 = vadd.f32 %v2641_v5, %v2004_v22  ;;  %v2009_v15 = vadd.f32 %v6105_v46, %v8718_v47  ;;  %v6140_v50 = vpop.f32.mrf.mxu0 }
 0x190   : > { %v1928_v7 = vpop.f32.mrf.mxu1 }
 0x191   : > { %v8861_v29 = vadd.f32 %v6139_v24, %v2009_v15  ;;  %v2007_v30 = vadd.f32 %v1928_v7, %v8721_v6  ;;  %v2657_v17 = vpop.f32.mrf.mxu0 }
 0x192   : > { %v6106_v51 = vpop.f32.mrf.mxu1 }
 0x193   : > { %v8864_v9 = vadd.f32 %v2654_v25, %v2007_v30  ;;  %v2010_v3 = vadd.f32 %v6106_v51, %v8741_v36  ;;  %v6143_v19 = vpop.f32.mrf.mxu0 }
 0x194   : > { %v1931_v33 = vpop.f32.mrf.mxu1 }
 0x195   : > { %v8867_v34 = vadd.f32 %v6140_v50, %v2010_v3  ;;  %v2008_v42 = vadd.f32 %v1931_v33, %v8756_v28  ;;  %v2670_v41 = vpop.f32.mrf.mxu0 }
 0x196   : > { %v6109_v47 = vpop.f32.mrf.mxu1 }
 0x197   : > { %v8870_v59 = vadd.f32 %v2657_v17, %v2008_v42  ;;  %v2013_v44 = vadd.f32 %v6109_v47, %v8762_v21  ;;  %v6144_v49 = vpop.f32.mrf.mxu0 }
 0x198   : > { %v1944_v6 = vpop.f32.mrf.mxu1 }
 0x199   : > { %v8873_v58 = vadd.f32 %v6143_v19, %v2013_v44  ;;  %v2011_v35 = vadd.f32 %v1944_v6, %v8765_v10  ;;  %v2673_v20 = vpop.f32.mrf.mxu0 }
 0x19a   : > { %v6110_v36 = vpop.f32.mrf.mxu1 }
 0x19b   : > { %v8876_v55 = vadd.f32 %v2670_v41, %v2011_v35  ;;  %v2014_v32 = vadd.f32 %v6110_v36, %v8774_v4  ;;  %v6147_v5 = vpop.f32.mrf.mxu0 }
 0x19c   : > { %v1947_v28 = vpop.f32.mrf.mxu1 }
 0x19d   : > { %v8879_v56 = vadd.f32 %v6144_v49, %v2014_v32  ;;  %v2012_v43 = vadd.f32 %v1947_v28, %v8781_v1  ;;  %v2686_v37 = vpop.f32.mrf.mxu0 }
 0x19e   : > { %v6113_v21 = vpop.f32.mrf.mxu1 }
 0x19f   : > { %v8882_v24 = vadd.f32 %v2673_v20, %v2012_v43  ;;  %v2017_v63 = vadd.f32 %v6113_v21, %v8787_v23  ;;  %v6148_v54 = vpop.f32.mrf.mxu0 }
 0x1a0   : > { %v1960_v10 = vpop.f32.mrf.mxu1 }
 0x1a1   : > { %v8885_v22 = vadd.f32 %v6147_v5, %v2017_v63  ;;  %v2015_v25 = vadd.f32 %v1960_v10, %v8790_v57  ;;  %v2689_v46 = vpop.f32.mrf.mxu0 }
 0x1a2   : > { %v6114_v4 = vpop.f32.mrf.mxu1 }
 0x1a3   : > { %v8888_v15 = vadd.f32 %v2686_v37, %v2015_v25  ;;  %v2018_v50 = vadd.f32 %v6114_v4, %v8794_v52  ;;  %v6151_v7 = vpop.f32.mrf.mxu0 }
 0x1a4   : > { %v1963_v1 = vpop.f32.mrf.mxu1 }
 0x1a5   : > { %v8891_v30 = vadd.f32 %v6148_v54, %v2018_v50  ;;  %v2016_v17 = vadd.f32 %v1963_v1, %v8798_v14  ;;  %v2702_v51 = vpop.f32.mrf.mxu0 }
 0x1a6   : > { %v6117_v23 = vpop.f32.mrf.mxu1 }
 0x1a7   : > { %9394 = vst [vmem:[#allocation5_spill] sm:$0xff] %v8891_v30  ;;  %v8894_v3 = vadd.f32 %v2689_v46, %v2016_v17  ;;  %v2021_v19 = vadd.f32 %v6117_v23, %v8801_v39  ;;  %v6152_v33 = vpop.f32.mrf.mxu0 }
 0x1a8   : > { %v1976_v57 = vpop.f32.mrf.mxu1 }
 0x1a9   : > { %9395 = vst [vmem:[#allocation17_spill] sm:$0xff] %v8894_v3  ;;  %v8897_v42 = vadd.f32 %v6151_v7, %v2021_v19  ;;  %v2019_v41 = vadd.f32 %v1976_v57, %v8804_v45  ;;  %v2705_v47 = vpop.f32.mrf.mxu0 }
 0x1aa   : > { %v6118_v52 = vpop.f32.mrf.mxu1 }
 0x1ab   : > { %v8900_v44 = vadd.f32 %v2702_v51, %v2019_v41  ;;  %v2022_v49 = vadd.f32 %v6118_v52, %v8807_v61  ;;  %v6191_v6 = vpop.f32.mrf.mxu0 }
 0x1ac   : > { %v1979_v14 = vpop.f32.mrf.mxu1 }
 0x1ad   : > { %v8903_v35 = vadd.f32 %v6152_v33, %v2022_v49  ;;  %v2020_v20 = vadd.f32 %v1979_v14, %v8810_v40  ;;  %v3419_v36 = vpop.f32.mrf.mxu0 }
 0x1ae   : > { %v6157_v39 = vpop.f32.mrf.mxu1 }
 0x1af   : > { %9396 = vst [vmem:[#allocation22_spill] sm:$0xff] %v8903_v35  ;;  %v8906_v32 = vadd.f32 %v2705_v47, %v2020_v20  ;;  %v3189_v5 = vadd.f32 %v6157_v39, %v8813_v62  ;;  %v8909_v28 = vpop.f32.mrf.mxu0 }
 0x1b0   : > { %v3060_v45 = vpop.f32.mrf.mxu1 }
 0x1b1   : > { %9397 = vst [vmem:[#allocation12_spill] sm:$0xff] %v8906_v32  ;;  %v8911_v43 = vadd.f32 %v6191_v6, %v3189_v5  ;;  %v3187_v37 = vadd.f32 %v3060_v45, %v8816_v0  ;;  %v8914_v61 = vpop.f32.mrf.mxu0 }
 0x1b2   : > { %v8916_v21 = vpop.f32.mrf.mxu1 }
 0x1b3   : > { %v8918_v63 = vadd.f32 %v3419_v36, %v3187_v37  ;;  %v6195_v40 = vpop.f32.mrf.mxu0 }
 0x1b4   : > { %v8920_v54 = vpop.f32.mrf.mxu1 }
 0x1b5   : > { %v3435_v10 = vpop.f32.mrf.mxu0 }
 0x1b6   : > { %v6161_v25 = vpop.f32.mrf.mxu1 }
 0x1b7   : > { %v3193_v62 = vadd.f32 %v6161_v25, %v8825_v48  ;;  %v8923_v46 = vpop.f32.mrf.mxu0 }
 0x1b8   : > { %v3076_v4 = vpop.f32.mrf.mxu1 }
 0x1b9   : > { %v8925_v50 = vadd.f32 %v6195_v40, %v3193_v62  ;;  %v3191_v0 = vadd.f32 %v3076_v4, %v8828_v31  ;;  %v8928_v7 = vpop.f32.mrf.mxu0 }
 0x1ba   : > { %v8930_v1 = vpop.f32.mrf.mxu1 }
 0x1bb   : > { %v8932_v17 = vadd.f32 %v3435_v10, %v3191_v0  ;;  %v6199_v51 = vpop.f32.mrf.mxu0 }
 0x1bc   : > { %v8934_v23 = vpop.f32.mrf.mxu1 }
 0x1bd   : > { %v3451_v19 = vpop.f32.mrf.mxu0 }
 0x1be   : > { %v6165_v33 = vpop.f32.mrf.mxu1 }
 0x1bf   : > { %v3197_v48 = vadd.f32 %v6165_v33, %v8837_v27  ;;  %v8937_v57 = vpop.f32.mrf.mxu0 }
 0x1c0   : > { %v3092_v41 = vpop.f32.mrf.mxu1 }
 0x1c1   : > { %v8939_v47 = vadd.f32 %v6199_v51, %v3197_v48  ;;  %v3195_v31 = vadd.f32 %v3092_v41, %v8840_v18  ;;  %v8942_v52 = vpop.f32.mrf.mxu0 }
 0x1c2   : > { %v8944_v49 = vpop.f32.mrf.mxu1 }
 0x1c3   : > { %v8946_v6 = vadd.f32 %v3451_v19, %v3195_v31  ;;  %v6203_v14 = vpop.f32.mrf.mxu0 }
 0x1c4   : > { %v8948_v20 = vpop.f32.mrf.mxu1 }
 0x1c5   : > { %v3467_v36 = vpop.f32.mrf.mxu0 }
 0x1c6   : > { %v6169_v39 = vpop.f32.mrf.mxu1 }
 0x1c7   : > { %v3201_v27 = vadd.f32 %v6169_v39, %v8849_v53  ;;  %v8951_v5 = vpop.f32.mrf.mxu0 }
 0x1c8   : > { %v3108_v45 = vpop.f32.mrf.mxu1 }
 0x1c9   : > { %v8953_v37 = vadd.f32 %v6203_v14, %v3201_v27  ;;  %v3199_v18 = vadd.f32 %v3108_v45, %v8852_v12  ;;  %v8956_v40 = vpop.f32.mrf.mxu0 }
 0x1ca   : > { %v8958_v10 = vpop.f32.mrf.mxu1 }
 0x1cb   : > { %v8960_v25 = vadd.f32 %v3467_v36, %v3199_v18  ;;  %v6207_v62 = vpop.f32.mrf.mxu0 }
 0x1cc   : > { %v8962_v4 = vpop.f32.mrf.mxu1 }
 0x1cd   : > { %v3483_v0 = vpop.f32.mrf.mxu0 }
 0x1ce   : > { %v6173_v51 = vpop.f32.mrf.mxu1 }
 0x1cf   : > { %v3205_v53 = vadd.f32 %v6173_v51, %v8861_v29  ;;  %v8965_v19 = vpop.f32.mrf.mxu0 }
 0x1d0   : > { %v3124_v33 = vpop.f32.mrf.mxu1 }
 0x1d1   : > { %v8967_v48 = vadd.f32 %v6207_v62, %v3205_v53  ;;  %v3203_v12 = vadd.f32 %v3124_v33, %v8864_v9  ;;  %v8970_v41 = vpop.f32.mrf.mxu0 }
 0x1d2   : > { %v8972_v31 = vpop.f32.mrf.mxu1 }
 0x1d3   : > { %v8974_v14 = vadd.f32 %v3483_v0, %v3203_v12  ;;  %v6211_v36 = vpop.f32.mrf.mxu0 }
 0x1d4   : > { %v8976_v39 = vpop.f32.mrf.mxu1 }
 0x1d5   : > { %v3499_v27 = vpop.f32.mrf.mxu0 }
 0x1d6   : > { %v6177_v45 = vpop.f32.mrf.mxu1 }
 0x1d7   : > { %v3209_v29 = vadd.f32 %v6177_v45, %v8873_v58  ;;  %v8979_v18 = vpop.f32.mrf.mxu0 }
 0x1d8   : > { %9398 = vst [vmem:[#allocation21_spill] sm:$0xff] %v8979_v18  ;;  %v3140_v51 = vpop.f32.mrf.mxu1 }
 0x1d9   : > { %v8981_v62 = vadd.f32 %v6211_v36, %v3209_v29  ;;  %v3207_v9 = vadd.f32 %v3140_v51, %v8876_v55  ;;  %v8984_v53 = vpop.f32.mrf.mxu0 }
 0x1da   : > { %9399 = vst [vmem:[#allocation24_spill] sm:$0xff] %v8984_v53  ;;  %v8986_v33 = vpop.f32.mrf.mxu1 }
 0x1db   : > { %v8988_v0 = vadd.f32 %v3499_v27, %v3207_v9  ;;  %v6215_v12 = vpop.f32.mrf.mxu0 }
 0x1dc   : > { %v8990_v32 = vpop.f32.mrf.mxu1 }
 0x1dd   : > { %9400 = vst [vmem:[#allocation26_spill] sm:$0xff] %v8988_v0  ;;  %v3515_v35 = vpop.f32.mrf.mxu0 }
 0x1de   : > { %v6181_v3 = vpop.f32.mrf.mxu1 }
 0x1df   : > { %v3213_v58 = vadd.f32 %v6181_v3, %v8885_v22  ;;  %v8993_v45 = vpop.f32.mrf.mxu0 }
 0x1e0   : > { %9401 = vst [vmem:[#allocation28_spill] sm:$0xff] %v8993_v45  ;;  %v3156_v30 = vpop.f32.mrf.mxu1 }
 0x1e1   : > { %v8995_v36 = vadd.f32 %v6215_v12, %v3213_v58  ;;  %v3211_v55 = vadd.f32 %v3156_v30, %v8888_v15  ;;  %v8998_v29 = vpop.f32.mrf.mxu0 }
 0x1e2   : > { %9402 = vst [vmem:[#allocation7_spill] sm:$0xff] %v8998_v29  ;;  %v9000_v51 = vpop.f32.mrf.mxu1 }
 0x1e3   : > { %v9002_v27 = vadd.f32 %v3515_v35, %v3211_v55  ;;  %v6219_v9 = vpop.f32.mrf.mxu0 }
 0x1e4   : > { %v9004_v53 = vpop.f32.mrf.mxu1 }
 0x1e5   : > { %9403 = vst [vmem:[#allocation6_spill] sm:$0xff] %v9002_v27  ;;  %v3531_v0 = vpop.f32.mrf.mxu0  ;;  %v3190_v27 = vadd.f32 %v8916_v21, %v8819_v26  ;;  %v9030_v26 = vld [vmem:[%s9200_s2] ss:$0 sm:$0xff] }
 0x1e6   : > { %v6185_v18 = vpop.f32.mrf.mxu1 }
 0x1e7   : > { %v3217_v22 = vadd.f32 %v6185_v18, %v8897_v42  ;;  %v9007_v3 = vpop.f32.mrf.mxu0 }
 0x1e8   : > { %9404 = vst [vmem:[#allocation9_spill] sm:$0xff] %v9007_v3  ;;  %v3172_v45 = vpop.f32.mrf.mxu1 }
 0x1e9   : > { %v9009_v12 = vadd.f32 %v6219_v9, %v3217_v22  ;;  %v3215_v15 = vadd.f32 %v3172_v45, %v8900_v44  ;;  %v9012_v30 = vpop.f32.mrf.mxu0  ;;  %v3188_v9 = vadd.f32 %v8920_v54, %v8822_v60 }
 0x1ea   : > { %9406 = vst [vmem:[#allocation10_spill] sm:$0xff] %v9012_v30  ;;  %v9014_v58 = vpop.f32.mrf.mxu1  ;;  %v3549_v30 = vadd.f32 %v8909_v28, %v3190_v27 }
 0x1eb   : > { %9405 = vst [vmem:[#allocation8_spill] sm:$0xff] %v9009_v12  ;;  %v9016_v35 = vadd.f32 %v3531_v0, %v3215_v15  ;;  %v6259_v55 = vpop.f32.mrf.mxu0 }
 0x1ec   : > { %v9018_v29 = vpop.f32.mrf.mxu1 }
 0x1ed   : > { %9407 = vst [vmem:[#allocation13_spill] sm:$0xff] %v9016_v35  ;;  %9408 = vst [vmem:[#allocation16_spill] sm:$0xff] %v9018_v29  ;;  %v4615_v42 = vpop.f32.mrf.mxu0  ;;  %v3547_v35 = vadd.f32 %v8914_v61, %v3188_v9 }
 0x1ee   : > { %v6225_v18 = vpop.f32.mrf.mxu1 }
 0x1ef   : > { %v4274_v44 = vadd.f32 %v6225_v18, %v8911_v43  ;;  %v6260_v45 = vpop.f32.mrf.mxu0 }
 0x1f0   : > { %v4145_v22 = vpop.f32.mrf.mxu1 }
 0x1f1   : > { %v4744_v0 = vadd.f32 %v6259_v55, %v4274_v44  ;;  %v4272_v15 = vadd.f32 %v4145_v22, %v8918_v63  ;;  %v4618_v3 = vpop.f32.mrf.mxu0  ;;  %v3194_v44 = vadd.f32 %v8930_v1, %v8831_v38  ;;  %v3192_v22 = vadd.f32 %v8934_v23, %v8834_v2 }
 0x1f2   : > { %v6226_v21 = vpop.f32.mrf.mxu1 }
 0x1f3   : > { %v4742_v60 = vadd.f32 %v4615_v42, %v4272_v15  ;;  %v4275_v54 = vadd.f32 %v6226_v21, %v3549_v30  ;;  %v6263_v43 = vpop.f32.mrf.mxu0  ;;  %v4783_v28 = vadd.f32 %v9030_v26, %v4744_v0  ;;  %v3553_v2 = vadd.f32 %v8923_v46, %v3194_v44 }
 0x1f4   : > { %v4148_v18 = vpop.f32.mrf.mxu1  ;;  %v3551_v23 = vadd.f32 %v8928_v7, %v3192_v22 }
 0x1f5   : > { %v4745_v27 = vadd.f32 %v6260_v45, %v4275_v54  ;;  %v4273_v55 = vadd.f32 %v4148_v18, %v3547_v35  ;;  %v4631_v63 = vpop.f32.mrf.mxu0  ;;  %v4781_v29 = vadd.f32 %v9030_v26, %v4742_v60  ;;  %v4815_v35 = vmax.f32 %v4783_v28, 0.0 }
 0x1f6   : > { %v6229_v12 = vpop.f32.mrf.mxu1  ;;  %v3198_v28 = vadd.f32 %v8944_v49, %v8843_v13  ;;  %v3196_v13 = vadd.f32 %v8948_v20, %v8846_v8 }
 0x1f7   : > { %v4784_v61 = vadd.f32 %v9030_v26, %v4745_v27  ;;  %v4743_v30 = vadd.f32 %v4618_v3, %v4273_v55  ;;  %v4278_v42 = vadd.f32 %v6229_v12, %v8925_v50  ;;  %v6264_v9 = vpop.f32.mrf.mxu0  ;;  %v4813_v54 = vmax.f32 %v4781_v29, 0.0 }
 0x1f8   : > { %v4161_v45 = vpop.f32.mrf.mxu1  ;;  %v3555_v20 = vadd.f32 %v8942_v52, %v3196_v13 }
 0x1f9   : > { %v4816_v0 = vmax.f32 %v4784_v61, 0.0  ;;  %v4782_v15 = vadd.f32 %v9030_v26, %v4743_v30  ;;  %v4276_v38 = vadd.f32 %v4161_v45, %v8932_v17  ;;  %v4634_v1 = vpop.f32.mrf.mxu0  ;;  %v4748_v21 = vadd.f32 %v6263_v43, %v4278_v42 }
 0x1fa   : > { %v6230_v60 = vpop.f32.mrf.mxu1  ;;  %v3557_v45 = vadd.f32 %v8937_v57, %v3198_v28  ;;  %v3202_v57 = vadd.f32 %v8958_v10, %v8855_v16  ;;  %v3200_v28 = vadd.f32 %v8962_v4, %v8858_v11 }
 0x1fb   : > { %v5743_v18 = vpack.c.bf16 %v4816_v0, %v4815_v35  ;;  %v4814_v3 = vmax.f32 %v4782_v15, 0.0  ;;  %v4746_v27 = vadd.f32 %v4631_v63, %v4276_v38  ;;  %v6267_v50 = vpop.f32.mrf.mxu0  ;;  %v4279_v12 = vadd.f32 %v6230_v60, %v3553_v2 }
 0x1fc   : > { %v4164_v55 = vpop.f32.mrf.mxu1  ;;  %v4787_v43 = vadd.f32 %v9030_v26, %v4748_v21  ;;  %v3561_v10 = vadd.f32 %v8951_v5, %v3202_v57 }
 0x1fd   : > { %5815 = vst [vmem:[%s9050_s9 + $0x8] sm:$0xff] %v5743_v18   ;;  %v5738_v46 = vpack.c.bf16 %v4814_v3, %v4813_v54  ;;  %v4277_v17 = vadd.f32 %v4164_v55, %v3551_v23  ;;  %v4647_v7 = vpop.f32.mrf.mxu0  ;;  %v4749_v29 = vadd.f32 %v6264_v9, %v4279_v12  ;;  %v4785_v63 = vadd.f32 %v9030_v26, %v4746_v27 }
 0x1fe   : > { %v6233_v44 = vpop.f32.mrf.mxu1  ;;  %v4819_v38 = vmax.f32 %v4787_v43, 0.0 }
 0x1ff   : > { %5739 = vst [vmem:[%s9050_s9] sm:$0xff] %v5738_v46   ;;  %v4747_v22 = vadd.f32 %v4634_v1, %v4277_v17  ;;  %v4282_v61 = vadd.f32 %v6233_v44, %v8939_v47  ;;  %v6268_v30 = vpop.f32.mrf.mxu0  ;;  %v4788_v49 = vadd.f32 %v9030_v26, %v4749_v29  ;;  %v4817_v47 = vmax.f32 %v4785_v63, 0.0 }
 0x200   : > { %v4177_v42 = vpop.f32.mrf.mxu1 }
 0x201   : > { %v4786_v35 = vadd.f32 %v9030_v26, %v4747_v22  ;;  %v4752_v0 = vadd.f32 %v6267_v50, %v4282_v61  ;;  %v4280_v9 = vadd.f32 %v4177_v42, %v8946_v6  ;;  %v4650_v15 = vpop.f32.mrf.mxu0  ;;  %v4820_v1 = vmax.f32 %v4788_v49, 0.0 }
 0x202   : > { %v6234_v2 = vpop.f32.mrf.mxu1 }
 0x203   : > { %v4818_v23 = vmax.f32 %v4786_v35, 0.0  ;;  %v4283_v21 = vadd.f32 %v6234_v2, %v3557_v45  ;;  %v6271_v8 = vpop.f32.mrf.mxu0  ;;  %v5753_v60 = vpack.c.bf16 %v4820_v1, %v4819_v38  ;;  %v4750_v54 = vadd.f32 %v4647_v7, %v4280_v9 }
 0x204   : > { %v4180_v18 = vpop.f32.mrf.mxu1  ;;  %v4791_v6 = vadd.f32 %v9030_v26, %v4752_v0  ;;  %v3206_v38 = vadd.f32 %v8972_v31, %v8867_v34 }
 0x205   : > { %v5748_v3 = vpack.c.bf16 %v4818_v23, %v4817_v47  ;;  %v4753_v27 = vadd.f32 %v6268_v30, %v4283_v21  ;;  %v4663_v50 = vpop.f32.mrf.mxu0  ;;  %5817 = vst [vmem:[%s9050_s9 + $0x18] sm:$0xff] %v5753_v60   ;;  %v4281_v12 = vadd.f32 %v4180_v18, %v3555_v20  ;;  %v4789_v17 = vadd.f32 %v9030_v26, %v4750_v54 }
 0x206   : > { %v6237_v55 = vpop.f32.mrf.mxu1  ;;  %v4823_v29 = vmax.f32 %v4791_v6, 0.0  ;;  %v3559_v30 = vadd.f32 %v8956_v40, %v3200_v28  ;;  %v3204_v40 = vadd.f32 %v8976_v39, %v8870_v59  ;;  %v3565_v39 = vadd.f32 %v8965_v19, %v3206_v38 }
 0x207   : > { %5816 = vst [vmem:[%s9050_s9 + $0x10] sm:$0xff] %v5748_v3   ;;  %v4792_v52 = vadd.f32 %v9030_v26, %v4753_v27  ;;  %v4286_v46 = vadd.f32 %v6237_v55, %v8953_v37  ;;  %v6272_v16 = vpop.f32.mrf.mxu0  ;;  %v4751_v7 = vadd.f32 %v4650_v15, %v4281_v12  ;;  %v4821_v42 = vmax.f32 %v4789_v17, 0.0 }
 0x208   : > { %v4193_v43 = vpop.f32.mrf.mxu1  ;;  %v3563_v18 = vadd.f32 %v8970_v41, %v3204_v40 }
 0x209   : > { %v4824_v44 = vmax.f32 %v4792_v52, 0.0  ;;  %v4756_v63 = vadd.f32 %v6271_v8, %v4286_v46  ;;  %v4284_v22 = vadd.f32 %v4193_v43, %v8960_v25  ;;  %v4666_v61 = vpop.f32.mrf.mxu0  ;;  %v4790_v11 = vadd.f32 %v9030_v26, %v4751_v7 }
 0x20a   : > { %v6238_v4 = vpop.f32.mrf.mxu1  ;;  %v3210_v46 = vadd.f32 %v8986_v33, %v8879_v56 }
 0x20b   : > { %v5763_v37 = vpack.c.bf16 %v4824_v44, %v4823_v29  ;;  %v4754_v13 = vadd.f32 %v4663_v50, %v4284_v22  ;;  %v4287_v49 = vadd.f32 %v6238_v4, %v3561_v10  ;;  %v6275_v5 = vpop.f32.mrf.mxu0  ;;  %v4822_v45 = vmax.f32 %v4790_v11, 0.0  ;;  %v9409_v22 = vld [vmem:[#allocation21_spill] sm:$0xff] }
 0x20c   : > { %v4196_v35 = vpop.f32.mrf.mxu1  ;;  %v4795_v0 = vadd.f32 %v9030_v26, %v4756_v63  ;;  %v3208_v63 = vadd.f32 %v8990_v32, %v8882_v24  ;;  %v9411_v32 = vld [vmem:[#allocation24_spill] sm:$0xff] }
 0x20d   : > { %5819 = vst [vmem:[%s9050_s9 + $0x28] sm:$0xff] %v5763_v37   ;;  %v4757_v9 = vadd.f32 %v6272_v16, %v4287_v49  ;;  %v4285_v15 = vadd.f32 %v4196_v35, %v3559_v30  ;;  %v4679_v25 = vpop.f32.mrf.mxu0  ;;  %v5758_v1 = vpack.c.bf16 %v4822_v45, %v4821_v42  ;;  %v4793_v47 = vadd.f32 %v9030_v26, %v4754_v13  ;;  %v9410_v30 = vld [vmem:[#allocation26_spill] sm:$0xff] }
 0x20e   : > { %v6241_v2 = vpop.f32.mrf.mxu1  ;;  %v4827_v60 = vmax.f32 %v4795_v0, 0.0  ;;  %v3567_v0 = vadd.f32 %v9411_v32, %v3208_v63  ;;  %v9418_v63 = vld [vmem:[#allocation12_spill] sm:$0xff] }
 0x20f   : > { %v4796_v23 = vadd.f32 %v9030_v26, %v4757_v9  ;;  %v4755_v21 = vadd.f32 %v4666_v61, %v4285_v15  ;;  %v4290_v8 = vadd.f32 %v6241_v2, %v8967_v48  ;;  %v6276_v20 = vpop.f32.mrf.mxu0  ;;  %5818 = vst [vmem:[%s9050_s9 + $0x20] sm:$0xff] %v5758_v1   ;;  %v4825_v27 = vmax.f32 %v4793_v47, 0.0  ;;  %v9412_v9 = vld [vmem:[#allocation5_spill] sm:$0xff] }
 0x210   : > { %v4209_v57 = vpop.f32.mrf.mxu1  ;;  %v3569_v61 = vadd.f32 %v9409_v22, %v3210_v46  ;;  %v3214_v15 = vadd.f32 %v9000_v51, %v9412_v9 }
 0x211   : > { %v4828_v54 = vmax.f32 %v4796_v23, 0.0  ;;  %v4794_v34 = vadd.f32 %v9030_v26, %v4755_v21  ;;  %v4288_v31 = vadd.f32 %v4209_v57, %v8974_v14  ;;  %v4682_v59 = vpop.f32.mrf.mxu0  ;;  %v4760_v3 = vadd.f32 %v6275_v5, %v4290_v8 }
 0x212   : > { %v6242_v6 = vpop.f32.mrf.mxu1 }
 0x213   : > { %v5773_v48 = vpack.c.bf16 %v4828_v54, %v4827_v60  ;;  %v4826_v50 = vmax.f32 %v4794_v34, 0.0  ;;  %v4758_v12 = vadd.f32 %v4679_v25, %v4288_v31  ;;  %v4291_v28 = vadd.f32 %v6242_v6, %v3565_v39  ;;  %v9414_v34 = vld [vmem:[#allocation28_spill] sm:$0xff] }
 0x214   : > { %v6279_v55 = vpop.f32.mrf.mxu0  ;;  %v4212_v52 = vpop.f32.mrf.mxu1  ;;  %v4799_v19 = vadd.f32 %v9030_v26, %v4760_v3  ;;  %v3573_v31 = vadd.f32 %v9414_v34, %v3214_v15 }
 0x215   : > { %5821 = vst [vmem:[%s9050_s9 + $0x38] sm:$0xff] %v5773_v48   ;;  %v5768_v14 = vpack.c.bf16 %v4826_v50, %v4825_v27  ;;  %v4289_v16 = vadd.f32 %v4212_v52, %v3563_v18  ;;  %v4761_v41 = vadd.f32 %v6276_v20, %v4291_v28  ;;  %v4797_v7 = vadd.f32 %v9030_v26, %v4758_v12  ;;  %v9413_v20 = vld [vmem:[#allocation17_spill] sm:$0xff]  ;;  %v9415_v48 = vld [vmem:[#allocation6_spill] sm:$0xff]  ;;  %v9416_v28 = vld [vmem:[#allocation7_spill] sm:$0xff] }
 0x216   : > { %v4695_v10 = vpop.f32.mrf.mxu0  ;;  %v6245_v17 = vpop.f32.mrf.mxu1  ;;  %v4831_v49 = vmax.f32 %v4799_v19, 0.0  ;;  %v3212_v57 = vadd.f32 %v9004_v53, %v9413_v20 }
 0x217   : > { %5820 = vst [vmem:[%s9050_s9 + $0x30] sm:$0xff] %v5768_v14   ;;  %v4759_v43 = vadd.f32 %v4682_v59, %v4289_v16  ;;  %v4294_v29 = vadd.f32 %v6245_v17, %v8981_v62  ;;  %v4800_v56 = vadd.f32 %v9030_v26, %v4761_v41  ;;  %v4829_v62 = vmax.f32 %v4797_v7, 0.0 }
 0x218   : > { %v6280_v44 = vpop.f32.mrf.mxu0  ;;  %v4225_v33 = vpop.f32.mrf.mxu1  ;;  %v3571_v52 = vadd.f32 %v9416_v28, %v3212_v57 }
 0x219   : > { %v4798_v11 = vadd.f32 %v9030_v26, %v4759_v43  ;;  %v4764_v4 = vadd.f32 %v6279_v55, %v4294_v29  ;;  %v4292_v37 = vadd.f32 %v4225_v33, %v9410_v30  ;;  %v4832_v5 = vmax.f32 %v4800_v56, 0.0  ;;  %v9417_v29 = vld [vmem:[#allocation22_spill] sm:$0xff]  ;;  %v9419_v56 = vld [vmem:[#allocation16_spill] sm:$0xff] }
 0x21a   : > { %v4698_v13 = vpop.f32.mrf.mxu0  ;;  %v6246_v42 = vpop.f32.mrf.mxu1  ;;  %v3216_v33 = vadd.f32 %v9419_v56, %v9418_v63 }
 0x21b   : > { %v4830_v45 = vmax.f32 %v4798_v11, 0.0  ;;  %v4295_v35 = vadd.f32 %v6246_v42, %v3569_v61  ;;  %v5783_v25 = vpack.c.bf16 %v4832_v5, %v4831_v49  ;;  %v4762_v38 = vadd.f32 %v4695_v10, %v4292_v37 }
 0x21c   : > { %v6283_v24 = vpop.f32.mrf.mxu0  ;;  %v4228_v40 = vpop.f32.mrf.mxu1  ;;  %v4803_v2 = vadd.f32 %v9030_v26, %v4764_v4 }
 0x21d   : > { %v5778_v1 = vpack.c.bf16 %v4830_v45, %v4829_v62  ;;  %v4765_v47 = vadd.f32 %v6280_v44, %v4295_v35  ;;  %5823 = vst [vmem:[%s9050_s9 + $0x48] sm:$0xff] %v5783_v25   ;;  %v4293_v21 = vadd.f32 %v4228_v40, %v3567_v0  ;;  %v4801_v59 = vadd.f32 %v9030_v26, %v4762_v38  ;;  %v9421_v45 = vld [vmem:[#allocation13_spill] sm:$0xff]  ;;  %v9423_v0 = vld [vmem:[#allocation10_spill] sm:$0xff] }
 0x21e   : > { %v4711_v23 = vpop.f32.mrf.mxu0  ;;  %v6249_v8 = vpop.f32.mrf.mxu1  ;;  %v4835_v3 = vmax.f32 %v4803_v2, 0.0  ;;  %v3218_v44 = vadd.f32 %v9014_v58, %v9417_v29  ;;  %v3575_v9 = vadd.f32 %v9423_v0, %v3216_v33 }
 0x21f   : > { %5822 = vst [vmem:[%s9050_s9 + $0x40] sm:$0xff] %v5778_v1   ;;  %v4804_v60 = vadd.f32 %v9030_v26, %v4765_v47  ;;  %v4298_v54 = vadd.f32 %v6249_v8, %v8995_v36  ;;  %v4763_v39 = vadd.f32 %v4698_v13, %v4293_v21  ;;  %v4833_v10 = vmax.f32 %v4801_v59, 0.0  ;;  %v9420_v13 = vld [vmem:[#allocation8_spill] sm:$0xff] }
 0x220   : > { %v6284_v51 = vpop.f32.mrf.mxu0  ;;  %v4241_v18 = vpop.f32.mrf.mxu1 }
 0x221   : > { %v4836_v6 = vmax.f32 %v4804_v60, 0.0  ;;  %v4768_v27 = vadd.f32 %v6283_v24, %v4298_v54  ;;  %v4296_v50 = vadd.f32 %v4241_v18, %v9415_v48  ;;  %v4802_v53 = vadd.f32 %v9030_v26, %v4763_v39  ;;  %v9422_v24 = vld [vmem:[#allocation9_spill] sm:$0xff] }
 0x222   : > { %v4714_v12 = vpop.f32.mrf.mxu0  ;;  %v6250_v55 = vpop.f32.mrf.mxu1  ;;  %v3577_v32 = vadd.f32 %v9422_v24, %v3218_v44 }
 0x223   : > { %v5793_v36 = vpack.c.bf16 %v4836_v6, %v4835_v3  ;;  %v4766_v46 = vadd.f32 %v4711_v23, %v4296_v50  ;;  %v4299_v14 = vadd.f32 %v6250_v55, %v3573_v31  ;;  %v4834_v19 = vmax.f32 %v4802_v53, 0.0 }
 0x224   : > { %v6287_v16 = vpop.f32.mrf.mxu0  ;;  %v4244_v41 = vpop.f32.mrf.mxu1  ;;  %v4807_v17 = vadd.f32 %v9030_v26, %v4768_v27 }
 0x225   : > { %5825 = vst [vmem:[%s9050_s9 + $0x58] sm:$0xff] %v5793_v36   ;;  %v4769_v7 = vadd.f32 %v6284_v51, %v4299_v14  ;;  %v4297_v43 = vadd.f32 %v4244_v41, %v3571_v52  ;;  %v5788_v22 = vpack.c.bf16 %v4834_v19, %v4833_v10  ;;  %v4805_v4 = vadd.f32 %v9030_v26, %v4766_v46 }
 0x226   : > { %v6253_v61 = vpop.f32.mrf.mxu1  ;;  %v4727_v11 = vpop.f32.mrf.mxu0  ;;  %v4839_v42 = vmax.f32 %v4807_v17, 0.0 }
 0x227   : > { %v4808_v30 = vadd.f32 %v9030_v26, %v4769_v7  ;;  %v4767_v37 = vadd.f32 %v4714_v12, %v4297_v43  ;;  %v4302_v49 = vadd.f32 %v6253_v61, %v9420_v13  ;;  %5824 = vst [vmem:[%s9050_s9 + $0x50] sm:$0xff] %v5788_v22   ;;  %v4837_v40 = vmax.f32 %v4805_v4, 0.0 }
 0x228   : > { %v4257_v5 = vpop.f32.mrf.mxu1  ;;  %v6288_v38 = vpop.f32.mrf.mxu0 }
 0x229   : > { %v4840_v62 = vmax.f32 %v4808_v30, 0.0  ;;  %v4806_v58 = vadd.f32 %v9030_v26, %v4767_v37  ;;  %v4300_v35 = vadd.f32 %v4257_v5, %v9421_v45  ;;  %v4772_v15 = vadd.f32 %v6287_v16, %v4302_v49 }
 0x22a   : > { %v6254_v25 = vpop.f32.mrf.mxu1  ;;  %v4730_v54 = vpop.f32.mrf.mxu0 }
 0x22b   : > { %v5803_v1 = vpack.c.bf16 %v4840_v62, %v4839_v42  ;;  %v4838_v2 = vmax.f32 %v4806_v58, 0.0  ;;  %v4770_v47 = vadd.f32 %v4727_v11, %v4300_v35  ;;  %v4303_v23 = vadd.f32 %v6254_v25, %v3577_v32 }
 0x22c   : > { %v4260_v21 = vpop.f32.mrf.mxu1  ;;  %v4811_v57 = vadd.f32 %v9030_v26, %v4772_v15 }
 0x22d   : > { %5827 = vst [vmem:[%s9050_s9 + $0x68] sm:$0xff] %v5803_v1   ;;  %v5798_v8 = vpack.c.bf16 %v4838_v2, %v4837_v40  ;;  %v4301_v20 = vadd.f32 %v4260_v21, %v3575_v9  ;;  %v4773_v60 = vadd.f32 %v6288_v38, %v4303_v23  ;;  %v4809_v51 = vadd.f32 %v9030_v26, %v4770_v47 }
 0x22e   : > { %v4843_v39 = vmax.f32 %v4811_v57, 0.0 }
 0x22f   : > { %5826 = vst [vmem:[%s9050_s9 + $0x60] sm:$0xff] %v5798_v8   ;;  %v4771_v34 = vadd.f32 %v4730_v54, %v4301_v20  ;;  %v4812_v31 = vadd.f32 %v9030_v26, %v4773_v60  ;;  %v4841_v3 = vmax.f32 %v4809_v51, 0.0 }
 0x231   : > { %v4810_v59 = vadd.f32 %v9030_v26, %v4771_v34  ;;  %v4844_v18 = vmax.f32 %v4812_v31, 0.0 }
 0x233   : > { %v4842_v6 = vmax.f32 %v4810_v59, 0.0  ;;  %v5813_v27 = vpack.c.bf16 %v4844_v18, %v4843_v39 }
 0x235   : > { %v5808_v48 = vpack.c.bf16 %v4842_v6, %v4841_v3  ;;  %5829 = vst [vmem:[%s9050_s9 + $0x78] sm:$0xff] %v5813_v27  }
 0x237   : > { %5828 = vst [vmem:[%s9050_s9 + $0x70] sm:$0xff] %v5808_v48  }
 0x238   : > { %6422 = shalt.err (!%p6419_p5)
}
 0x239   : > { %s6423_s29 = scalar_lea.hbm %s9145_s21, 2048  ;;  %s6427_s5 = scalar_lea.hbm %s9201_s3, 4096 }
 0x23a   : > { %p6424_p6 = scmp.ne.s32.totalorder %s9145_s21, %s6423_s29  ;;  %p6428_p10 = scmp.lt.s32.totalorder %s9145_s21, %s9201_s3 }
 0x23b   : > { %p6429_p11 = scmp.lt.s32.totalorder %s6427_s5, %s6423_s29 }
 0x23c   : > { %p6425_p7 = pnand %p6424_p6, %p6550_p4 }
 0x23d   : > { %p6430_p12 = por %p6429_p11, %p6428_p10 }
 0x23e   : > { %p6426_p9 = pneg %p6425_p7 }
 0x240   : > { %p6431_p13 = pnand %p6430_p12, %p6426_p9 }
 0x242   : > { %6434 = shalt.err (!%p6431_p13)
}
 0x243   : > { %s6488_s8 = smov 64   ;;  %s6489_s9 = smov 4  }
 0x244   : > { %6302 = dma.vmem_to_hbm [thread:$0]  (%p6550_p4), %s9147_s11, 2048, %s9145_s21, %s9153_s15, %s6488_s8, %s6488_s8, %s6489_s9  }
 0x245 PF: > { %p6308_p0 = scmp.ge.s32.totalorder %s6485_s17, 2  ;;  %s5035_s10 = sand.u32 1, %s6465_s12  }
 0x246   : > { %s5036_s18 = scalar_lea.sflag [#allocation3], %s5035_s10 }
 0x247   : > { %p6305_p1 = pnand %p6308_p0, %p6557_p8 }
 0x249   : > { %p6306_p2 = pneg %p6305_p1 }
 0x24b   : > { %6460 = dma.done.wait (%p6306_p2), %s5036_s18, 2048  }
 0x24c   : > { %6462 = vsyncadd (%p6306_p2), %s5036_s18, 4294965248  ;;  %s16_s17 = sadd.s32 1, %s6485_s17   ;;  %s9424_s12 = smov %s6469_s13 }
 0x24d   : > { %p13_p3 = scmp.ge.s32.totalorder %s16_s17, 4   ;;  %s9425_s13 = smov %s6473_s14 }
 0x24e   : > { %s9426_s14 = smov %s6563_s25  ;;  %s9427_s15 = smov %s6481_s16 }
 0x24f   : > { %s9428_s16 = smov %s9430_s20  ;;  %15 = sbr.rel (!%p13_p3) target bundleno = 4 (0x4), region = 83 }
 0x254   :  { %5041 = vsyncpa [#allocation3], 1 }
 0x255   :  { %5043 = vsyncpa [#allocation3 + $0x1], 1 }

</bundles_post_ra>
